<compile_context>
chip_gen: v6e
topology: v6e:2x2x1
jax: 0.10.0
libtpu: 0.0.40
codegen_flags: <defaults>
</compile_context>

<pallas_src>
import math
import jax
import jax.numpy as jnp
from jax import lax
from jax.experimental import pallas as pl
from jax.experimental.pallas import tpu as pltpu

INPUT_SIZE = 63
INPUT_PAD = 64          # zero-pad feature dim 63 -> 64 for clean tiling
HIDDEN1 = 256
HIDDEN2 = 128
SEQ_LEN = 30            # fc expects hidden_size2 * 30 features
NUM_CLASSES = 12        # len(class_names)
BP = 8                  # batch padded to one sublane group


# ---------------------------------------------------------------------------
# Fused kernel: gru1 (T steps) -> gru2 (T steps) -> fc head, all in VMEM.
# ---------------------------------------------------------------------------
def _gru_fused_kernel(x_ref,                       # (T*BP, INPUT_PAD) bf16
                      w1_ih_ref, w1_hh_ref,        # (IP, 3H1), (H1, 3H1) bf16
                      b1_ref, b1_hn_ref,           # (1, 3H1), (1, H1)  f32
                      w2_ih_ref, w2_hh_ref,        # (H1, 3H2), (H2, 3H2) bf16
                      b2_ref, b2_hn_ref,           # (1, 3H2), (1, H2)  f32
                      fcw_ref, fcb_ref,            # (T*H2, C) bf16, (1, C) f32
                      out_ref,                     # (BP, C) f32
                      gi1_scr,                     # (T*BP, 3H1) f32
                      h1_scr,                      # (T*BP, H1)  f32
                      gi2_scr,                     # (T*BP, 3H2) f32
                      feat_scr):                   # (BP, T*H2)  f32
    H1 = w1_hh_ref.shape[0]
    H2 = w2_hh_ref.shape[0]
    bp = out_ref.shape[0]
    T = gi1_scr.shape[0] // bp

    # ---------------- layer 1: hoisted input projection (one matmul) --------
    gi1_scr[...] = (
        jnp.dot(x_ref[...], w1_ih_ref[...], preferred_element_type=jnp.float32)
        + b1_ref[...]
    )

    b1_hn = b1_hn_ref[...]                         # (1, H1)

    def step1(t, h):                               # h: (BP, H1) f32, lives in vregs
        base = pl.multiple_of(t * bp, bp)
        gi = gi1_scr[pl.ds(base, bp), :]           # (BP, 3H1)
        gh = jnp.dot(h.astype(jnp.bfloat16), w1_hh_ref[...],
                     preferred_element_type=jnp.float32)
        r = jax.nn.sigmoid(gi[:, :H1] + gh[:, :H1])
        z = jax.nn.sigmoid(gi[:, H1:2 * H1] + gh[:, H1:2 * H1])
        n = jnp.tanh(gi[:, 2 * H1:] + r * (gh[:, 2 * H1:] + b1_hn))
        h_new = n + z * (h - n)
        h1_scr[pl.ds(base, bp), :] = h_new         # sublane-aligned store
        return h_new

    lax.fori_loop(0, T, step1, jnp.zeros((bp, H1), jnp.float32))

    # ---------------- layer 2: hoisted input projection over all timesteps --
    gi2_scr[...] = (
        jnp.dot(h1_scr[...].astype(jnp.bfloat16), w2_ih_ref[...],
                preferred_element_type=jnp.float32)
        + b2_ref[...]
    )

    b2_hn = b2_hn_ref[...]                         # (1, H2)

    def step2(t, h):                               # h: (BP, H2) f32
        base = pl.multiple_of(t * bp, bp)
        gi = gi2_scr[pl.ds(base, bp), :]           # (BP, 3H2)
        gh = jnp.dot(h.astype(jnp.bfloat16), w2_hh_ref[...],
                     preferred_element_type=jnp.float32)
        r = jax.nn.sigmoid(gi[:, :H2] + gh[:, :H2])
        z = jax.nn.sigmoid(gi[:, H2:2 * H2] + gh[:, H2:2 * H2])
        n = jnp.tanh(gi[:, 2 * H2:] + r * (gh[:, 2 * H2:] + b2_hn))
        h_new = n + z * (h - n)
        # feat[b, t*H2 + j] = h2[t, b, j]  == torch out.reshape(B, -1) layout
        feat_scr[:, pl.ds(pl.multiple_of(t * H2, H2), H2)] = h_new
        return h_new

    lax.fori_loop(0, T, step2, jnp.zeros((bp, H2), jnp.float32))

    # ---------------- fused FC head ------------------------------------------
    out_ref[...] = (
        jnp.dot(feat_scr[...].astype(jnp.bfloat16), fcw_ref[...],
                preferred_element_type=jnp.float32)
        + fcb_ref[...]
    ).astype(out_ref.dtype)


def _full_spec(shape):
    return pl.BlockSpec(shape, lambda i, _n=len(shape): (0,) * _n)


def _fused_forward(x_flat, p):
    TB = x_flat.shape[0]
    C = p["fc_w_t"].shape[1]
    args = (x_flat,
            p["gru1"][0], p["gru1"][1], p["gru1"][2], p["gru1"][3],
            p["gru2"][0], p["gru2"][1], p["gru2"][2], p["gru2"][3],
            p["fc_w_t"], p["fc_b"])
    return pl.pallas_call(
        _gru_fused_kernel,
        out_shape=jax.ShapeDtypeStruct((BP, C), jnp.float32),
        grid=(1,),
        in_specs=[_full_spec(a.shape) for a in args],
        out_specs=_full_spec((BP, C)),
        scratch_shapes=[
            pltpu.VMEM((TB, 3 * HIDDEN1), jnp.float32),   # gi1
            pltpu.VMEM((TB, HIDDEN1), jnp.float32),       # h1 (all timesteps)
            pltpu.VMEM((TB, 3 * HIDDEN2), jnp.float32),   # gi2
            pltpu.VMEM((BP, SEQ_LEN * HIDDEN2), jnp.float32),  # flattened features
        ],
        compiler_params=pltpu.CompilerParams(
            dimension_semantics=("arbitrary",)),
    )(*args)


# ---------------------------------------------------------------------------
# Parameter init (deterministic, PyTorch-style uniform ranges), pre-laid-out
# for the kernel: transposed weights in bf16, folded r/z biases in f32.
# ---------------------------------------------------------------------------
def _init_gru_layer(key, input_size, hidden_size, pad_input_to=None):
    H = hidden_size
    k = 1.0 / math.sqrt(H)
    ks = jax.random.split(key, 4)
    w_ih = jax.random.uniform(ks[0], (3 * H, input_size), jnp.float32, -k, k)
    w_hh = jax.random.uniform(ks[1], (3 * H, H), jnp.float32, -k, k)
    b_ih = jax.random.uniform(ks[2], (3 * H,), jnp.float32, -k, k)
    b_hh = jax.random.uniform(ks[3], (3 * H,), jnp.float32, -k, k)

    w_ih_t = w_ih.T                                  # (I, 3H)
    if pad_input_to is not None and pad_input_to > input_size:
        w_ih_t = jnp.zeros((pad_input_to, 3 * H), jnp.float32).at[:input_size].set(w_ih_t)
    w_hh_t = w_hh.T                                  # (H, 3H)
    # fold b_hr/b_hz into the input-side bias; keep b_hn separate (inside r*(...))
    b_comb = jnp.concatenate([b_ih[:2 * H] + b_hh[:2 * H], b_ih[2 * H:]])[None, :]
    b_hn = b_hh[2 * H:][None, :]
    return (w_ih_t.astype(jnp.bfloat16), w_hh_t.astype(jnp.bfloat16),
            b_comb.astype(jnp.float32), b_hn.astype(jnp.float32))


def init_params(seed=0):
    key = jax.random.PRNGKey(seed)
    k1, k2, k3, k4 = jax.random.split(key, 4)
    gru1 = _init_gru_layer(k1, INPUT_SIZE, HIDDEN1, pad_input_to=INPUT_PAD)
    gru2 = _init_gru_layer(k2, HIDDEN1, HIDDEN2)
    fan_in = HIDDEN2 * SEQ_LEN
    kf = 1.0 / math.sqrt(fan_in)
    fc_w = jax.random.uniform(k3, (NUM_CLASSES, fan_in), jnp.float32, -kf, kf)
    fc_b = jax.random.uniform(k4, (NUM_CLASSES,), jnp.float32, -kf, kf)
    return {"gru1": gru1, "gru2": gru2,
            "fc_w_t": fc_w.T.astype(jnp.bfloat16),
            "fc_b": fc_b[None, :].astype(jnp.float32)}


# ---------------------------------------------------------------------------
# Full forward pass (dropout layers are identity at inference).
# ---------------------------------------------------------------------------
@jax.jit
def gru_model_forward(params, x_bti):
    B, T, I = x_bti.shape
    assert T == SEQ_LEN and I == INPUT_SIZE and B <= BP
    # TODO(synk): for B > 8, add a batch grid axis marked "parallel" (v7x: 2 TCs).
    x_tbi = jnp.transpose(x_bti, (1, 0, 2))                       # (T, B, I)
    x_pad = jnp.zeros((T, BP, INPUT_PAD), jnp.float32)
    x_pad = x_pad.at[:, :B, :I].set(x_tbi)                        # pad batch & feat
    x_flat = x_pad.reshape(T * BP, INPUT_PAD).astype(jnp.bfloat16)
    out = _fused_forward(x_flat, params)                          # (BP, C)
    return out[:B]                                                # (B, num_classes)


if __name__ == "__main__":
    params = init_params(seed=0)
    x = jax.random.normal(jax.random.PRNGKey(0), (2, SEQ_LEN, INPUT_SIZE), jnp.float32)
    logits = gru_model_forward(params, x)
    jax.block_until_ready(logits)
    assert logits.shape == (2, NUM_CLASSES)
    assert bool(jnp.all(jnp.isfinite(logits)))
    print("KERNEL_OK")
</pallas_src>

<mosaic_0001>
module attributes {stable_mosaic.version = 11 : i64} {
  func.func @_gru_fused_kernel(%arg0: i32, %arg1: memref<240x64xbf16, #tpu.memory_space<vmem>>, %arg2: memref<64x768xbf16, #tpu.memory_space<vmem>>, %arg3: memref<256x768xbf16, #tpu.memory_space<vmem>>, %arg4: memref<1x768xf32, #tpu.memory_space<vmem>>, %arg5: memref<1x256xf32, #tpu.memory_space<vmem>>, %arg6: memref<256x384xbf16, #tpu.memory_space<vmem>>, %arg7: memref<128x384xbf16, #tpu.memory_space<vmem>>, %arg8: memref<1x384xf32, #tpu.memory_space<vmem>>, %arg9: memref<1x128xf32, #tpu.memory_space<vmem>>, %arg10: memref<3840x12xbf16, #tpu.memory_space<vmem>>, %arg11: memref<1x12xf32, #tpu.memory_space<vmem>>, %arg12: memref<8x12xf32, #tpu.memory_space<vmem>>, %arg13: memref<240x768xf32, #tpu.memory_space<vmem>>, %arg14: memref<240x256xf32, #tpu.memory_space<vmem>>, %arg15: memref<240x384xf32, #tpu.memory_space<vmem>>, %arg16: memref<8x3840xf32, #tpu.memory_space<vmem>>) attributes {dimension_semantics = [#tpu.dimension_semantics<arbitrary>], iteration_bounds = array<i64: 1>, scalar_prefetch = 0 : i64, scratch_operands = 4 : i64, tpu.core_type = #tpu.core_type<tc>, window_params = [{pipeline_mode = #tpu.pipeline_mode<synchronous>, transform_indices = @transform_0, window_bounds = array<i64: 240, 64>}, {pipeline_mode = #tpu.pipeline_mode<synchronous>, transform_indices = @transform_1, window_bounds = array<i64: 64, 768>}, {pipeline_mode = #tpu.pipeline_mode<synchronous>, transform_indices = @transform_2, window_bounds = array<i64: 256, 768>}, {pipeline_mode = #tpu.pipeline_mode<synchronous>, transform_indices = @transform_3, window_bounds = array<i64: 1, 768>}, {pipeline_mode = #tpu.pipeline_mode<synchronous>, transform_indices = @transform_4, window_bounds = array<i64: 1, 256>}, {pipeline_mode = #tpu.pipeline_mode<synchronous>, transform_indices = @transform_5, window_bounds = array<i64: 256, 384>}, {pipeline_mode = #tpu.pipeline_mode<synchronous>, transform_indices = @transform_6, window_bounds = array<i64: 128, 384>}, {pipeline_mode = #tpu.pipeline_mode<synchronous>, transform_indices = @transform_7, window_bounds = array<i64: 1, 384>}, {pipeline_mode = #tpu.pipeline_mode<synchronous>, transform_indices = @transform_8, window_bounds = array<i64: 1, 128>}, {pipeline_mode = #tpu.pipeline_mode<synchronous>, transform_indices = @transform_9, window_bounds = array<i64: 3840, 12>}, {pipeline_mode = #tpu.pipeline_mode<synchronous>, transform_indices = @transform_10, window_bounds = array<i64: 1, 12>}, {pipeline_mode = #tpu.pipeline_mode<synchronous>, transform_indices = @transform_11, window_bounds = array<i64: 8, 12>}]} {
    %c0 = arith.constant 0 : index
    %c0_0 = arith.constant 0 : index
    %0 = vector.load %arg1[%c0, %c0_0] : memref<240x64xbf16, #tpu.memory_space<vmem>>, vector<240x64xbf16>
    %c0_1 = arith.constant 0 : index
    %c0_2 = arith.constant 0 : index
    %1 = vector.load %arg2[%c0_1, %c0_2] : memref<64x768xbf16, #tpu.memory_space<vmem>>, vector<64x768xbf16>
    %cst = arith.constant dense<0.000000e+00> : vector<240x768xf32>
    %2 = tpu.matmul %0, %1, %cst {dimension_numbers = #tpu.dot_dimension_numbers<[1], [0], [0], [1], [0, 0, 1, 1], [], []>} : vector<240x64xbf16>, vector<64x768xbf16>, vector<240x768xf32> -> vector<240x768xf32>
    %c0_3 = arith.constant 0 : index
    %c0_4 = arith.constant 0 : index
    %3 = vector.load %arg4[%c0_3, %c0_4] : memref<1x768xf32, #tpu.memory_space<vmem>>, vector<1x768xf32>
    %4 = vector.broadcast %3 : vector<1x768xf32> to vector<240x768xf32>
    %5 = arith.addf %2, %4 : vector<240x768xf32>
    %c0_5 = arith.constant 0 : index
    %c0_6 = arith.constant 0 : index
    %6 = vector.load %arg13[%c0_5, %c0_6] : memref<240x768xf32, #tpu.memory_space<vmem>>, vector<240x768xf32>
    tpu.vector_store %arg13[%c0_5, %c0_6], %5 {strides = array<i32>} : memref<240x768xf32, #tpu.memory_space<vmem>>, vector<240x768xf32>,
    %c0_7 = arith.constant 0 : index
    %c0_8 = arith.constant 0 : index
    %7 = vector.load %arg5[%c0_7, %c0_8] : memref<1x256xf32, #tpu.memory_space<vmem>>, vector<1x256xf32>
    %cst_9 = arith.constant 0.000000e+00 : f32
    %8 = vector.broadcast %cst_9 : f32 to vector<8x256xf32>
    %c0_i32 = arith.constant 0 : i32
    %c30_i32 = arith.constant 30 : i32
    %9 = arith.addi %c0_i32, %c30_i32 : i32
    %c1_i32 = arith.constant 1 : i32
    %10 = scf.for %arg17 = %c0_i32 to %9 step %c1_i32 iter_args(%arg18 = %8) -> (vector<8x256xf32>)  : i32 {
      %c8_i32 = arith.constant 8 : i32
      %31 = arith.muli %arg17, %c8_i32 : i32
      %32 = tpu.assume_multiple %31, 8 : i32
      %33 = arith.index_cast %32 : i32 to index
      %c0_36 = arith.constant 0 : index
      %34 = vector.load %arg13[%33, %c0_36] : memref<240x768xf32, #tpu.memory_space<vmem>>, vector<8x768xf32>
      %35 = arith.truncf %arg18 : vector<8x256xf32> to vector<8x256xbf16>
      %c0_37 = arith.constant 0 : index
      %c0_38 = arith.constant 0 : index
      %36 = vector.load %arg3[%c0_37, %c0_38] : memref<256x768xbf16, #tpu.memory_space<vmem>>, vector<256x768xbf16>
      %cst_39 = arith.constant dense<0.000000e+00> : vector<8x768xf32>
      %37 = tpu.matmul %35, %36, %cst_39 {dimension_numbers = #tpu.dot_dimension_numbers<[1], [0], [0], [1], [0, 0, 1, 1], [], []>} : vector<8x256xbf16>, vector<256x768xbf16>, vector<8x768xf32> -> vector<8x768xf32>
      %38 = vector.extract_strided_slice %34 {offsets = [0, 0], sizes = [8, 256], strides = [1, 1]} : vector<8x768xf32> to vector<8x256xf32>
      %39 = vector.extract_strided_slice %37 {offsets = [0, 0], sizes = [8, 256], strides = [1, 1]} : vector<8x768xf32> to vector<8x256xf32>
      %40 = arith.addf %38, %39 : vector<8x256xf32>
      %41 = arith.negf %40 : vector<8x256xf32>
      %42 = math.exp %41 : vector<8x256xf32>
      %cst_40 = arith.constant 1.000000e+00 : f32
      %43 = vector.broadcast %cst_40 : f32 to vector<8x256xf32>
      %44 = arith.addf %43, %42 : vector<8x256xf32>
      %45 = arith.divf %43, %44 : vector<8x256xf32>
      %46 = vector.extract_strided_slice %34 {offsets = [0, 256], sizes = [8, 256], strides = [1, 1]} : vector<8x768xf32> to vector<8x256xf32>
      %47 = vector.extract_strided_slice %37 {offsets = [0, 256], sizes = [8, 256], strides = [1, 1]} : vector<8x768xf32> to vector<8x256xf32>
      %48 = arith.addf %46, %47 : vector<8x256xf32>
      %49 = arith.negf %48 : vector<8x256xf32>
      %50 = math.exp %49 : vector<8x256xf32>
      %cst_41 = arith.constant 1.000000e+00 : f32
      %51 = vector.broadcast %cst_41 : f32 to vector<8x256xf32>
      %52 = arith.addf %51, %50 : vector<8x256xf32>
      %53 = arith.divf %51, %52 : vector<8x256xf32>
      %54 = vector.extract_strided_slice %34 {offsets = [0, 512], sizes = [8, 256], strides = [1, 1]} : vector<8x768xf32> to vector<8x256xf32>
      %55 = vector.extract_strided_slice %37 {offsets = [0, 512], sizes = [8, 256], strides = [1, 1]} : vector<8x768xf32> to vector<8x256xf32>
      %56 = vector.broadcast %7 : vector<1x256xf32> to vector<8x256xf32>
      %57 = arith.addf %55, %56 : vector<8x256xf32>
      %58 = arith.mulf %45, %57 : vector<8x256xf32>
      %59 = arith.addf %54, %58 : vector<8x256xf32>
      %60 = math.tanh %59 : vector<8x256xf32>
      %61 = arith.subf %arg18, %60 : vector<8x256xf32>
      %62 = arith.mulf %53, %61 : vector<8x256xf32>
      %63 = arith.addf %60, %62 : vector<8x256xf32>
      %64 = arith.index_cast %32 : i32 to index
      %c0_42 = arith.constant 0 : index
      %65 = vector.load %arg14[%64, %c0_42] : memref<240x256xf32, #tpu.memory_space<vmem>>, vector<8x256xf32>
      tpu.vector_store %arg14[%64, %c0_42], %63 {strides = array<i32>} : memref<240x256xf32, #tpu.memory_space<vmem>>, vector<8x256xf32>,
      scf.yield %63 : vector<8x256xf32>
    }
    %c30_i32_10 = arith.constant 30 : i32
    %c0_11 = arith.constant 0 : index
    %c0_12 = arith.constant 0 : index
    %11 = vector.load %arg14[%c0_11, %c0_12] : memref<240x256xf32, #tpu.memory_space<vmem>>, vector<240x256xf32>
    %12 = arith.truncf %11 : vector<240x256xf32> to vector<240x256xbf16>
    %c0_13 = arith.constant 0 : index
    %c0_14 = arith.constant 0 : index
    %13 = vector.load %arg6[%c0_13, %c0_14] : memref<256x384xbf16, #tpu.memory_space<vmem>>, vector<256x384xbf16>
    %cst_15 = arith.constant dense<0.000000e+00> : vector<240x384xf32>
    %14 = tpu.matmul %12, %13, %cst_15 {dimension_numbers = #tpu.dot_dimension_numbers<[1], [0], [0], [1], [0, 0, 1, 1], [], []>} : vector<240x256xbf16>, vector<256x384xbf16>, vector<240x384xf32> -> vector<240x384xf32>
    %c0_16 = arith.constant 0 : index
    %c0_17 = arith.constant 0 : index
    %15 = vector.load %arg8[%c0_16, %c0_17] : memref<1x384xf32, #tpu.memory_space<vmem>>, vector<1x384xf32>
    %16 = vector.broadcast %15 : vector<1x384xf32> to vector<240x384xf32>
    %17 = arith.addf %14, %16 : vector<240x384xf32>
    %c0_18 = arith.constant 0 : index
    %c0_19 = arith.constant 0 : index
    %18 = vector.load %arg15[%c0_18, %c0_19] : memref<240x384xf32, #tpu.memory_space<vmem>>, vector<240x384xf32>
    tpu.vector_store %arg15[%c0_18, %c0_19], %17 {strides = array<i32>} : memref<240x384xf32, #tpu.memory_space<vmem>>, vector<240x384xf32>,
    %c0_20 = arith.constant 0 : index
    %c0_21 = arith.constant 0 : index
    %19 = vector.load %arg9[%c0_20, %c0_21] : memref<1x128xf32, #tpu.memory_space<vmem>>, vector<1x128xf32>
    %cst_22 = arith.constant 0.000000e+00 : f32
    %20 = vector.broadcast %cst_22 : f32 to vector<8x128xf32>
    %c0_i32_23 = arith.constant 0 : i32
    %c30_i32_24 = arith.constant 30 : i32
    %21 = arith.addi %c0_i32_23, %c30_i32_24 : i32
    %c1_i32_25 = arith.constant 1 : i32
    %22 = scf.for %arg17 = %c0_i32_23 to %21 step %c1_i32_25 iter_args(%arg18 = %20) -> (vector<8x128xf32>)  : i32 {
      %c8_i32 = arith.constant 8 : i32
      %31 = arith.muli %arg17, %c8_i32 : i32
      %32 = tpu.assume_multiple %31, 8 : i32
      %33 = arith.index_cast %32 : i32 to index
      %c0_36 = arith.constant 0 : index
      %34 = vector.load %arg15[%33, %c0_36] : memref<240x384xf32, #tpu.memory_space<vmem>>, vector<8x384xf32>
      %35 = arith.truncf %arg18 : vector<8x128xf32> to vector<8x128xbf16>
      %c0_37 = arith.constant 0 : index
      %c0_38 = arith.constant 0 : index
      %36 = vector.load %arg7[%c0_37, %c0_38] : memref<128x384xbf16, #tpu.memory_space<vmem>>, vector<128x384xbf16>
      %cst_39 = arith.constant dense<0.000000e+00> : vector<8x384xf32>
      %37 = tpu.matmul %35, %36, %cst_39 {dimension_numbers = #tpu.dot_dimension_numbers<[1], [0], [0], [1], [0, 0, 1, 1], [], []>} : vector<8x128xbf16>, vector<128x384xbf16>, vector<8x384xf32> -> vector<8x384xf32>
      %38 = vector.extract_strided_slice %34 {offsets = [0, 0], sizes = [8, 128], strides = [1, 1]} : vector<8x384xf32> to vector<8x128xf32>
      %39 = vector.extract_strided_slice %37 {offsets = [0, 0], sizes = [8, 128], strides = [1, 1]} : vector<8x384xf32> to vector<8x128xf32>
      %40 = arith.addf %38, %39 : vector<8x128xf32>
      %41 = arith.negf %40 : vector<8x128xf32>
      %42 = math.exp %41 : vector<8x128xf32>
      %cst_40 = arith.constant 1.000000e+00 : f32
      %43 = vector.broadcast %cst_40 : f32 to vector<8x128xf32>
      %44 = arith.addf %43, %42 : vector<8x128xf32>
      %45 = arith.divf %43, %44 : vector<8x128xf32>
      %46 = vector.extract_strided_slice %34 {offsets = [0, 128], sizes = [8, 128], strides = [1, 1]} : vector<8x384xf32> to vector<8x128xf32>
      %47 = vector.extract_strided_slice %37 {offsets = [0, 128], sizes = [8, 128], strides = [1, 1]} : vector<8x384xf32> to vector<8x128xf32>
      %48 = arith.addf %46, %47 : vector<8x128xf32>
      %49 = arith.negf %48 : vector<8x128xf32>
      %50 = math.exp %49 : vector<8x128xf32>
      %cst_41 = arith.constant 1.000000e+00 : f32
      %51 = vector.broadcast %cst_41 : f32 to vector<8x128xf32>
      %52 = arith.addf %51, %50 : vector<8x128xf32>
      %53 = arith.divf %51, %52 : vector<8x128xf32>
      %54 = vector.extract_strided_slice %34 {offsets = [0, 256], sizes = [8, 128], strides = [1, 1]} : vector<8x384xf32> to vector<8x128xf32>
      %55 = vector.extract_strided_slice %37 {offsets = [0, 256], sizes = [8, 128], strides = [1, 1]} : vector<8x384xf32> to vector<8x128xf32>
      %56 = vector.broadcast %19 : vector<1x128xf32> to vector<8x128xf32>
      %57 = arith.addf %55, %56 : vector<8x128xf32>
      %58 = arith.mulf %45, %57 : vector<8x128xf32>
      %59 = arith.addf %54, %58 : vector<8x128xf32>
      %60 = math.tanh %59 : vector<8x128xf32>
      %61 = arith.subf %arg18, %60 : vector<8x128xf32>
      %62 = arith.mulf %53, %61 : vector<8x128xf32>
      %63 = arith.addf %60, %62 : vector<8x128xf32>
      %c128_i32 = arith.constant 128 : i32
      %64 = arith.muli %arg17, %c128_i32 : i32
      %65 = tpu.assume_multiple %64, 128 : i32
      %c0_42 = arith.constant 0 : index
      %66 = arith.index_cast %65 : i32 to index
      %67 = vector.load %arg16[%c0_42, %66] : memref<8x3840xf32, #tpu.memory_space<vmem>>, vector<8x128xf32>
      tpu.vector_store %arg16[%c0_42, %66], %63 {strides = array<i32>} : memref<8x3840xf32, #tpu.memory_space<vmem>>, vector<8x128xf32>,
      scf.yield %63 : vector<8x128xf32>
    }
    %c30_i32_26 = arith.constant 30 : i32
    %c0_27 = arith.constant 0 : index
    %c0_28 = arith.constant 0 : index
    %23 = vector.load %arg16[%c0_27, %c0_28] : memref<8x3840xf32, #tpu.memory_space<vmem>>, vector<8x3840xf32>
    %24 = arith.truncf %23 : vector<8x3840xf32> to vector<8x3840xbf16>
    %c0_29 = arith.constant 0 : index
    %c0_30 = arith.constant 0 : index
    %25 = vector.load %arg10[%c0_29, %c0_30] : memref<3840x12xbf16, #tpu.memory_space<vmem>>, vector<3840x12xbf16>
    %cst_31 = arith.constant dense<0.000000e+00> : vector<8x12xf32>
    %26 = tpu.matmul %24, %25, %cst_31 {dimension_numbers = #tpu.dot_dimension_numbers<[1], [0], [0], [1], [0, 0, 1, 1], [], []>} : vector<8x3840xbf16>, vector<3840x12xbf16>, vector<8x12xf32> -> vector<8x12xf32>
    %c0_32 = arith.constant 0 : index
    %c0_33 = arith.constant 0 : index
    %27 = vector.load %arg11[%c0_32, %c0_33] : memref<1x12xf32, #tpu.memory_space<vmem>>, vector<1x12xf32>
    %28 = vector.broadcast %27 : vector<1x12xf32> to vector<8x12xf32>
    %29 = arith.addf %26, %28 : vector<8x12xf32>
    %c0_34 = arith.constant 0 : index
    %c0_35 = arith.constant 0 : index
    %30 = vector.load %arg12[%c0_34, %c0_35] : memref<8x12xf32, #tpu.memory_space<vmem>>, vector<8x12xf32>
    tpu.vector_store %arg12[%c0_34, %c0_35], %29 {strides = array<i32>} : memref<8x12xf32, #tpu.memory_space<vmem>>, vector<8x12xf32>,
    return
  }
  func.func @transform_0(%arg0: i32) -> (i32, i32) {
    %c0_i32 = arith.constant 0 : i32
    %c0_i32_0 = arith.constant 0 : i32
    %c0_i32_1 = arith.constant 0 : i32
    return %c0_i32, %c0_i32_0 : i32, i32
  }
  func.func @transform_1(%arg0: i32) -> (i32, i32) {
    %c0_i32 = arith.constant 0 : i32
    %c0_i32_0 = arith.constant 0 : i32
    %c0_i32_1 = arith.constant 0 : i32
    return %c0_i32, %c0_i32_0 : i32, i32
  }
  func.func @transform_2(%arg0: i32) -> (i32, i32) {
    %c0_i32 = arith.constant 0 : i32
    %c0_i32_0 = arith.constant 0 : i32
    %c0_i32_1 = arith.constant 0 : i32
    return %c0_i32, %c0_i32_0 : i32, i32
  }
  func.func @transform_3(%arg0: i32) -> (i32, i32) {
    %c0_i32 = arith.constant 0 : i32
    %c0_i32_0 = arith.constant 0 : i32
    %c0_i32_1 = arith.constant 0 : i32
    return %c0_i32, %c0_i32_0 : i32, i32
  }
  func.func @transform_4(%arg0: i32) -> (i32, i32) {
    %c0_i32 = arith.constant 0 : i32
    %c0_i32_0 = arith.constant 0 : i32
    %c0_i32_1 = arith.constant 0 : i32
    return %c0_i32, %c0_i32_0 : i32, i32
  }
  func.func @transform_5(%arg0: i32) -> (i32, i32) {
    %c0_i32 = arith.constant 0 : i32
    %c0_i32_0 = arith.constant 0 : i32
    %c0_i32_1 = arith.constant 0 : i32
    return %c0_i32, %c0_i32_0 : i32, i32
  }
  func.func @transform_6(%arg0: i32) -> (i32, i32) {
    %c0_i32 = arith.constant 0 : i32
    %c0_i32_0 = arith.constant 0 : i32
    %c0_i32_1 = arith.constant 0 : i32
    return %c0_i32, %c0_i32_0 : i32, i32
  }
  func.func @transform_7(%arg0: i32) -> (i32, i32) {
    %c0_i32 = arith.constant 0 : i32
    %c0_i32_0 = arith.constant 0 : i32
    %c0_i32_1 = arith.constant 0 : i32
    return %c0_i32, %c0_i32_0 : i32, i32
  }
  func.func @transform_8(%arg0: i32) -> (i32, i32) {
    %c0_i32 = arith.constant 0 : i32
    %c0_i32_0 = arith.constant 0 : i32
    %c0_i32_1 = arith.constant 0 : i32
    return %c0_i32, %c0_i32_0 : i32, i32
  }
  func.func @transform_9(%arg0: i32) -> (i32, i32) {
    %c0_i32 = arith.constant 0 : i32
    %c0_i32_0 = arith.constant 0 : i32
    %c0_i32_1 = arith.constant 0 : i32
    return %c0_i32, %c0_i32_0 : i32, i32
  }
  func.func @transform_10(%arg0: i32) -> (i32, i32) {
    %c0_i32 = arith.constant 0 : i32
    %c0_i32_0 = arith.constant 0 : i32
    %c0_i32_1 = arith.constant 0 : i32
    return %c0_i32, %c0_i32_0 : i32, i32
  }
  func.func @transform_11(%arg0: i32) -> (i32, i32) {
    %c0_i32 = arith.constant 0 : i32
    %c0_i32_0 = arith.constant 0 : i32
    %c0_i32_1 = arith.constant 0 : i32
    return %c0_i32, %c0_i32_0 : i32, i32
  }
}

</mosaic_0001>

<bundles_post_ra>
// kernel: gru_model_forward.1
= control target key start
LH: loop header
LB: loop body
LE: loop exit
PB: predicated region body
PF: predicated region fallthrough
CT: control target
= control target key end

     0   :  { %v7269_v1 = vmov 0   ;;  %vm320_vm0 = vcmask 523264   ;;  %v95_v40 = vlaneseq  ;;  %s9223_s1 = inlined_call_operand.vmem [shape: bf16[64,768], index: 1, kind: input, shape index: {}]   ;;  %s9224_s2 = inlined_call_operand.vmem [shape: bf16[256,768], index: 2, kind: input, shape index: {}]   ;;  %s9225_s5 = inlined_call_operand.vmem [shape: bf16[256,384], index: 5, kind: input, shape index: {}]   ;;  %s9226_s6 = inlined_call_operand.vmem [shape: bf16[128,384], index: 6, kind: input, shape index: {}]   ;;  %s9227_s7 = inlined_call_operand.vmem [shape: f32[1,384], index: 7, kind: input, shape index: {}]   ;;  %s9228_s8 = inlined_call_operand.vmem [shape: f32[1,128], index: 8, kind: input, shape index: {}]   ;;  %s9229_s9 = inlined_call_operand.vmem [shape: bf16[3840,12], index: 9, kind: input, shape index: {}]   ;;  %s9230_s10 = inlined_call_operand.vmem [shape: f32[1,12], index: 10, kind: input, shape index: {}]   ;;  %s9231_s11 = inlined_call_operand.vmem [shape: f32[8,12], index: 11, kind: output, shape index: {}]   ;;  %s9232_s0 = inlined_call_operand.vmem [shape: bf16[240,64], index: 0, kind: input, shape index: {}]   ;;  %s9233_s3 = inlined_call_operand.vmem [shape: f32[1,768], index: 3, kind: input, shape index: {}]   ;;  %s9234_s4 = inlined_call_operand.vmem [shape: f32[1,256], index: 4, kind: input, shape index: {}]  }
   0x1   :  { %v6668_v0 = vld [vmem:[%s9223_s1 + $0x94] ss:$24 sps:$4 sm:$0xff]   ;;  %398 = vmatprep.mubr.bf16.mxu0 %v7269_v1  ;;  %478 = vmatprep.mubr.bf16.mxu1 %v7269_v1  ;;  %v6670_v2 = vld [vmem:[%s9223_s1 + $0x90] ss:$24 sps:$4 sm:$0xff]   ;;  %v6671_v3 = vld [vmem:[%s9223_s1 + $0x64] ss:$24 sps:$4 sm:$0xff]  }
   0x2   :  { %374 = vmatprep.subr.bf16.mxu0 %v6668_v0  ;;  %6616 = vmatprep.subr.bf16.mxu1 %v6668_v0  ;;  %v6673_v4 = vld [vmem:[%s9223_s1 + $0x60] ss:$24 sps:$4 sm:$0xff]   ;;  %v6674_v5 = vld [vmem:[%s9223_s1 + $0x34] ss:$24 sps:$4 sm:$0xff]   ;;  %v6676_v6 = vld [vmem:[%s9223_s1 + $0x30] ss:$24 sps:$4 sm:$0xff]  }
   0x3   :  { %375 = vmatpush1.bf16.msra.mxu0 %v6670_v2  ;;  %6620 = vmatpush1.bf16.msra.mxu1 %v6670_v2  ;;  %v6677_v7 = vld [vmem:[%s9223_s1 + $0x4] ss:$24 sps:$4 sm:$0xff]   ;;  %v6679_v8 = vld [vmem:[%s9223_s1] ss:$24 sps:$4 sm:$0xff]   ;;  %v6693_v15 = vld [vmem:[%s9223_s1 + $0x74] ss:$24 sps:$4 sm:$0xff]  }
   0x4   :  { %376 = vmatprep.subr.bf16.mxu0 %v6671_v3  ;;  %6617 = vmatprep.subr.bf16.mxu1 %v6671_v3  ;;  %v6683_v9 = vld [vmem:[%s9223_s1 + $0xa4] ss:$24 sps:$4 sm:$0xff]   ;;  %v6681_v13 = vld [vmem:[%s9223_s1 + $0xa0] ss:$24 sps:$4 sm:$0xff]   ;;  %v6691_v17 = vld [vmem:[%s9223_s1 + $0x70] ss:$24 sps:$4 sm:$0xff]  }
   0x5   :  { %v6688_v10 = vld [vmem:[%s9223_s1 + $0x9c] ss:$24 sps:$4 sm:$0xff]   ;;  %v7368_v11 = vld [vmem:[%s9232_s0] sm:$0xff]   ;;  %v6686_v14 = vld [vmem:[%s9223_s1 + $0x98] ss:$24 sps:$4 sm:$0xff]   ;;  %v7585_v41 = vshrl.u32 %v95_v40, 7 }
   0x6   :  { %v7373_v12 = vld [vmem:[%s9232_s0 + $0x40] sm:$0xff]   ;;  %v7398_v18 = vld [vmem:[%s9232_s0 + $0x8] sm:$0xff]   ;;  %v6707_v23 = vld [vmem:[%s9223_s1 + $0x3c] ss:$24 sps:$4 sm:$0xff]  }
   0x7   :  { %377 = vmatpush1.bf16.msra.mxu0 %v6673_v4  ;;  %6621 = vmatpush1.bf16.msra.mxu1 %v6673_v4  ;;  %v6697_v16 = vld [vmem:[%s9223_s1 + $0x6c] ss:$24 sps:$4 sm:$0xff]   ;;  %v6695_v19 = vld [vmem:[%s9223_s1 + $0x68] ss:$24 sps:$4 sm:$0xff]   ;;  %v6705_v24 = vld [vmem:[%s9223_s1 + $0x38] ss:$24 sps:$4 sm:$0xff]  }
   0x8   :  { %378 = vmatprep.subr.bf16.mxu0 %v6674_v5  ;;  %6618 = vmatprep.subr.bf16.mxu1 %v6674_v5  ;;  %v6703_v20 = vld [vmem:[%s9223_s1 + $0x44] ss:$24 sps:$4 sm:$0xff]   ;;  %v7410_v21 = vld [vmem:[%s9232_s0 + $0x48] sm:$0xff]   ;;  %v6701_v22 = vld [vmem:[%s9223_s1 + $0x40] ss:$24 sps:$4 sm:$0xff]   ;;  %v7588_v42 = vsub.s32 0, %v7585_v41 }
   0x9   :  { %v6711_v25 = vld [vmem:[%s9223_s1 + $0x10] ss:$24 sps:$4 sm:$0xff]   ;;  %v6713_v26 = vld [vmem:[%s9223_s1 + $0x14] ss:$24 sps:$4 sm:$0xff]   ;;  %v6698_v31 = vld [vmem:[%s9232_s0 + $0x18] sm:$0xff]   ;;  %v7596_v44 = vsub.s32 1, %v7585_v41 }
   0xa   :  { %v6714_v27 = vld [vmem:[%s9223_s1 + $0x8] ss:$24 sps:$4 sm:$0xff]   ;;  %v6716_v28 = vld [vmem:[%s9223_s1 + $0xc] ss:$24 sps:$4 sm:$0xff]   ;;  %v6690_v29 = vld [vmem:[%s9232_s0 + $0x10] sm:$0xff]  }
   0xb   :  { %379 = vmatpush1.bf16.msra.mxu0 %v6676_v6  ;;  %6622 = vmatpush1.bf16.msra.mxu1 %v6676_v6  ;;  %v7445_v30 = vld [vmem:[%s9232_s0 + $0x50] sm:$0xff]   ;;  %v7458_v32 = vld [vmem:[%s9232_s0 + $0x58] sm:$0xff]   ;;  %v6700_v33 = vld [vmem:[%s9232_s0 + $0x20] sm:$0xff]  }
   0xc   :  { %380 = vmatprep.subr.bf16.mxu0 %v6677_v7  ;;  %6619 = vmatprep.subr.bf16.mxu1 %v6677_v7  ;;  %v7471_v34 = vld [vmem:[%s9232_s0 + $0x60] sm:$0xff]   ;;  %v6708_v35 = vld [vmem:[%s9232_s0 + $0x28] sm:$0xff]   ;;  %v6710_v37 = vld [vmem:[%s9232_s0 + $0x30] sm:$0xff]  }
   0xd   :  { %v7484_v36 = vld [vmem:[%s9232_s0 + $0x68] sm:$0xff]   ;;  %v7497_v38 = vld [vmem:[%s9232_s0 + $0x70] sm:$0xff]   ;;  %v6718_v39 = vld [vmem:[%s9232_s0 + $0x38] sm:$0xff]  }
   0xe   :  { %v7593_v43 = vld [vmem:[%s9233_s3] sm:$0x3f] }
   0xf   :  { %381 = vmatpush1.bf16.msra.mxu0 %v6679_v8  ;;  %6623 = vmatpush1.bf16.msra.mxu1 %v6679_v8  ;;  %v7600_v45 = vrot.slane %v7593_v43, %v7588_v42  ;;  %v7604_v46 = vrot.slane %v7593_v43, %v7596_v44 }
  0x10   :  { %740 = vmatprep.subr.bf16.mxu0 %v6683_v9  ;;  %557 = vmatprep.subr.bf16.mxu1 %v6688_v10 }
  0x12   :  { %5679 = vmatmul.mubr.msk.bf16.vlgmr.msra.gmra.mxu0 %vm320_vm0, %v7368_v11  ;;  %5687 = vmatmul.mubr.msk.bf16.vlgmr.msra.gmra.mxu1 %vm320_vm0, %v7373_v12 }
  0x13   :  { %741 = vmatpush1.bf16.msra.mxu0 %v6681_v13  ;;  %408 = vmatprep.mubr.bf16.mxu0 %v7269_v1 }
  0x14   :  { %558 = vmatpush1.bf16.msra.mxu1 %v6686_v14  ;;  %488 = vmatprep.mubr.bf16.mxu1 %v7269_v1 }
  0x15   :  { %742 = vmatprep.subr.bf16.mxu0 %v6693_v15  ;;  %559 = vmatprep.subr.bf16.mxu1 %v6697_v16 }
  0x17   :  { %743 = vmatpush1.bf16.msra.mxu0 %v6691_v17 }
  0x18   :  { %560 = vmatpush1.bf16.msra.mxu1 %v6695_v19  ;;  %744 = vmatprep.subr.bf16.mxu0 %v6703_v20 }
  0x19   :  { %561 = vmatprep.subr.bf16.mxu1 %v6707_v23 }
  0x1a   :  { %5680 = vmatmul.mubr.msk.bf16.gmra.mxu0 %vm320_vm0, %v7398_v18  ;;  %5688 = vmatmul.mubr.msk.bf16.gmra.mxu1 %vm320_vm0, %v7410_v21 }
  0x1b   :  { %418 = vmatprep.mubr.bf16.mxu0 %v7269_v1  ;;  %498 = vmatprep.mubr.bf16.mxu1 %v7269_v1 }
  0x1c   :  { %745 = vmatpush1.bf16.msra.mxu0 %v6701_v22  ;;  %562 = vmatpush1.bf16.msra.mxu1 %v6705_v24 }
  0x1d   :  { %746 = vmatprep.subr.bf16.mxu0 %v6713_v26  ;;  %563 = vmatprep.subr.bf16.mxu1 %v6716_v28 }
  0x20   :  { %747 = vmatpush1.bf16.msra.mxu0 %v6711_v25  ;;  %564 = vmatpush1.bf16.msra.mxu1 %v6714_v27 }
  0x22   :  { %5681 = vmatmul.mubr.msk.bf16.gmra.mxu0 %vm320_vm0, %v6690_v29  ;;  %5689 = vmatmul.mubr.msk.bf16.gmra.mxu1 %vm320_vm0, %v7445_v30 }
  0x23   :  { %428 = vmatprep.mubr.bf16.mxu0 %v7269_v1  ;;  %508 = vmatprep.mubr.bf16.mxu1 %v7269_v1 }
  0x2a   :  { %5682 = vmatmul.mubr.msk.bf16.gmra.mxu0 %vm320_vm0, %v6698_v31  ;;  %5690 = vmatmul.mubr.msk.bf16.gmra.mxu1 %vm320_vm0, %v7458_v32 }
  0x2b   :  { %438 = vmatprep.mubr.bf16.mxu0 %v7269_v1  ;;  %518 = vmatprep.mubr.bf16.mxu1 %v7269_v1 }
  0x32   :  { %5683 = vmatmul.mubr.msk.bf16.gmra.mxu0 %vm320_vm0, %v6700_v33  ;;  %5691 = vmatmul.mubr.msk.bf16.gmra.mxu1 %vm320_vm0, %v7471_v34 }
  0x33   :  { %448 = vmatprep.mubr.bf16.mxu0 %v7269_v1  ;;  %528 = vmatprep.mubr.bf16.mxu1 %v7269_v1 }
  0x3a   :  { %5684 = vmatmul.mubr.msk.bf16.gmra.mxu0 %vm320_vm0, %v6708_v35  ;;  %5692 = vmatmul.mubr.msk.bf16.gmra.mxu1 %vm320_vm0, %v7484_v36 }
  0x3b   :  { %458 = vmatprep.mubr.bf16.mxu0 %v7269_v1  ;;  %538 = vmatprep.mubr.bf16.mxu1 %v7269_v1 }
  0x42   :  { %5685 = vmatmul.mubr.msk.bf16.gmra.mxu0 %vm320_vm0, %v6710_v37  ;;  %5693 = vmatmul.mubr.msk.bf16.gmra.mxu1 %vm320_vm0, %v7497_v38 }
  0x43   :  { %468 = vmatprep.mubr.bf16.mxu0 %v7269_v1  ;;  %581 = vmatprep.mubr.bf16.mxu1 %v7269_v1 }
  0x4a   :  { %5686 = vmatmul.mubr.msk.bf16.gmra.mxu0 %vm320_vm0, %v6718_v39  ;;  %5694 = vmatmul.mubr.msk.bf16.vlgmr.msra.gmra.mxu1 %vm320_vm0, %v7368_v11 }
  0x4b   :  { %764 = vmatprep.mubr.bf16.mxu0 %v7269_v1  ;;  %591 = vmatprep.mubr.bf16.mxu1 %v7269_v1 }
  0x52   :  { %5709 = vmatmul.mubr.msk.bf16.vlgmr.msra.gmra.mxu0 %vm320_vm0, %v7368_v11  ;;  %5695 = vmatmul.mubr.msk.bf16.gmra.mxu1 %vm320_vm0, %v7398_v18 }
  0x53   :  { %774 = vmatprep.mubr.bf16.mxu0 %v7269_v1  ;;  %601 = vmatprep.mubr.bf16.mxu1 %v7269_v1 }
  0x5a   :  { %5710 = vmatmul.mubr.msk.bf16.gmra.mxu0 %vm320_vm0, %v7398_v18  ;;  %5696 = vmatmul.mubr.msk.bf16.gmra.mxu1 %vm320_vm0, %v6690_v29 }
  0x5b   :  { %784 = vmatprep.mubr.bf16.mxu0 %v7269_v1  ;;  %611 = vmatprep.mubr.bf16.mxu1 %v7269_v1 }
  0x62   :  { %5711 = vmatmul.mubr.msk.bf16.gmra.mxu0 %vm320_vm0, %v6690_v29  ;;  %5697 = vmatmul.mubr.msk.bf16.gmra.mxu1 %vm320_vm0, %v6698_v31 }
  0x63   :  { %794 = vmatprep.mubr.bf16.mxu0 %v7269_v1  ;;  %621 = vmatprep.mubr.bf16.mxu1 %v7269_v1 }
  0x6a   :  { %5712 = vmatmul.mubr.msk.bf16.gmra.mxu0 %vm320_vm0, %v6698_v31  ;;  %5698 = vmatmul.mubr.msk.bf16.gmra.mxu1 %vm320_vm0, %v6700_v33 }
  0x6b   :  { %804 = vmatprep.mubr.bf16.mxu0 %v7269_v1  ;;  %631 = vmatprep.mubr.bf16.mxu1 %v7269_v1 }
  0x72   :  { %5713 = vmatmul.mubr.msk.bf16.gmra.mxu0 %vm320_vm0, %v6700_v33  ;;  %5699 = vmatmul.mubr.msk.bf16.gmra.mxu1 %vm320_vm0, %v6708_v35 }
  0x73   :  { %814 = vmatprep.mubr.bf16.mxu0 %v7269_v1  ;;  %641 = vmatprep.mubr.bf16.mxu1 %v7269_v1 }
  0x7a   :  { %5714 = vmatmul.mubr.msk.bf16.gmra.mxu0 %vm320_vm0, %v6708_v35  ;;  %5700 = vmatmul.mubr.msk.bf16.gmra.mxu1 %vm320_vm0, %v6710_v37 }
  0x7b   :  { %824 = vmatprep.mubr.bf16.mxu0 %v7269_v1  ;;  %651 = vmatprep.mubr.bf16.mxu1 %v7269_v1 }
  0x82   :  { %5715 = vmatmul.mubr.msk.bf16.gmra.mxu0 %vm320_vm0, %v6710_v37  ;;  %5701 = vmatmul.mubr.msk.bf16.gmra.mxu1 %vm320_vm0, %v6718_v39 }
  0x83   :  { %834 = vmatprep.mubr.bf16.mxu0 %v7269_v1  ;;  %661 = vmatprep.mubr.bf16.mxu1 %v7269_v1 }
  0x8a   :  { %5716 = vmatmul.mubr.msk.bf16.gmra.mxu0 %vm320_vm0, %v6718_v39  ;;  %5702 = vmatmul.mubr.msk.bf16.gmra.mxu1 %vm320_vm0, %v7373_v12 }
  0x8b   :  { %844 = vmatprep.mubr.bf16.mxu0 %v7269_v1  ;;  %671 = vmatprep.mubr.bf16.mxu1 %v7269_v1 }
  0x92   :  { %5717 = vmatmul.mubr.msk.bf16.gmra.mxu0 %vm320_vm0, %v7373_v12  ;;  %5703 = vmatmul.mubr.msk.bf16.gmra.mxu1 %vm320_vm0, %v7410_v21 }
  0x93   :  { %854 = vmatprep.mubr.bf16.mxu0 %v7269_v1  ;;  %681 = vmatprep.mubr.bf16.mxu1 %v7269_v1 }
  0x9a   :  { %5718 = vmatmul.mubr.msk.bf16.gmra.mxu0 %vm320_vm0, %v7410_v21  ;;  %5704 = vmatmul.mubr.msk.bf16.gmra.mxu1 %vm320_vm0, %v7445_v30 }
  0x9b   :  { %864 = vmatprep.mubr.bf16.mxu0 %v7269_v1  ;;  %691 = vmatprep.mubr.bf16.mxu1 %v7269_v1 }
  0xa2   :  { %5719 = vmatmul.mubr.msk.bf16.gmra.mxu0 %vm320_vm0, %v7445_v30  ;;  %5705 = vmatmul.mubr.msk.bf16.gmra.mxu1 %vm320_vm0, %v7458_v32 }
  0xa3   :  { %874 = vmatprep.mubr.bf16.mxu0 %v7269_v1  ;;  %701 = vmatprep.mubr.bf16.mxu1 %v7269_v1 }
  0xaa   :  { %5720 = vmatmul.mubr.msk.bf16.gmra.mxu0 %vm320_vm0, %v7458_v32  ;;  %5706 = vmatmul.mubr.msk.bf16.gmra.mxu1 %vm320_vm0, %v7471_v34 }
  0xab   :  { %884 = vmatprep.mubr.bf16.mxu0 %v7269_v1  ;;  %711 = vmatprep.mubr.bf16.mxu1 %v7269_v1 }
  0xb2   :  { %5721 = vmatmul.mubr.msk.bf16.gmra.mxu0 %vm320_vm0, %v7471_v34  ;;  %5707 = vmatmul.mubr.msk.bf16.gmra.mxu1 %vm320_vm0, %v7484_v36 }
  0xb3   :  { %894 = vmatprep.mubr.bf16.mxu0 %v7269_v1  ;;  %721 = vmatprep.mubr.bf16.mxu1 %v7269_v1 }
  0xba   :  { %5722 = vmatmul.mubr.msk.bf16.gmra.mxu0 %vm320_vm0, %v7484_v36  ;;  %5708 = vmatmul.mubr.msk.bf16.gmra.mxu1 %vm320_vm0, %v7497_v38 }
  0xbb   :  { %904 = vmatprep.mubr.bf16.mxu0 %v7269_v1 }
  0xc2   :  { %5723 = vmatmul.mubr.msk.bf16.gmra.mxu0 %vm320_vm0, %v7497_v38 }
  0xd2   :  { %v400_v47 = vpop.f32.mrf.mxu0  ;;  %v480_v48 = vpop.f32.mrf.mxu1 }
  0xd3   :  { %v401_v49 = vadd.f32 %v400_v47, %v7600_v45  ;;  %v481_v50 = vadd.f32 %v480_v48, %v7600_v45 }
  0xd4   :  { %v402_v51 = vpop.f32.mrf.mxu0  ;;  %v482_v52 = vpop.f32.mrf.mxu1 }
  0xd5   :  { %915 = vst [vmem:[#allocation2] sm:$0xff] %v401_v49  ;;  %v403_v53 = vadd.f32 %v402_v51, %v7604_v46  ;;  %1011 = vst [vmem:[#allocation2 + $0x300] sm:$0xff] %v481_v50  ;;  %v483_v54 = vadd.f32 %v482_v52, %v7604_v46 }
  0xd6   :  { %v404_v55 = vpop.f32.mrf.mxu0  ;;  %v484_v56 = vpop.f32.mrf.mxu1 }
  0xd7   :  { %916 = vst [vmem:[#allocation2 + $0x8] sm:$0xff] %v403_v53  ;;  %v405_v57 = vadd.f32 %v404_v55, %v7600_v45  ;;  %1012 = vst [vmem:[#allocation2 + $0x308] sm:$0xff] %v483_v54  ;;  %v485_v58 = vadd.f32 %v484_v56, %v7600_v45 }
  0xd8   :  { %v406_v59 = vpop.f32.mrf.mxu0  ;;  %v486_v60 = vpop.f32.mrf.mxu1 }
  0xd9   :  { %921 = vst [vmem:[#allocation2 + $0x30] sm:$0xff] %v405_v57  ;;  %v407_v61 = vadd.f32 %v406_v59, %v7604_v46  ;;  %1017 = vst [vmem:[#allocation2 + $0x330] sm:$0xff] %v485_v58  ;;  %v487_v62 = vadd.f32 %v486_v60, %v7604_v46 }
  0xda   :  { %v410_v63 = vpop.f32.mrf.mxu0  ;;  %v490_v0 = vpop.f32.mrf.mxu1 }
  0xdb   :  { %922 = vst [vmem:[#allocation2 + $0x38] sm:$0xff] %v407_v61  ;;  %v411_v1 = vadd.f32 %v410_v63, %v7600_v45  ;;  %1018 = vst [vmem:[#allocation2 + $0x338] sm:$0xff] %v487_v62  ;;  %v491_v2 = vadd.f32 %v490_v0, %v7600_v45 }
  0xdc   :  { %v412_v3 = vpop.f32.mrf.mxu0  ;;  %v492_v4 = vpop.f32.mrf.mxu1 }
  0xdd   :  { %927 = vst [vmem:[#allocation2 + $0x60] sm:$0xff] %v411_v1  ;;  %v413_v5 = vadd.f32 %v412_v3, %v7604_v46  ;;  %1023 = vst [vmem:[#allocation2 + $0x360] sm:$0xff] %v491_v2  ;;  %v493_v6 = vadd.f32 %v492_v4, %v7604_v46 }
  0xde   :  { %v414_v7 = vpop.f32.mrf.mxu0  ;;  %v494_v8 = vpop.f32.mrf.mxu1 }
  0xdf   :  { %928 = vst [vmem:[#allocation2 + $0x68] sm:$0xff] %v413_v5  ;;  %v415_v9 = vadd.f32 %v414_v7, %v7600_v45  ;;  %1024 = vst [vmem:[#allocation2 + $0x368] sm:$0xff] %v493_v6  ;;  %v495_v10 = vadd.f32 %v494_v8, %v7600_v45 }
  0xe0   :  { %v416_v11 = vpop.f32.mrf.mxu0  ;;  %v496_v12 = vpop.f32.mrf.mxu1 }
  0xe1   :  { %933 = vst [vmem:[#allocation2 + $0x90] sm:$0xff] %v415_v9  ;;  %v417_v13 = vadd.f32 %v416_v11, %v7604_v46  ;;  %1029 = vst [vmem:[#allocation2 + $0x390] sm:$0xff] %v495_v10  ;;  %v497_v14 = vadd.f32 %v496_v12, %v7604_v46 }
  0xe2   :  { %v420_v15 = vpop.f32.mrf.mxu0  ;;  %v500_v16 = vpop.f32.mrf.mxu1 }
  0xe3   :  { %934 = vst [vmem:[#allocation2 + $0x98] sm:$0xff] %v417_v13  ;;  %v421_v17 = vadd.f32 %v420_v15, %v7600_v45  ;;  %1030 = vst [vmem:[#allocation2 + $0x398] sm:$0xff] %v497_v14  ;;  %v501_v18 = vadd.f32 %v500_v16, %v7600_v45 }
  0xe4   :  { %v422_v19 = vpop.f32.mrf.mxu0  ;;  %v502_v20 = vpop.f32.mrf.mxu1 }
  0xe5   :  { %939 = vst [vmem:[#allocation2 + $0xc0] sm:$0xff] %v421_v17  ;;  %v423_v21 = vadd.f32 %v422_v19, %v7604_v46  ;;  %1035 = vst [vmem:[#allocation2 + $0x3c0] sm:$0xff] %v501_v18  ;;  %v503_v22 = vadd.f32 %v502_v20, %v7604_v46 }
  0xe6   :  { %v424_v23 = vpop.f32.mrf.mxu0  ;;  %v504_v24 = vpop.f32.mrf.mxu1 }
  0xe7   :  { %940 = vst [vmem:[#allocation2 + $0xc8] sm:$0xff] %v423_v21  ;;  %v425_v25 = vadd.f32 %v424_v23, %v7600_v45  ;;  %1036 = vst [vmem:[#allocation2 + $0x3c8] sm:$0xff] %v503_v22  ;;  %v505_v26 = vadd.f32 %v504_v24, %v7600_v45 }
  0xe8   :  { %v426_v27 = vpop.f32.mrf.mxu0  ;;  %v506_v28 = vpop.f32.mrf.mxu1 }
  0xe9   :  { %945 = vst [vmem:[#allocation2 + $0xf0] sm:$0xff] %v425_v25  ;;  %v427_v29 = vadd.f32 %v426_v27, %v7604_v46  ;;  %1041 = vst [vmem:[#allocation2 + $0x3f0] sm:$0xff] %v505_v26  ;;  %v507_v30 = vadd.f32 %v506_v28, %v7604_v46  ;;  %v105_v25 = vsub.s32 2, %v7585_v41 }
  0xea   :  { %v430_v31 = vpop.f32.mrf.mxu0  ;;  %v510_v32 = vpop.f32.mrf.mxu1 }
  0xeb   :  { %946 = vst [vmem:[#allocation2 + $0xf8] sm:$0xff] %v427_v29  ;;  %v431_v33 = vadd.f32 %v430_v31, %v7600_v45  ;;  %1042 = vst [vmem:[#allocation2 + $0x3f8] sm:$0xff] %v507_v30  ;;  %v511_v34 = vadd.f32 %v510_v32, %v7600_v45  ;;  %v109_v30 = vsub.s32 3, %v7585_v41 }
  0xec   :  { %v432_v35 = vpop.f32.mrf.mxu0  ;;  %v512_v36 = vpop.f32.mrf.mxu1 }
  0xed   :  { %951 = vst [vmem:[#allocation2 + $0x120] sm:$0xff] %v431_v33  ;;  %v433_v37 = vadd.f32 %v432_v35, %v7604_v46  ;;  %1047 = vst [vmem:[#allocation2 + $0x420] sm:$0xff] %v511_v34  ;;  %v513_v38 = vadd.f32 %v512_v36, %v7604_v46  ;;  %v7665_v35 = vrot.slane %v7593_v43, %v105_v25 }
  0xee   :  { %v434_v39 = vpop.f32.mrf.mxu0  ;;  %v514_v40 = vpop.f32.mrf.mxu1 }
  0xef   :  { %952 = vst [vmem:[#allocation2 + $0x128] sm:$0xff] %v433_v37  ;;  %v435_v47 = vadd.f32 %v434_v39, %v7600_v45  ;;  %1048 = vst [vmem:[#allocation2 + $0x428] sm:$0xff] %v513_v38  ;;  %v515_v48 = vadd.f32 %v514_v40, %v7600_v45  ;;  %v7670_v40 = vrot.slane %v7593_v43, %v109_v30 }
  0xf0   :  { %v436_v49 = vpop.f32.mrf.mxu0  ;;  %v516_v50 = vpop.f32.mrf.mxu1 }
  0xf1   :  { %957 = vst [vmem:[#allocation2 + $0x150] sm:$0xff] %v435_v47  ;;  %v437_v51 = vadd.f32 %v436_v49, %v7604_v46  ;;  %1053 = vst [vmem:[#allocation2 + $0x450] sm:$0xff] %v515_v48  ;;  %v517_v52 = vadd.f32 %v516_v50, %v7604_v46 }
  0xf2   :  { %v440_v53 = vpop.f32.mrf.mxu0  ;;  %v520_v54 = vpop.f32.mrf.mxu1 }
  0xf3   :  { %958 = vst [vmem:[#allocation2 + $0x158] sm:$0xff] %v437_v51  ;;  %v441_v55 = vadd.f32 %v440_v53, %v7600_v45  ;;  %1054 = vst [vmem:[#allocation2 + $0x458] sm:$0xff] %v517_v52  ;;  %v521_v56 = vadd.f32 %v520_v54, %v7600_v45  ;;  %v113_v51 = vsub.s32 4, %v7585_v41  ;;  %v7678_v52 = vld [vmem:[%s9234_s4] sm:$0x3]  ;;  %s7813_s4 = smov 0  }
  0xf4   :  { %v442_v57 = vpop.f32.mrf.mxu0  ;;  %v522_v58 = vpop.f32.mrf.mxu1 }
  0xf5   :  { %963 = vst [vmem:[#allocation2 + $0x180] sm:$0xff] %v441_v55  ;;  %v443_v59 = vadd.f32 %v442_v57, %v7604_v46  ;;  %1059 = vst [vmem:[#allocation2 + $0x480] sm:$0xff] %v521_v56  ;;  %v523_v60 = vadd.f32 %v522_v58, %v7604_v46  ;;  %v117_v57 = vsub.s32 5, %v7585_v41 }
  0xf6   :  { %v444_v61 = vpop.f32.mrf.mxu0  ;;  %v524_v62 = vpop.f32.mrf.mxu1 }
  0xf7   :  { %964 = vst [vmem:[#allocation2 + $0x188] sm:$0xff] %v443_v59  ;;  %v445_v63 = vadd.f32 %v444_v61, %v7600_v45  ;;  %1060 = vst [vmem:[#allocation2 + $0x488] sm:$0xff] %v523_v60  ;;  %v525_v0 = vadd.f32 %v524_v62, %v7600_v45  ;;  %v7686_v62 = vrot.slane %v7593_v43, %v113_v51 }
  0xf8   :  { %v446_v1 = vpop.f32.mrf.mxu0  ;;  %v526_v2 = vpop.f32.mrf.mxu1 }
  0xf9   :  { %969 = vst [vmem:[#allocation2 + $0x1b0] sm:$0xff] %v445_v63  ;;  %v447_v3 = vadd.f32 %v446_v1, %v7604_v46  ;;  %1065 = vst [vmem:[#allocation2 + $0x4b0] sm:$0xff] %v525_v0  ;;  %v527_v4 = vadd.f32 %v526_v2, %v7604_v46 }
  0xfa   :  { %v450_v5 = vpop.f32.mrf.mxu0  ;;  %v530_v6 = vpop.f32.mrf.mxu1 }
  0xfb   :  { %970 = vst [vmem:[#allocation2 + $0x1b8] sm:$0xff] %v447_v3  ;;  %v451_v7 = vadd.f32 %v450_v5, %v7600_v45  ;;  %1066 = vst [vmem:[#allocation2 + $0x4b8] sm:$0xff] %v527_v4  ;;  %v531_v8 = vadd.f32 %v530_v6, %v7600_v45  ;;  %v7691_v3 = vrot.slane %v7593_v43, %v117_v57 }
  0xfc   :  { %v452_v9 = vpop.f32.mrf.mxu0  ;;  %v532_v10 = vpop.f32.mrf.mxu1 }
  0xfd   :  { %975 = vst [vmem:[#allocation2 + $0x1e0] sm:$0xff] %v451_v7  ;;  %v453_v11 = vadd.f32 %v452_v9, %v7604_v46  ;;  %1071 = vst [vmem:[#allocation2 + $0x4e0] sm:$0xff] %v531_v8  ;;  %v533_v12 = vadd.f32 %v532_v10, %v7604_v46 }
  0xfe   :  { %v454_v13 = vpop.f32.mrf.mxu0  ;;  %v534_v14 = vpop.f32.mrf.mxu1 }
  0xff   :  { %976 = vst [vmem:[#allocation2 + $0x1e8] sm:$0xff] %v453_v11  ;;  %v455_v15 = vadd.f32 %v454_v13, %v7600_v45  ;;  %1072 = vst [vmem:[#allocation2 + $0x4e8] sm:$0xff] %v533_v12  ;;  %v535_v16 = vadd.f32 %v534_v14, %v7600_v45 }
 0x100   :  { %v456_v17 = vpop.f32.mrf.mxu0  ;;  %v536_v18 = vpop.f32.mrf.mxu1 }
 0x101   :  { %981 = vst [vmem:[#allocation2 + $0x210] sm:$0xff] %v455_v15  ;;  %v457_v19 = vadd.f32 %v456_v17, %v7604_v46  ;;  %1077 = vst [vmem:[#allocation2 + $0x510] sm:$0xff] %v535_v16  ;;  %v537_v20 = vadd.f32 %v536_v18, %v7604_v46 }
 0x102   :  { %v460_v21 = vpop.f32.mrf.mxu0  ;;  %v540_v22 = vpop.f32.mrf.mxu1 }
 0x103   :  { %982 = vst [vmem:[#allocation2 + $0x218] sm:$0xff] %v457_v19  ;;  %v461_v23 = vadd.f32 %v460_v21, %v7600_v45  ;;  %1078 = vst [vmem:[#allocation2 + $0x518] sm:$0xff] %v537_v20  ;;  %v541_v24 = vadd.f32 %v540_v22, %v7600_v45 }
 0x104   :  { %v462_v26 = vpop.f32.mrf.mxu0  ;;  %v542_v27 = vpop.f32.mrf.mxu1 }
 0x105   :  { %987 = vst [vmem:[#allocation2 + $0x240] sm:$0xff] %v461_v23  ;;  %v463_v28 = vadd.f32 %v462_v26, %v7604_v46  ;;  %1083 = vst [vmem:[#allocation2 + $0x540] sm:$0xff] %v541_v24  ;;  %v543_v29 = vadd.f32 %v542_v27, %v7604_v46 }
 0x106   :  { %v464_v31 = vpop.f32.mrf.mxu0  ;;  %v544_v32 = vpop.f32.mrf.mxu1 }
 0x107   :  { %988 = vst [vmem:[#allocation2 + $0x248] sm:$0xff] %v463_v28  ;;  %v465_v33 = vadd.f32 %v464_v31, %v7600_v45  ;;  %1084 = vst [vmem:[#allocation2 + $0x548] sm:$0xff] %v543_v29  ;;  %v545_v34 = vadd.f32 %v544_v32, %v7600_v45 }
 0x108   :  { %v466_v36 = vpop.f32.mrf.mxu0  ;;  %v546_v37 = vpop.f32.mrf.mxu1 }
 0x109   :  { %993 = vst [vmem:[#allocation2 + $0x270] sm:$0xff] %v465_v33  ;;  %v467_v38 = vadd.f32 %v466_v36, %v7604_v46  ;;  %1089 = vst [vmem:[#allocation2 + $0x570] sm:$0xff] %v545_v34  ;;  %v547_v39 = vadd.f32 %v546_v37, %v7604_v46 }
 0x10a   :  { %v470_v47 = vpop.f32.mrf.mxu0  ;;  %v583_v48 = vpop.f32.mrf.mxu1 }
 0x10b   :  { %994 = vst [vmem:[#allocation2 + $0x278] sm:$0xff] %v467_v38  ;;  %v471_v49 = vadd.f32 %v470_v47, %v7600_v45  ;;  %1090 = vst [vmem:[#allocation2 + $0x578] sm:$0xff] %v547_v39  ;;  %v584_v50 = vadd.f32 %v583_v48, %v7665_v35 }
 0x10c   :  { %v472_v53 = vpop.f32.mrf.mxu0  ;;  %v585_v54 = vpop.f32.mrf.mxu1 }
 0x10d   :  { %999 = vst [vmem:[#allocation2 + $0x2a0] sm:$0xff] %v471_v49  ;;  %v473_v55 = vadd.f32 %v472_v53, %v7604_v46  ;;  %917 = vst [vmem:[#allocation2 + $0x10] sm:$0xff] %v584_v50  ;;  %v586_v56 = vadd.f32 %v585_v54, %v7670_v40 }
 0x10e   :  { %v474_v58 = vpop.f32.mrf.mxu0  ;;  %v587_v59 = vpop.f32.mrf.mxu1 }
 0x10f   :  { %1000 = vst [vmem:[#allocation2 + $0x2a8] sm:$0xff] %v473_v55  ;;  %v475_v60 = vadd.f32 %v474_v58, %v7600_v45  ;;  %918 = vst [vmem:[#allocation2 + $0x18] sm:$0xff] %v586_v56  ;;  %v588_v61 = vadd.f32 %v587_v59, %v7665_v35 }
 0x110   :  { %v476_v63 = vpop.f32.mrf.mxu0  ;;  %v589_v0 = vpop.f32.mrf.mxu1 }
 0x111   :  { %1005 = vst [vmem:[#allocation2 + $0x2d0] sm:$0xff] %v475_v60  ;;  %v477_v1 = vadd.f32 %v476_v63, %v7604_v46  ;;  %923 = vst [vmem:[#allocation2 + $0x40] sm:$0xff] %v588_v61  ;;  %v590_v2 = vadd.f32 %v589_v0, %v7670_v40 }
 0x112   :  { %v766_v4 = vpop.f32.mrf.mxu0  ;;  %v593_v5 = vpop.f32.mrf.mxu1 }
 0x113   :  { %1006 = vst [vmem:[#allocation2 + $0x2d8] sm:$0xff] %v477_v1  ;;  %v767_v45 = vadd.f32 %v766_v4, %v7686_v62  ;;  %924 = vst [vmem:[#allocation2 + $0x48] sm:$0xff] %v590_v2  ;;  %v594_v6 = vadd.f32 %v593_v5, %v7665_v35 }
 0x114   :  { %v768_v7 = vpop.f32.mrf.mxu0  ;;  %v595_v8 = vpop.f32.mrf.mxu1 }
 0x115   :  { %919 = vst [vmem:[#allocation2 + $0x20] sm:$0xff] %v767_v45  ;;  %v769_v9 = vadd.f32 %v768_v7, %v7691_v3  ;;  %929 = vst [vmem:[#allocation2 + $0x70] sm:$0xff] %v594_v6  ;;  %v596_v46 = vadd.f32 %v595_v8, %v7670_v40 }
 0x116   :  { %v770_v10 = vpop.f32.mrf.mxu0  ;;  %v597_v11 = vpop.f32.mrf.mxu1 }
 0x117   :  { %920 = vst [vmem:[#allocation2 + $0x28] sm:$0xff] %v769_v9  ;;  %v771_v43 = vadd.f32 %v770_v10, %v7686_v62  ;;  %930 = vst [vmem:[#allocation2 + $0x78] sm:$0xff] %v596_v46  ;;  %v598_v12 = vadd.f32 %v597_v11, %v7665_v35 }
 0x118   :  { %v772_v13 = vpop.f32.mrf.mxu0  ;;  %v599_v14 = vpop.f32.mrf.mxu1 }
 0x119   :  { %925 = vst [vmem:[#allocation2 + $0x50] sm:$0xff] %v771_v43  ;;  %v773_v15 = vadd.f32 %v772_v13, %v7691_v3  ;;  %935 = vst [vmem:[#allocation2 + $0xa0] sm:$0xff] %v598_v12  ;;  %v600_v16 = vadd.f32 %v599_v14, %v7670_v40 }
 0x11a   :  { %v776_v17 = vpop.f32.mrf.mxu0  ;;  %v603_v18 = vpop.f32.mrf.mxu1 }
 0x11b   :  { %926 = vst [vmem:[#allocation2 + $0x58] sm:$0xff] %v773_v15  ;;  %v777_v19 = vadd.f32 %v776_v17, %v7686_v62  ;;  %936 = vst [vmem:[#allocation2 + $0xa8] sm:$0xff] %v600_v16  ;;  %v604_v20 = vadd.f32 %v603_v18, %v7665_v35 }
 0x11c   :  { %v778_v21 = vpop.f32.mrf.mxu0  ;;  %v605_v22 = vpop.f32.mrf.mxu1 }
 0x11d   :  { %931 = vst [vmem:[#allocation2 + $0x80] sm:$0xff] %v777_v19  ;;  %v779_v23 = vadd.f32 %v778_v21, %v7691_v3  ;;  %941 = vst [vmem:[#allocation2 + $0xd0] sm:$0xff] %v604_v20  ;;  %v606_v24 = vadd.f32 %v605_v22, %v7670_v40 }
 0x11e   :  { %v780_v26 = vpop.f32.mrf.mxu0  ;;  %v607_v27 = vpop.f32.mrf.mxu1 }
 0x11f   :  { %932 = vst [vmem:[#allocation2 + $0x88] sm:$0xff] %v779_v23  ;;  %v781_v28 = vadd.f32 %v780_v26, %v7686_v62  ;;  %942 = vst [vmem:[#allocation2 + $0xd8] sm:$0xff] %v606_v24  ;;  %v608_v29 = vadd.f32 %v607_v27, %v7665_v35 }
 0x120   :  { %v782_v30 = vpop.f32.mrf.mxu0  ;;  %v609_v31 = vpop.f32.mrf.mxu1 }
 0x121   :  { %937 = vst [vmem:[#allocation2 + $0xb0] sm:$0xff] %v781_v28  ;;  %v783_v32 = vadd.f32 %v782_v30, %v7691_v3  ;;  %947 = vst [vmem:[#allocation2 + $0x100] sm:$0xff] %v608_v29  ;;  %v610_v33 = vadd.f32 %v609_v31, %v7670_v40 }
 0x122   :  { %v786_v34 = vpop.f32.mrf.mxu0  ;;  %v613_v36 = vpop.f32.mrf.mxu1 }
 0x123   :  { %938 = vst [vmem:[#allocation2 + $0xb8] sm:$0xff] %v783_v32  ;;  %v787_v37 = vadd.f32 %v786_v34, %v7686_v62  ;;  %948 = vst [vmem:[#allocation2 + $0x108] sm:$0xff] %v610_v33  ;;  %v614_v38 = vadd.f32 %v613_v36, %v7665_v35 }
 0x124   :  { %v788_v39 = vpop.f32.mrf.mxu0  ;;  %v615_v47 = vpop.f32.mrf.mxu1 }
 0x125   :  { %943 = vst [vmem:[#allocation2 + $0xe0] sm:$0xff] %v787_v37  ;;  %v789_v48 = vadd.f32 %v788_v39, %v7691_v3  ;;  %953 = vst [vmem:[#allocation2 + $0x130] sm:$0xff] %v614_v38  ;;  %v616_v49 = vadd.f32 %v615_v47, %v7670_v40 }
 0x126   :  { %v790_v50 = vpop.f32.mrf.mxu0  ;;  %v617_v51 = vpop.f32.mrf.mxu1 }
 0x127   :  { %944 = vst [vmem:[#allocation2 + $0xe8] sm:$0xff] %v789_v48  ;;  %v791_v53 = vadd.f32 %v790_v50, %v7686_v62  ;;  %954 = vst [vmem:[#allocation2 + $0x138] sm:$0xff] %v616_v49  ;;  %v618_v54 = vadd.f32 %v617_v51, %v7665_v35 }
 0x128   :  { %v792_v55 = vpop.f32.mrf.mxu0  ;;  %v619_v56 = vpop.f32.mrf.mxu1 }
 0x129   :  { %949 = vst [vmem:[#allocation2 + $0x110] sm:$0xff] %v791_v53  ;;  %v793_v57 = vadd.f32 %v792_v55, %v7691_v3  ;;  %959 = vst [vmem:[#allocation2 + $0x160] sm:$0xff] %v618_v54  ;;  %v620_v58 = vadd.f32 %v619_v56, %v7670_v40 }
 0x12a   :  { %v796_v59 = vpop.f32.mrf.mxu0  ;;  %v623_v60 = vpop.f32.mrf.mxu1 }
 0x12b   :  { %950 = vst [vmem:[#allocation2 + $0x118] sm:$0xff] %v793_v57  ;;  %v797_v61 = vadd.f32 %v796_v59, %v7686_v62  ;;  %960 = vst [vmem:[#allocation2 + $0x168] sm:$0xff] %v620_v58  ;;  %v624_v63 = vadd.f32 %v623_v60, %v7665_v35 }
 0x12c   :  { %v798_v0 = vpop.f32.mrf.mxu0  ;;  %v625_v1 = vpop.f32.mrf.mxu1 }
 0x12d   :  { %955 = vst [vmem:[#allocation2 + $0x140] sm:$0xff] %v797_v61  ;;  %v799_v2 = vadd.f32 %v798_v0, %v7691_v3  ;;  %965 = vst [vmem:[#allocation2 + $0x190] sm:$0xff] %v624_v63  ;;  %v626_v4 = vadd.f32 %v625_v1, %v7670_v40 }
 0x12e   :  { %v800_v5 = vpop.f32.mrf.mxu0  ;;  %v627_v45 = vpop.f32.mrf.mxu1 }
 0x12f   :  { %956 = vst [vmem:[#allocation2 + $0x148] sm:$0xff] %v799_v2  ;;  %v801_v6 = vadd.f32 %v800_v5, %v7686_v62  ;;  %966 = vst [vmem:[#allocation2 + $0x198] sm:$0xff] %v626_v4  ;;  %v628_v7 = vadd.f32 %v627_v45, %v7665_v35 }
 0x130   :  { %v802_v8 = vpop.f32.mrf.mxu0  ;;  %v629_v9 = vpop.f32.mrf.mxu1 }
 0x131   :  { %961 = vst [vmem:[#allocation2 + $0x170] sm:$0xff] %v801_v6  ;;  %v803_v46 = vadd.f32 %v802_v8, %v7691_v3  ;;  %971 = vst [vmem:[#allocation2 + $0x1c0] sm:$0xff] %v628_v7  ;;  %v630_v10 = vadd.f32 %v629_v9, %v7670_v40 }
 0x132   :  { %v806_v11 = vpop.f32.mrf.mxu0  ;;  %v633_v43 = vpop.f32.mrf.mxu1 }
 0x133   :  { %962 = vst [vmem:[#allocation2 + $0x178] sm:$0xff] %v803_v46  ;;  %v807_v12 = vadd.f32 %v806_v11, %v7686_v62  ;;  %972 = vst [vmem:[#allocation2 + $0x1c8] sm:$0xff] %v630_v10  ;;  %v634_v13 = vadd.f32 %v633_v43, %v7665_v35 }
 0x134   :  { %v808_v14 = vpop.f32.mrf.mxu0  ;;  %v635_v15 = vpop.f32.mrf.mxu1 }
 0x135   :  { %967 = vst [vmem:[#allocation2 + $0x1a0] sm:$0xff] %v807_v12  ;;  %v809_v16 = vadd.f32 %v808_v14, %v7691_v3  ;;  %977 = vst [vmem:[#allocation2 + $0x1f0] sm:$0xff] %v634_v13  ;;  %v636_v17 = vadd.f32 %v635_v15, %v7670_v40 }
 0x136   :  { %v810_v18 = vpop.f32.mrf.mxu0  ;;  %v637_v19 = vpop.f32.mrf.mxu1 }
 0x137   :  { %968 = vst [vmem:[#allocation2 + $0x1a8] sm:$0xff] %v809_v16  ;;  %v811_v20 = vadd.f32 %v810_v18, %v7686_v62  ;;  %978 = vst [vmem:[#allocation2 + $0x1f8] sm:$0xff] %v636_v17  ;;  %v638_v21 = vadd.f32 %v637_v19, %v7665_v35 }
 0x138   :  { %v812_v22 = vpop.f32.mrf.mxu0  ;;  %v639_v23 = vpop.f32.mrf.mxu1 }
 0x139   :  { %973 = vst [vmem:[#allocation2 + $0x1d0] sm:$0xff] %v811_v20  ;;  %v813_v24 = vadd.f32 %v812_v22, %v7691_v3  ;;  %983 = vst [vmem:[#allocation2 + $0x220] sm:$0xff] %v638_v21  ;;  %v640_v26 = vadd.f32 %v639_v23, %v7670_v40 }
 0x13a   :  { %v816_v27 = vpop.f32.mrf.mxu0  ;;  %v643_v28 = vpop.f32.mrf.mxu1 }
 0x13b   :  { %974 = vst [vmem:[#allocation2 + $0x1d8] sm:$0xff] %v813_v24  ;;  %v817_v29 = vadd.f32 %v816_v27, %v7686_v62  ;;  %984 = vst [vmem:[#allocation2 + $0x228] sm:$0xff] %v640_v26  ;;  %v644_v30 = vadd.f32 %v643_v28, %v7665_v35 }
 0x13c   :  { %v818_v31 = vpop.f32.mrf.mxu0  ;;  %v645_v32 = vpop.f32.mrf.mxu1 }
 0x13d   :  { %979 = vst [vmem:[#allocation2 + $0x200] sm:$0xff] %v817_v29  ;;  %v819_v33 = vadd.f32 %v818_v31, %v7691_v3  ;;  %989 = vst [vmem:[#allocation2 + $0x250] sm:$0xff] %v644_v30  ;;  %v646_v34 = vadd.f32 %v645_v32, %v7670_v40 }
 0x13e   :  { %v820_v36 = vpop.f32.mrf.mxu0  ;;  %v647_v37 = vpop.f32.mrf.mxu1 }
 0x13f   :  { %980 = vst [vmem:[#allocation2 + $0x208] sm:$0xff] %v819_v33  ;;  %v821_v38 = vadd.f32 %v820_v36, %v7686_v62  ;;  %990 = vst [vmem:[#allocation2 + $0x258] sm:$0xff] %v646_v34  ;;  %v648_v39 = vadd.f32 %v647_v37, %v7665_v35 }
 0x140   :  { %v822_v47 = vpop.f32.mrf.mxu0  ;;  %v649_v48 = vpop.f32.mrf.mxu1 }
 0x141   :  { %985 = vst [vmem:[#allocation2 + $0x230] sm:$0xff] %v821_v38  ;;  %v823_v49 = vadd.f32 %v822_v47, %v7691_v3  ;;  %995 = vst [vmem:[#allocation2 + $0x280] sm:$0xff] %v648_v39  ;;  %v650_v50 = vadd.f32 %v649_v48, %v7670_v40 }
 0x142   :  { %v826_v51 = vpop.f32.mrf.mxu0  ;;  %v653_v53 = vpop.f32.mrf.mxu1 }
 0x143   :  { %986 = vst [vmem:[#allocation2 + $0x238] sm:$0xff] %v823_v49  ;;  %v827_v54 = vadd.f32 %v826_v51, %v7686_v62  ;;  %996 = vst [vmem:[#allocation2 + $0x288] sm:$0xff] %v650_v50  ;;  %v654_v55 = vadd.f32 %v653_v53, %v7665_v35 }
 0x144   :  { %v828_v56 = vpop.f32.mrf.mxu0  ;;  %v655_v57 = vpop.f32.mrf.mxu1 }
 0x145   :  { %991 = vst [vmem:[#allocation2 + $0x260] sm:$0xff] %v827_v54  ;;  %v829_v58 = vadd.f32 %v828_v56, %v7691_v3  ;;  %1001 = vst [vmem:[#allocation2 + $0x2b0] sm:$0xff] %v654_v55  ;;  %v656_v59 = vadd.f32 %v655_v57, %v7670_v40 }
 0x146   :  { %v830_v60 = vpop.f32.mrf.mxu0  ;;  %v657_v61 = vpop.f32.mrf.mxu1 }
 0x147   :  { %992 = vst [vmem:[#allocation2 + $0x268] sm:$0xff] %v829_v58  ;;  %v831_v63 = vadd.f32 %v830_v60, %v7686_v62  ;;  %1002 = vst [vmem:[#allocation2 + $0x2b8] sm:$0xff] %v656_v59  ;;  %v658_v0 = vadd.f32 %v657_v61, %v7665_v35 }
 0x148   :  { %v832_v1 = vpop.f32.mrf.mxu0  ;;  %v659_v2 = vpop.f32.mrf.mxu1 }
 0x149   :  { %997 = vst [vmem:[#allocation2 + $0x290] sm:$0xff] %v831_v63  ;;  %v833_v4 = vadd.f32 %v832_v1, %v7691_v3  ;;  %1007 = vst [vmem:[#allocation2 + $0x2e0] sm:$0xff] %v658_v0  ;;  %v660_v5 = vadd.f32 %v659_v2, %v7670_v40 }
 0x14a   :  { %v836_v45 = vpop.f32.mrf.mxu0  ;;  %v663_v6 = vpop.f32.mrf.mxu1 }
 0x14b   :  { %998 = vst [vmem:[#allocation2 + $0x298] sm:$0xff] %v833_v4  ;;  %v837_v7 = vadd.f32 %v836_v45, %v7686_v62  ;;  %1008 = vst [vmem:[#allocation2 + $0x2e8] sm:$0xff] %v660_v5  ;;  %v664_v8 = vadd.f32 %v663_v6, %v7665_v35 }
 0x14c   :  { %v838_v9 = vpop.f32.mrf.mxu0  ;;  %v665_v46 = vpop.f32.mrf.mxu1 }
 0x14d   :  { %1003 = vst [vmem:[#allocation2 + $0x2c0] sm:$0xff] %v837_v7  ;;  %v839_v10 = vadd.f32 %v838_v9, %v7691_v3  ;;  %1013 = vst [vmem:[#allocation2 + $0x310] sm:$0xff] %v664_v8  ;;  %v666_v11 = vadd.f32 %v665_v46, %v7670_v40 }
 0x14e   :  { %v840_v43 = vpop.f32.mrf.mxu0  ;;  %v667_v12 = vpop.f32.mrf.mxu1 }
 0x14f   :  { %1004 = vst [vmem:[#allocation2 + $0x2c8] sm:$0xff] %v839_v10  ;;  %v841_v13 = vadd.f32 %v840_v43, %v7686_v62  ;;  %1014 = vst [vmem:[#allocation2 + $0x318] sm:$0xff] %v666_v11  ;;  %v668_v14 = vadd.f32 %v667_v12, %v7665_v35 }
 0x150   :  { %v842_v15 = vpop.f32.mrf.mxu0  ;;  %v669_v16 = vpop.f32.mrf.mxu1 }
 0x151   :  { %1009 = vst [vmem:[#allocation2 + $0x2f0] sm:$0xff] %v841_v13  ;;  %v843_v17 = vadd.f32 %v842_v15, %v7691_v3  ;;  %1019 = vst [vmem:[#allocation2 + $0x340] sm:$0xff] %v668_v14  ;;  %v670_v18 = vadd.f32 %v669_v16, %v7670_v40 }
 0x152   :  { %v846_v19 = vpop.f32.mrf.mxu0  ;;  %v673_v20 = vpop.f32.mrf.mxu1 }
 0x153   :  { %1010 = vst [vmem:[#allocation2 + $0x2f8] sm:$0xff] %v843_v17  ;;  %v847_v21 = vadd.f32 %v846_v19, %v7686_v62  ;;  %1020 = vst [vmem:[#allocation2 + $0x348] sm:$0xff] %v670_v18  ;;  %v674_v22 = vadd.f32 %v673_v20, %v7665_v35 }
 0x154   :  { %v848_v23 = vpop.f32.mrf.mxu0  ;;  %v675_v24 = vpop.f32.mrf.mxu1 }
 0x155   :  { %1015 = vst [vmem:[#allocation2 + $0x320] sm:$0xff] %v847_v21  ;;  %v849_v26 = vadd.f32 %v848_v23, %v7691_v3  ;;  %1025 = vst [vmem:[#allocation2 + $0x370] sm:$0xff] %v674_v22  ;;  %v676_v27 = vadd.f32 %v675_v24, %v7670_v40 }
 0x156   :  { %v850_v28 = vpop.f32.mrf.mxu0  ;;  %v677_v29 = vpop.f32.mrf.mxu1 }
 0x157   :  { %1016 = vst [vmem:[#allocation2 + $0x328] sm:$0xff] %v849_v26  ;;  %v851_v30 = vadd.f32 %v850_v28, %v7686_v62  ;;  %1026 = vst [vmem:[#allocation2 + $0x378] sm:$0xff] %v676_v27  ;;  %v678_v31 = vadd.f32 %v677_v29, %v7665_v35 }
 0x158   :  { %v852_v32 = vpop.f32.mrf.mxu0  ;;  %v679_v33 = vpop.f32.mrf.mxu1 }
 0x159   :  { %1021 = vst [vmem:[#allocation2 + $0x350] sm:$0xff] %v851_v30  ;;  %v853_v34 = vadd.f32 %v852_v32, %v7691_v3  ;;  %1031 = vst [vmem:[#allocation2 + $0x3a0] sm:$0xff] %v678_v31  ;;  %v680_v36 = vadd.f32 %v679_v33, %v7670_v40 }
 0x15a   :  { %v856_v37 = vpop.f32.mrf.mxu0  ;;  %v683_v38 = vpop.f32.mrf.mxu1 }
 0x15b   :  { %1022 = vst [vmem:[#allocation2 + $0x358] sm:$0xff] %v853_v34  ;;  %v857_v39 = vadd.f32 %v856_v37, %v7686_v62  ;;  %1032 = vst [vmem:[#allocation2 + $0x3a8] sm:$0xff] %v680_v36  ;;  %v684_v47 = vadd.f32 %v683_v38, %v7665_v35 }
 0x15c   :  { %v858_v48 = vpop.f32.mrf.mxu0  ;;  %v685_v49 = vpop.f32.mrf.mxu1 }
 0x15d   :  { %1027 = vst [vmem:[#allocation2 + $0x380] sm:$0xff] %v857_v39  ;;  %v859_v50 = vadd.f32 %v858_v48, %v7691_v3  ;;  %1037 = vst [vmem:[#allocation2 + $0x3d0] sm:$0xff] %v684_v47  ;;  %v686_v51 = vadd.f32 %v685_v49, %v7670_v40 }
 0x15e   :  { %v860_v53 = vpop.f32.mrf.mxu0  ;;  %v687_v54 = vpop.f32.mrf.mxu1 }
 0x15f   :  { %1028 = vst [vmem:[#allocation2 + $0x388] sm:$0xff] %v859_v50  ;;  %v861_v55 = vadd.f32 %v860_v53, %v7686_v62  ;;  %1038 = vst [vmem:[#allocation2 + $0x3d8] sm:$0xff] %v686_v51  ;;  %v688_v56 = vadd.f32 %v687_v54, %v7665_v35 }
 0x160   :  { %v862_v57 = vpop.f32.mrf.mxu0  ;;  %v689_v58 = vpop.f32.mrf.mxu1 }
 0x161   :  { %1033 = vst [vmem:[#allocation2 + $0x3b0] sm:$0xff] %v861_v55  ;;  %v863_v59 = vadd.f32 %v862_v57, %v7691_v3  ;;  %1043 = vst [vmem:[#allocation2 + $0x400] sm:$0xff] %v688_v56  ;;  %v690_v60 = vadd.f32 %v689_v58, %v7670_v40 }
 0x162   :  { %v866_v61 = vpop.f32.mrf.mxu0  ;;  %v693_v63 = vpop.f32.mrf.mxu1 }
 0x163   :  { %1034 = vst [vmem:[#allocation2 + $0x3b8] sm:$0xff] %v863_v59  ;;  %v867_v0 = vadd.f32 %v866_v61, %v7686_v62  ;;  %1044 = vst [vmem:[#allocation2 + $0x408] sm:$0xff] %v690_v60  ;;  %v694_v1 = vadd.f32 %v693_v63, %v7665_v35 }
 0x164   :  { %v868_v2 = vpop.f32.mrf.mxu0  ;;  %v695_v4 = vpop.f32.mrf.mxu1 }
 0x165   :  { %1039 = vst [vmem:[#allocation2 + $0x3e0] sm:$0xff] %v867_v0  ;;  %v869_v5 = vadd.f32 %v868_v2, %v7691_v3  ;;  %1049 = vst [vmem:[#allocation2 + $0x430] sm:$0xff] %v694_v1  ;;  %v696_v45 = vadd.f32 %v695_v4, %v7670_v40 }
 0x166   :  { %v870_v6 = vpop.f32.mrf.mxu0  ;;  %v697_v7 = vpop.f32.mrf.mxu1 }
 0x167   :  { %1040 = vst [vmem:[#allocation2 + $0x3e8] sm:$0xff] %v869_v5  ;;  %v871_v8 = vadd.f32 %v870_v6, %v7686_v62  ;;  %1050 = vst [vmem:[#allocation2 + $0x438] sm:$0xff] %v696_v45  ;;  %v698_v9 = vadd.f32 %v697_v7, %v7665_v35 }
 0x168   :  { %v872_v46 = vpop.f32.mrf.mxu0  ;;  %v699_v10 = vpop.f32.mrf.mxu1 }
 0x169   :  { %1045 = vst [vmem:[#allocation2 + $0x410] sm:$0xff] %v871_v8  ;;  %v873_v11 = vadd.f32 %v872_v46, %v7691_v3  ;;  %1055 = vst [vmem:[#allocation2 + $0x460] sm:$0xff] %v698_v9  ;;  %v700_v43 = vadd.f32 %v699_v10, %v7670_v40 }
 0x16a   :  { %v876_v12 = vpop.f32.mrf.mxu0  ;;  %v703_v13 = vpop.f32.mrf.mxu1 }
 0x16b   :  { %1046 = vst [vmem:[#allocation2 + $0x418] sm:$0xff] %v873_v11  ;;  %v877_v14 = vadd.f32 %v876_v12, %v7686_v62  ;;  %1056 = vst [vmem:[#allocation2 + $0x468] sm:$0xff] %v700_v43  ;;  %v704_v15 = vadd.f32 %v703_v13, %v7665_v35  ;;  %v7809_v12 = vmov 0.0  }
 0x16c   :  { %v878_v16 = vpop.f32.mrf.mxu0  ;;  %v705_v17 = vpop.f32.mrf.mxu1 }
 0x16d   :  { %1051 = vst [vmem:[#allocation2 + $0x440] sm:$0xff] %v877_v14  ;;  %v879_v18 = vadd.f32 %v878_v16, %v7691_v3  ;;  %1061 = vst [vmem:[#allocation2 + $0x490] sm:$0xff] %v704_v15  ;;  %v706_v19 = vadd.f32 %v705_v17, %v7670_v40 }
 0x16e   :  { %v880_v20 = vpop.f32.mrf.mxu0  ;;  %v707_v21 = vpop.f32.mrf.mxu1 }
 0x16f   :  { %1052 = vst [vmem:[#allocation2 + $0x448] sm:$0xff] %v879_v18  ;;  %v881_v22 = vadd.f32 %v880_v20, %v7686_v62  ;;  %1062 = vst [vmem:[#allocation2 + $0x498] sm:$0xff] %v706_v19  ;;  %v708_v23 = vadd.f32 %v707_v21, %v7665_v35 }
 0x170   :  { %v882_v24 = vpop.f32.mrf.mxu0  ;;  %v709_v26 = vpop.f32.mrf.mxu1 }
 0x171   :  { %1057 = vst [vmem:[#allocation2 + $0x470] sm:$0xff] %v881_v22  ;;  %v883_v27 = vadd.f32 %v882_v24, %v7691_v3  ;;  %1067 = vst [vmem:[#allocation2 + $0x4c0] sm:$0xff] %v708_v23  ;;  %v710_v28 = vadd.f32 %v709_v26, %v7670_v40 }
 0x172   :  { %v886_v29 = vpop.f32.mrf.mxu0  ;;  %v713_v30 = vpop.f32.mrf.mxu1 }
 0x173   :  { %1058 = vst [vmem:[#allocation2 + $0x478] sm:$0xff] %v883_v27  ;;  %v887_v31 = vadd.f32 %v886_v29, %v7686_v62  ;;  %1068 = vst [vmem:[#allocation2 + $0x4c8] sm:$0xff] %v710_v28  ;;  %v714_v32 = vadd.f32 %v713_v30, %v7665_v35 }
 0x174   :  { %v888_v33 = vpop.f32.mrf.mxu0  ;;  %v715_v34 = vpop.f32.mrf.mxu1 }
 0x175   :  { %1063 = vst [vmem:[#allocation2 + $0x4a0] sm:$0xff] %v887_v31  ;;  %v889_v36 = vadd.f32 %v888_v33, %v7691_v3  ;;  %1073 = vst [vmem:[#allocation2 + $0x4f0] sm:$0xff] %v714_v32  ;;  %v716_v37 = vadd.f32 %v715_v34, %v7670_v40 }
 0x176   :  { %v890_v38 = vpop.f32.mrf.mxu0  ;;  %v717_v39 = vpop.f32.mrf.mxu1 }
 0x177   :  { %1064 = vst [vmem:[#allocation2 + $0x4a8] sm:$0xff] %v889_v36  ;;  %v891_v47 = vadd.f32 %v890_v38, %v7686_v62  ;;  %1074 = vst [vmem:[#allocation2 + $0x4f8] sm:$0xff] %v716_v37  ;;  %v718_v48 = vadd.f32 %v717_v39, %v7665_v35 }
 0x178   :  { %v892_v49 = vpop.f32.mrf.mxu0  ;;  %v719_v50 = vpop.f32.mrf.mxu1 }
 0x179   :  { %1069 = vst [vmem:[#allocation2 + $0x4d0] sm:$0xff] %v891_v47  ;;  %v893_v51 = vadd.f32 %v892_v49, %v7691_v3  ;;  %1079 = vst [vmem:[#allocation2 + $0x520] sm:$0xff] %v718_v48  ;;  %v720_v53 = vadd.f32 %v719_v50, %v7670_v40 }
 0x17a   :  { %v896_v54 = vpop.f32.mrf.mxu0  ;;  %v723_v55 = vpop.f32.mrf.mxu1 }
 0x17b   :  { %1070 = vst [vmem:[#allocation2 + $0x4d8] sm:$0xff] %v893_v51  ;;  %v897_v56 = vadd.f32 %v896_v54, %v7686_v62  ;;  %1080 = vst [vmem:[#allocation2 + $0x528] sm:$0xff] %v720_v53  ;;  %v724_v57 = vadd.f32 %v723_v55, %v7665_v35 }
 0x17c   :  { %v898_v58 = vpop.f32.mrf.mxu0  ;;  %v725_v59 = vpop.f32.mrf.mxu1 }
 0x17d   :  { %1075 = vst [vmem:[#allocation2 + $0x500] sm:$0xff] %v897_v56  ;;  %v899_v60 = vadd.f32 %v898_v58, %v7691_v3  ;;  %1085 = vst [vmem:[#allocation2 + $0x550] sm:$0xff] %v724_v57  ;;  %v726_v61 = vadd.f32 %v725_v59, %v7670_v40 }
 0x17e   :  { %v900_v63 = vpop.f32.mrf.mxu0  ;;  %v727_v0 = vpop.f32.mrf.mxu1 }
 0x17f   :  { %1076 = vst [vmem:[#allocation2 + $0x508] sm:$0xff] %v899_v60  ;;  %v901_v1 = vadd.f32 %v900_v63, %v7686_v62  ;;  %1086 = vst [vmem:[#allocation2 + $0x558] sm:$0xff] %v726_v61  ;;  %v728_v2 = vadd.f32 %v727_v0, %v7665_v35 }
 0x180   :  { %v902_v4 = vpop.f32.mrf.mxu0  ;;  %v729_v5 = vpop.f32.mrf.mxu1 }
 0x181   :  { %1081 = vst [vmem:[#allocation2 + $0x530] sm:$0xff] %v901_v1  ;;  %v903_v45 = vadd.f32 %v902_v4, %v7691_v3  ;;  %1091 = vst [vmem:[#allocation2 + $0x580] sm:$0xff] %v728_v2  ;;  %v730_v6 = vadd.f32 %v729_v5, %v7670_v40  ;;  %v7811_v40 = vmov 0.0  }
 0x182   :  { %v906_v7 = vpop.f32.mrf.mxu0 }
 0x183   :  { %1082 = vst [vmem:[#allocation2 + $0x538] sm:$0xff] %v903_v45  ;;  %v907_v8 = vadd.f32 %v906_v7, %v7686_v62  ;;  %1092 = vst [vmem:[#allocation2 + $0x588] sm:$0xff] %v730_v6 }
 0x184   :  { %v908_v9 = vpop.f32.mrf.mxu0 }
 0x185   :  { %1087 = vst [vmem:[#allocation2 + $0x560] sm:$0xff] %v907_v8  ;;  %v909_v46 = vadd.f32 %v908_v9, %v7691_v3 }
 0x186   :  { %v910_v10 = vpop.f32.mrf.mxu0 }
 0x187   :  { %1088 = vst [vmem:[#allocation2 + $0x568] sm:$0xff] %v909_v46  ;;  %v911_v35 = vadd.f32 %v910_v10, %v7686_v62 }
 0x188   :  { %v912_v11 = vpop.f32.mrf.mxu0 }
 0x189   :  { %1093 = vst [vmem:[#allocation2 + $0x590] sm:$0xff] %v911_v35  ;;  %v913_v43 = vadd.f32 %v912_v11, %v7691_v3 }
 0x18b   :  { %1094 = vst [vmem:[#allocation2 + $0x598] sm:$0xff] %v913_v43 }
 0x18c LB: > { %v6719_v62 = vld [vmem:[%s9224_s2 + $0x154] ss:$24 sps:$4 sm:$0xff]   ;;  %v6721_v3 = vld [vmem:[%s9224_s2 + $0x150] ss:$24 sps:$4 sm:$0xff]   ;;  %v6722_v13 = vld [vmem:[%s9224_s2 + $0x124] ss:$24 sps:$4 sm:$0xff]   ;;  %v7835_v14 = vpack.c.bf16 %v7251_v12, %v7251_v12  ;;  %s7259_s4 = sphi %s7813_s4, %s1101_s4   ;;  %v7255_v40 = vphi %v7811_v40, %v1868_v40   ;;  %v7251_v12 = vphi %v7809_v12, %v1869_v12  }
 0x18d   : > { %1694 = vmatprep.subr.bf16.mxu0 %v6719_v62  ;;  %v6724_v15 = vld [vmem:[%s9224_s2 + $0x120] ss:$24 sps:$4 sm:$0xff]   ;;  %v6725_v16 = vld [vmem:[%s9224_s2 + $0xf4] ss:$24 sps:$4 sm:$0xff]   ;;  %v6727_v17 = vld [vmem:[%s9224_s2 + $0xf0] ss:$24 sps:$4 sm:$0xff]  }
 0x18e   : > { %1695 = vmatpush1.bf16.msra.mxu0 %v6721_v3  ;;  %1726 = vmatprep.mubr.bf16.mxu0 %v7835_v14  ;;  %v6728_v18 = vld [vmem:[%s9224_s2 + $0xc4] ss:$24 sps:$4 sm:$0xff]   ;;  %v6730_v19 = vld [vmem:[%s9224_s2 + $0xc0] ss:$24 sps:$4 sm:$0xff]   ;;  %v6731_v20 = vld [vmem:[%s9224_s2 + $0x94] ss:$24 sps:$4 sm:$0xff]  }
 0x18f   : > { %1696 = vmatprep.subr.bf16.mxu0 %v6722_v13  ;;  %1767 = vmatprep.mubr.bf16.mxu1 %v7835_v14  ;;  %v6733_v21 = vld [vmem:[%s9224_s2 + $0x90] ss:$24 sps:$4 sm:$0xff]   ;;  %v6734_v22 = vld [vmem:[%s9224_s2 + $0x64] ss:$24 sps:$4 sm:$0xff]   ;;  %v6736_v26 = vld [vmem:[%s9224_s2 + $0x60] ss:$24 sps:$4 sm:$0xff]   ;;  %v8006_v13 = vpack.c.bf16 %v7255_v40, %v7255_v40 }
 0x190   : > { %v6755_v23 = vld [vmem:[%s9224_s2 + $0x15c] ss:$24 sps:$4 sm:$0xff]   ;;  %v6757_v24 = vld [vmem:[%s9224_s2 + $0x158] ss:$24 sps:$4 sm:$0xff]   ;;  %v6761_v27 = vld [vmem:[%s9224_s2 + $0x12c] ss:$24 sps:$4 sm:$0xff]  }
 0x191   : > { %1735 = vmatprep.subr.bf16.mxu1 %v6755_v23  ;;  %v6763_v28 = vld [vmem:[%s9224_s2 + $0x128] ss:$24 sps:$4 sm:$0xff]   ;;  %v6737_v29 = vld [vmem:[%s9224_s2 + $0x34] ss:$24 sps:$4 sm:$0xff]   ;;  %v6740_v32 = vld [vmem:[%s9224_s2 + $0x4] ss:$24 sps:$4 sm:$0xff]  }
 0x192   : > { %1697 = vmatpush1.bf16.msra.mxu0 %v6724_v15  ;;  %1736 = vmatpush1.bf16.msra.mxu1 %v6757_v24  ;;  %v6739_v30 = vld [vmem:[%s9224_s2 + $0x30] ss:$24 sps:$4 sm:$0xff]   ;;  %v6767_v31 = vld [vmem:[%s9224_s2 + $0xfc] ss:$24 sps:$4 sm:$0xff]   ;;  %v6773_v34 = vld [vmem:[%s9224_s2 + $0xcc] ss:$24 sps:$4 sm:$0xff]  }
 0x193   : > { %1698 = vmatprep.subr.bf16.mxu0 %v6725_v16  ;;  %1737 = vmatprep.subr.bf16.mxu1 %v6761_v27  ;;  %v6769_v33 = vld [vmem:[%s9224_s2 + $0xf8] ss:$24 sps:$4 sm:$0xff]   ;;  %v6743_v37 = vld [vmem:[%s9224_s2 + $0x2d4] ss:$24 sps:$4 sm:$0xff]   ;;  %v6775_v38 = vld [vmem:[%s9224_s2 + $0xc8] ss:$24 sps:$4 sm:$0xff]  }
 0x194   : > { %v6742_v36 = vld [vmem:[%s9224_s2] ss:$24 sps:$4 sm:$0xff]   ;;  %v6779_v39 = vld [vmem:[%s9224_s2 + $0x9c] ss:$24 sps:$4 sm:$0xff]   ;;  %v6745_v47 = vld [vmem:[%s9224_s2 + $0x2d0] ss:$24 sps:$4 sm:$0xff]  }
 0x195   : > { %v6746_v48 = vld [vmem:[%s9224_s2 + $0x2a4] ss:$24 sps:$4 sm:$0xff]   ;;  %v6781_v49 = vld [vmem:[%s9224_s2 + $0x98] ss:$24 sps:$4 sm:$0xff]   ;;  %v6749_v53 = vld [vmem:[%s9224_s2 + $0x274] ss:$24 sps:$4 sm:$0xff]  }
 0x196   : > { %1699 = vmatpush1.bf16.msra.mxu0 %v6727_v17  ;;  %1738 = vmatpush1.bf16.msra.mxu1 %v6763_v28  ;;  %v6785_v50 = vld [vmem:[%s9224_s2 + $0x6c] ss:$24 sps:$4 sm:$0xff]   ;;  %v6748_v51 = vld [vmem:[%s9224_s2 + $0x2a0] ss:$24 sps:$4 sm:$0xff]   ;;  %v6791_v55 = vld [vmem:[%s9224_s2 + $0x3c] ss:$24 sps:$4 sm:$0xff]  }
 0x197   : > { %1700 = vmatprep.subr.bf16.mxu0 %v6728_v18  ;;  %1739 = vmatprep.subr.bf16.mxu1 %v6767_v31  ;;  %v6787_v54 = vld [vmem:[%s9224_s2 + $0x68] ss:$24 sps:$4 sm:$0xff]   ;;  %v6752_v57 = vld [vmem:[%s9224_s2 + $0x244] ss:$24 sps:$4 sm:$0xff]   ;;  %v6793_v58 = vld [vmem:[%s9224_s2 + $0x38] ss:$24 sps:$4 sm:$0xff]  }
 0x198   : > { %v6751_v56 = vld [vmem:[%s9224_s2 + $0x270] ss:$24 sps:$4 sm:$0xff]   ;;  %v6797_v59 = vld [vmem:[%s9224_s2 + $0xc] ss:$24 sps:$4 sm:$0xff]   ;;  %v6754_v60 = vld [vmem:[%s9224_s2 + $0x240] ss:$24 sps:$4 sm:$0xff]  }
 0x199   : > { %v6758_v61 = vld [vmem:[%s9224_s2 + $0x214] ss:$24 sps:$4 sm:$0xff]   ;;  %v6799_v63 = vld [vmem:[%s9224_s2 + $0x8] ss:$24 sps:$4 sm:$0xff]   ;;  %v6764_v2 = vld [vmem:[%s9224_s2 + $0x1e4] ss:$24 sps:$4 sm:$0xff]  }
 0x19a   : > { %1701 = vmatpush1.bf16.msra.mxu0 %v6730_v19  ;;  %1740 = vmatpush1.bf16.msra.mxu1 %v6769_v33  ;;  %v6803_v0 = vld [vmem:[%s9224_s2 + $0x2dc] ss:$24 sps:$4 sm:$0xff]   ;;  %v6760_v1 = vld [vmem:[%s9224_s2 + $0x210] ss:$24 sps:$4 sm:$0xff]   ;;  %v6809_v5 = vld [vmem:[%s9224_s2 + $0x2ac] ss:$24 sps:$4 sm:$0xff]  }
 0x19b   : > { %1702 = vmatprep.subr.bf16.mxu0 %v6731_v20  ;;  %1741 = vmatprep.subr.bf16.mxu1 %v6773_v34  ;;  %v6805_v4 = vld [vmem:[%s9224_s2 + $0x2d8] ss:$24 sps:$4 sm:$0xff]   ;;  %v6770_v6 = vld [vmem:[%s9224_s2 + $0x1b4] ss:$24 sps:$4 sm:$0xff]   ;;  %v6811_v7 = vld [vmem:[%s9224_s2 + $0x2a8] ss:$24 sps:$4 sm:$0xff]  }
 0x19c   : > { %v6766_v45 = vld [vmem:[%s9224_s2 + $0x1e0] ss:$24 sps:$4 sm:$0xff]   ;;  %v6815_v8 = vld [vmem:[%s9224_s2 + $0x27c] ss:$24 sps:$4 sm:$0xff]   ;;  %v6772_v9 = vld [vmem:[%s9224_s2 + $0x1b0] ss:$24 sps:$4 sm:$0xff]  }
 0x19d   : > { %v6776_v46 = vld [vmem:[%s9224_s2 + $0x184] ss:$24 sps:$4 sm:$0xff]   ;;  %v6817_v10 = vld [vmem:[%s9224_s2 + $0x278] ss:$24 sps:$4 sm:$0xff]   ;;  %v6823_v62 = vld [vmem:[%s9224_s2 + $0x248] ss:$24 sps:$4 sm:$0xff]  }
 0x19e   : > { %1703 = vmatpush1.bf16.msra.mxu0 %v6733_v21  ;;  %1742 = vmatpush1.bf16.msra.mxu1 %v6775_v38  ;;  %v6821_v35 = vld [vmem:[%s9224_s2 + $0x24c] ss:$24 sps:$4 sm:$0xff]   ;;  %v6778_v11 = vld [vmem:[%s9224_s2 + $0x180] ss:$24 sps:$4 sm:$0xff]   ;;  %v6827_v3 = vld [vmem:[%s9224_s2 + $0x21c] ss:$24 sps:$4 sm:$0xff]  }
 0x19f   : > { %1704 = vmatprep.subr.bf16.mxu0 %v6734_v22  ;;  %1743 = vmatprep.subr.bf16.mxu1 %v6779_v39  ;;  %v6784_v43 = vld [vmem:[%s9224_s2 + $0x164] ss:$24 sps:$4 sm:$0xff]   ;;  %v6782_v15 = vld [vmem:[%s9224_s2 + $0x160] ss:$24 sps:$4 sm:$0xff]   ;;  %v6790_v17 = vld [vmem:[%s9224_s2 + $0x134] ss:$24 sps:$4 sm:$0xff]  }
 0x1a0   : > { %v6829_v16 = vld [vmem:[%s9224_s2 + $0x218] ss:$24 sps:$4 sm:$0xff]   ;;  %v6833_v18 = vld [vmem:[%s9224_s2 + $0x1ec] ss:$24 sps:$4 sm:$0xff]   ;;  %v6835_v20 = vld [vmem:[%s9224_s2 + $0x1e8] ss:$24 sps:$4 sm:$0xff]  }
 0x1a1   : > { %v6788_v19 = vld [vmem:[%s9224_s2 + $0x130] ss:$24 sps:$4 sm:$0xff]   ;;  %v6796_v21 = vld [vmem:[%s9224_s2 + $0x104] ss:$24 sps:$4 sm:$0xff]   ;;  %v6794_v23 = vld [vmem:[%s9224_s2 + $0x100] ss:$24 sps:$4 sm:$0xff]  }
 0x1a2   : > { %1705 = vmatpush1.bf16.msra.mxu0 %v6736_v26  ;;  %1744 = vmatpush1.bf16.msra.mxu1 %v6781_v49  ;;  %v6839_v22 = vld [vmem:[%s9224_s2 + $0x1bc] ss:$24 sps:$4 sm:$0xff]   ;;  %v6841_v24 = vld [vmem:[%s9224_s2 + $0x1b8] ss:$24 sps:$4 sm:$0xff]   ;;  %v6847_v28 = vld [vmem:[%s9224_s2 + $0x188] ss:$24 sps:$4 sm:$0xff]  }
 0x1a3   : > { %1706 = vmatprep.subr.bf16.mxu0 %v6737_v29  ;;  %1745 = vmatprep.subr.bf16.mxu1 %v6785_v50  ;;  %v6802_v26 = vld [vmem:[%s9224_s2 + $0xd4] ss:$24 sps:$4 sm:$0xff]   ;;  %v6800_v27 = vld [vmem:[%s9224_s2 + $0xd0] ss:$24 sps:$4 sm:$0xff]   ;;  %v6808_v29 = vld [vmem:[%s9224_s2 + $0xa4] ss:$24 sps:$4 sm:$0xff]  }
 0x1a4   : > { %v6814_v31 = vld [vmem:[%s9224_s2 + $0x74] ss:$24 sps:$4 sm:$0xff]   ;;  %v6820_v33 = vld [vmem:[%s9224_s2 + $0x44] ss:$24 sps:$4 sm:$0xff]   ;;  %v6818_v34 = vld [vmem:[%s9224_s2 + $0x40] ss:$24 sps:$4 sm:$0xff]  }
 0x1a5   : > { %v6832_v38 = vld [vmem:[%s9224_s2 + $0x2e4] ss:$24 sps:$4 sm:$0xff]   ;;  %v6830_v39 = vld [vmem:[%s9224_s2 + $0x2e0] ss:$24 sps:$4 sm:$0xff]   ;;  %s5724_s16 = sshll.u32 %s7259_s4, 3  ;;  %s1101_s4 = sadd.s32 1, %s7259_s4  }
 0x1a6   : > { %1707 = vmatpush1.bf16.msra.mxu0 %v6739_v30  ;;  %1746 = vmatpush1.bf16.msra.mxu1 %v6787_v54  ;;  %v6806_v30 = vld [vmem:[%s9224_s2 + $0xa0] ss:$24 sps:$4 sm:$0xff]   ;;  %v6844_v49 = vld [vmem:[%s9224_s2 + $0x284] ss:$24 sps:$4 sm:$0xff]   ;;  %s8127_s17 = sshra.s32 %s5724_s16, 3  ;;  %p1098_p0 = scmp.ge.s32.totalorder %s1101_s4, 30  }
 0x1a7   : > { %1708 = vmatprep.subr.bf16.mxu0 %v6740_v32  ;;  %1747 = vmatprep.subr.bf16.mxu1 %v6791_v55  ;;  %v6812_v32 = vld [vmem:[%s9224_s2 + $0x70] ss:$24 sps:$4 sm:$0xff]   ;;  %v6842_v50 = vld [vmem:[%s9224_s2 + $0x280] ss:$24 sps:$4 sm:$0xff]   ;;  %v6853_v54 = vld [vmem:[%s9224_s2 + $0x224] ss:$24 sps:$4 sm:$0xff]  }
 0x1a8   : > { %v6851_v55 = vld [vmem:[%s9224_s2 + $0x220] ss:$24 sps:$4 sm:$0xff]   ;;  %s6148_s0 = smul.u32 48, %s8127_s17  ;;  %s6149_s3 = sshll.u32 %s8127_s17, 4 }
 0x1a9   : > { %s1872_s19 = scalar_lea.vmem [#allocation3], %s6149_s3 }
 0x1aa   : > { %1709 = vmatpush1.bf16.msra.mxu0 %v6742_v36  ;;  %1748 = vmatpush1.bf16.msra.mxu1 %v6793_v58  ;;  %v6826_v36 = vld [vmem:[%s9224_s2 + $0x14] ss:$24 sps:$4 sm:$0xff]   ;;  %v6859_v58 = vld [vmem:[%s9224_s2 + $0x1c4] ss:$24 sps:$4 sm:$0xff]   ;;  %s8130_s18 = scalar_lea.vmem [#allocation2], %s6148_s0 }
 0x1ab   : > { %1710 = vmatprep.subr.bf16.mxu0 %v6743_v37  ;;  %1749 = vmatprep.subr.bf16.mxu1 %v6797_v59  ;;  %v6824_v37 = vld [vmem:[%s9224_s2 + $0x10] ss:$24 sps:$4 sm:$0xff]   ;;  %v6857_v59 = vld [vmem:[%s9224_s2 + $0x1c0] ss:$24 sps:$4 sm:$0xff]  }
 0x1ae   : > { %1711 = vmatpush2.bf16.msra.mxu0 %v6745_v47  ;;  %1750 = vmatpush1.bf16.msra.mxu1 %v6799_v63  ;;  %v6838_v47 = vld [vmem:[%s9224_s2 + $0x2b4] ss:$24 sps:$4 sm:$0xff]  }
 0x1af   : > { %1712 = vmatprep.subr.bf16.mxu0 %v6746_v48  ;;  %1751 = vmatprep.subr.bf16.mxu1 %v6803_v0  ;;  %v6836_v48 = vld [vmem:[%s9224_s2 + $0x2b0] ss:$24 sps:$4 sm:$0xff]  }
 0x1b2   : > { %1713 = vmatpush2.bf16.msra.mxu0 %v6748_v51  ;;  %1752 = vmatpush2.bf16.msra.mxu1 %v6805_v4  ;;  %v6850_v51 = vld [vmem:[%s9224_s2 + $0x254] ss:$24 sps:$4 sm:$0xff]  }
 0x1b3   : > { %1714 = vmatprep.subr.bf16.mxu0 %v6749_v53  ;;  %1753 = vmatprep.subr.bf16.mxu1 %v6809_v5  ;;  %v6848_v53 = vld [vmem:[%s9224_s2 + $0x250] ss:$24 sps:$4 sm:$0xff]  }
 0x1b6   : > { %1715 = vmatpush2.bf16.msra.mxu0 %v6751_v56  ;;  %1754 = vmatpush2.bf16.msra.mxu1 %v6811_v7  ;;  %v6856_v56 = vld [vmem:[%s9224_s2 + $0x1f4] ss:$24 sps:$4 sm:$0xff]  }
 0x1b7   : > { %1716 = vmatprep.subr.bf16.mxu0 %v6752_v57  ;;  %1755 = vmatprep.subr.bf16.mxu1 %v6815_v8  ;;  %v6854_v57 = vld [vmem:[%s9224_s2 + $0x1f0] ss:$24 sps:$4 sm:$0xff]  }
 0x1b8   : > { %v1111_v8 = vld [vmem:[%s8130_s18 + $0x8] sm:$0xff] }
 0x1ba   : > { %1717 = vmatpush2.bf16.msra.mxu0 %v6754_v60  ;;  %1756 = vmatpush2.bf16.msra.mxu1 %v6817_v10  ;;  %v6862_v60 = vld [vmem:[%s9224_s2 + $0x194] ss:$24 sps:$4 sm:$0xff]  }
 0x1bb   : > { %1718 = vmatprep.subr.bf16.mxu0 %v6758_v61  ;;  %1757 = vmatprep.subr.bf16.mxu1 %v6821_v35  ;;  %v6860_v61 = vld [vmem:[%s9224_s2 + $0x190] ss:$24 sps:$4 sm:$0xff]  }
 0x1be   : > { %1719 = vmatpush2.bf16.msra.mxu0 %v6760_v1  ;;  %1758 = vmatpush2.bf16.msra.mxu1 %v6823_v62  ;;  %v1113_v62 = vld [vmem:[%s8130_s18 + $0x18] sm:$0xff] }
 0x1bf   : > { %1720 = vmatprep.subr.bf16.mxu0 %v6764_v2  ;;  %1759 = vmatprep.subr.bf16.mxu1 %v6827_v3 }
 0x1c2   : > { %1721 = vmatpush2.bf16.msra.mxu0 %v6766_v45  ;;  %1760 = vmatpush2.bf16.msra.mxu1 %v6829_v16 }
 0x1c3   : > { %1722 = vmatprep.subr.bf16.mxu0 %v6770_v6  ;;  %1761 = vmatprep.subr.bf16.mxu1 %v6833_v18  ;;  %v1110_v6 = vld [vmem:[%s8130_s18] sm:$0xff] }
 0x1c6   : > { %1723 = vmatpush2.bf16.msra.mxu0 %v6772_v9  ;;  %1762 = vmatpush2.bf16.msra.mxu1 %v6835_v20  ;;  %v1849_v20 = vrot.slane %v7678_v52, %v7588_v42 }
 0x1c7   : > { %1724 = vmatprep.subr.bf16.mxu0 %v6776_v46  ;;  %1763 = vmatprep.subr.bf16.mxu1 %v6839_v22  ;;  %v1853_v22 = vrot.slane %v7678_v52, %v7596_v44  ;;  %v6889_v52 = vld [vmem:[%s9225_s5 + $0x7c] ss:$12 sps:$4 sm:$0xff] (%p1098_p0)  }
 0x1ca   : > { %1725 = vmatpush2.bf16.msra.mxu0 %v6778_v11  ;;  %1764 = vmatpush2.bf16.msra.mxu1 %v6841_v24  ;;  %v1112_v11 = vld [vmem:[%s8130_s18 + $0x10] sm:$0xff] }
 0x1cb   : > { %1776 = vmatprep.subr.bf16.mxu0 %v6784_v43 }
 0x1cd   : > { %1727 = vmatmul.mubr.bf16.vlgmr.msra.gmra.mxu0 %v8006_v13 }
 0x1ce   : > { %1777 = vmatpush1.bf16.msra.mxu0 %v6782_v15  ;;  %1808 = vmatprep.mubr.bf16.mxu0 %v7835_v14  ;;  %v6845_v14 = vld [vmem:[%s9224_s2 + $0x18c] ss:$24 sps:$4 sm:$0xff]  }
 0x1cf   : > { %1778 = vmatprep.subr.bf16.mxu0 %v6790_v17  ;;  %1765 = vmatprep.subr.bf16.mxu1 %v6845_v14 }
 0x1d0   : > { %1766 = vmatpush2.bf16.msra.mxu1 %v6847_v28 }
 0x1d2   : > { %1779 = vmatpush1.bf16.msra.mxu0 %v6788_v19 }
 0x1d3   : > { %1780 = vmatprep.subr.bf16.mxu0 %v6796_v21  ;;  %1768 = vmatmul.mubr.bf16.vlgmr.msra.gmra.mxu1 %v8006_v13 }
 0x1d6   : > { %1781 = vmatpush1.bf16.msra.mxu0 %v6794_v23 }
 0x1d7   : > { %1782 = vmatprep.subr.bf16.mxu0 %v6802_v26 }
 0x1da   : > { %1783 = vmatpush1.bf16.msra.mxu0 %v6800_v27  ;;  %v1114_v27 = vld [vmem:[%s8130_s18 + $0x20] sm:$0xff] }
 0x1db   : > { %1784 = vmatprep.subr.bf16.mxu0 %v6808_v29 }
 0x1de   : > { %1785 = vmatpush1.bf16.msra.mxu0 %v6806_v30 }
 0x1df   : > { %1786 = vmatprep.subr.bf16.mxu0 %v6814_v31 }
 0x1e2   : > { %1787 = vmatpush1.bf16.msra.mxu0 %v6812_v32 }
 0x1e3   : > { %1788 = vmatprep.subr.bf16.mxu0 %v6820_v33  ;;  %v1115_v33 = vld [vmem:[%s8130_s18 + $0x28] sm:$0xff] }
 0x1e6   : > { %1789 = vmatpush1.bf16.msra.mxu0 %v6818_v34 }
 0x1e7   : > { %1790 = vmatprep.subr.bf16.mxu0 %v6826_v36 }
 0x1ea   : > { %1791 = vmatpush1.bf16.msra.mxu0 %v6824_v37 }
 0x1eb   : > { %1792 = vmatprep.subr.bf16.mxu0 %v6832_v38 }
 0x1ee   : > { %1793 = vmatpush2.bf16.msra.mxu0 %v6830_v39 }
 0x1ef   : > { %1794 = vmatprep.subr.bf16.mxu0 %v6838_v47 }
 0x1f2   : > { %1795 = vmatpush2.bf16.msra.mxu0 %v6836_v48 }
 0x1f3   : > { %1796 = vmatprep.subr.bf16.mxu0 %v6844_v49 }
 0x1f6   : > { %1797 = vmatpush2.bf16.msra.mxu0 %v6842_v50 }
 0x1f7   : > { %1798 = vmatprep.subr.bf16.mxu0 %v6850_v51 }
 0x1fa   : > { %1799 = vmatpush2.bf16.msra.mxu0 %v6848_v53 }
 0x1fb   : > { %1800 = vmatprep.subr.bf16.mxu0 %v6853_v54 }
 0x1fe   : > { %1801 = vmatpush2.bf16.msra.mxu0 %v6851_v55 }
 0x1ff   : > { %1802 = vmatprep.subr.bf16.mxu0 %v6856_v56 }
 0x202   : > { %1803 = vmatpush2.bf16.msra.mxu0 %v6854_v57  ;;  %v6883_v57 = vld [vmem:[%s9225_s5 + $0xac] ss:$12 sps:$4 sm:$0xff] (%p1098_p0)  }
 0x203   : > { %1804 = vmatprep.subr.bf16.mxu0 %v6859_v58  ;;  %v6885_v58 = vld [vmem:[%s9225_s5 + $0xa8] ss:$12 sps:$4 sm:$0xff] (%p1098_p0)  }
 0x206   : > { %1805 = vmatpush2.bf16.msra.mxu0 %v6857_v59  ;;  %v6886_v59 = vld [vmem:[%s9225_s5 + $0x94] ss:$12 sps:$4 sm:$0xff] (%p1098_p0)  }
 0x207   : > { %1806 = vmatprep.subr.bf16.mxu0 %v6862_v60  ;;  %v6892_v60 = vld [vmem:[%s9225_s5 + $0x64] ss:$12 sps:$4 sm:$0xff] (%p1098_p0)  }
 0x20a   : > { %1807 = vmatpush2.bf16.msra.mxu0 %v6860_v61  ;;  %v6903_v61 = vld [vmem:[%s9225_s5 + $0x170] ss:$12 sps:$4 sm:$0xff] (%p1098_p0)  }
 0x20b   :  { %2302 = vmatprep.subr.bf16.mxu0 (%p1098_p0), %v6883_v57  ;;  %6151 = vmatprep.subr.bf16.mxu1 (%p1098_p0), %v6903_v61 }
 0x20d   : > { %1809 = vmatmul.mubr.bf16.vlgmr.msra.gmra.mxu0 %v8006_v13 }
 0x20e   :  { %2303 = vmatpush1.bf16.msra.mxu0 (%p1098_p0), %v6885_v58 }
 0x20f   :  { %2304 = vmatprep.subr.bf16.mxu0 (%p1098_p0), %v6886_v59 }
 0x28d   : > { %v1728_v63 = vpop.f32.mrf.mxu0 }
 0x28e   : > { %v1817_v9 = vadd.f32 %v1728_v63, %v1110_v6  ;;  %v6894_v63 = vld [vmem:[%s9225_s5 + $0x60] ss:$12 sps:$4 sm:$0xff] (%p1098_p0)  }
 0x28f   : > { %v1730_v0 = vpop.f32.mrf.mxu0  ;;  %v6913_v6 = vld [vmem:[%s9225_s5 + $0x140] ss:$12 sps:$4 sm:$0xff] (%p1098_p0)  }
 0x290   : > { %v1818_v46 = vadd.f32 %v1730_v0, %v1111_v8  ;;  %v5822_v10 = vmul.f32 -1.442695, %v1817_v9  ;;  %v6905_v0 = vld [vmem:[%s9225_s5 + $0xb0] ss:$12 sps:$4 sm:$0xff] (%p1098_p0)   ;;  %v6918_v9 = vld [vmem:[%s9225_s5 + $0x128] ss:$12 sps:$4 sm:$0xff] (%p1098_p0)  }
 0x291   : > { %v1732_v1 = vpop.f32.mrf.mxu0  ;;  %6152 = vmatpush3.bf16.msra.mxu1 (%p1098_p0), %v6905_v0  ;;  %v6900_v8 = vld [vmem:[%s9225_s5 + $0x30] ss:$12 sps:$4 sm:$0xff] (%p1098_p0)  }
 0x292   : > { %v5823_v35 = vmul.f32 -1.442695, %v1818_v46  ;;  %6863 = vpow2.f32 %v5822_v10  ;;  %v6895_v1 = vld [vmem:[%s9225_s5 + $0x4c] ss:$12 sps:$4 sm:$0xff] (%p1098_p0)   ;;  %v6901_v46 = vld [vmem:[%s9225_s5 + $0x1c] ss:$12 sps:$4 sm:$0xff] (%p1098_p0)  }
 0x293   : > { %v1733_v2 = vpop.f32.mrf.mxu0  ;;  %v1769_v4 = vpop.f32.mrf.mxu1  ;;  %v6920_v10 = vld [vmem:[%s9225_s5 + $0x68] ss:$12 sps:$4 sm:$0xff] (%p1098_p0)  }
 0x294   : > { %6865 = vpow2.f32 %v5823_v35  ;;  %v1831_v43 = vadd.f32 %v1769_v4, %v1112_v11  ;;  %v6908_v2 = vld [vmem:[%s9225_s5 + $0x158] ss:$12 sps:$4 sm:$0xff] (%p1098_p0)   ;;  %v6923_v11 = vld [vmem:[%s9225_s5 + $0x110] ss:$12 sps:$4 sm:$0xff] (%p1098_p0)  }
 0x295   : > { %v1771_v5 = vpop.f32.mrf.mxu1  ;;  %v6910_v4 = vld [vmem:[%s9225_s5 + $0x98] ss:$12 sps:$4 sm:$0xff] (%p1098_p0)   ;;  %6153 = vmatprep.subr.bf16.mxu1 (%p1098_p0), %v6908_v2 }
 0x296   : > { %v5824_v13 = vmul.f32 -1.442695, %v1831_v43  ;;  %v1832_v16 = vadd.f32 %v1771_v5, %v1113_v62  ;;  %v6897_v5 = vld [vmem:[%s9225_s5 + $0x48] ss:$12 sps:$4 sm:$0xff] (%p1098_p0)   ;;  %6154 = vmatpush3.bf16.msra.mxu1 (%p1098_p0), %v6910_v4  ;;  %v6904_v35 = vld [vmem:[%s9225_s5 + $0x18] ss:$12 sps:$4 sm:$0xff] (%p1098_p0)  }
 0x297   : > { %v1773_v45 = vpop.f32.mrf.mxu1  ;;  %6155 = vmatprep.subr.bf16.mxu1 (%p1098_p0), %v6913_v6  ;;  %v6906_v43 = vld [vmem:[%s9225_s5 + $0x4] ss:$12 sps:$4 sm:$0xff] (%p1098_p0)  }
 0x298   : > { %6867 = vpow2.f32 %v5824_v13  ;;  %v5825_v19 = vmul.f32 -1.442695, %v1832_v16  ;;  %v6898_v45 = vld [vmem:[%s9225_s5 + $0x34] ss:$12 sps:$4 sm:$0xff] (%p1098_p0)   ;;  %v6925_v62 = vld [vmem:[%s9225_s5 + $0x50] ss:$12 sps:$4 sm:$0xff] (%p1098_p0)  }
 0x299   : > { %v1774_v7 = vpop.f32.mrf.mxu1  ;;  %v6909_v13 = vld [vmem:[%s9225_s5] ss:$12 sps:$4 sm:$0xff] (%p1098_p0)   ;;  %v6930_v16 = vld [vmem:[%s9225_s5 + $0x38] ss:$12 sps:$4 sm:$0xff] (%p1098_p0)  }
 0x29a   :  { %v6915_v7 = vld [vmem:[%s9225_s5 + $0x80] ss:$12 sps:$4 sm:$0xff] (%p1098_p0)  }
 0x29b   :  { %6156 = vmatpush3.bf16.msra.mxu1 (%p1098_p0), %v6915_v7 }
 0x29c   :  { %6157 = vmatprep.subr.bf16.mxu1 (%p1098_p0), %v6918_v9 }
 0x29f   : > { %v6864_v3 = vpop.eup %6863  ;;  %6158 = vmatpush3.bf16.msra.mxu1 (%p1098_p0), %v6920_v10 }
 0x2a0   : > { %v1825_v17 = vadd.f32 1.0, %v6864_v3  ;;  %6159 = vmatprep.subr.bf16.mxu1 (%p1098_p0), %v6923_v11  ;;  %v6928_v3 = vld [vmem:[%s9225_s5 + $0xf8] ss:$12 sps:$4 sm:$0xff] (%p1098_p0)  }
 0x2a1   : > { %v6866_v15 = vpop.eup %6865 }
 0x2a2   : > { %v1826_v18 = vadd.f32 1.0, %v6866_v15  ;;  %6869 = vrcp.f32 %v1825_v17  ;;  %v6911_v15 = vld [vmem:[%s9225_s5 + $0x16c] ss:$12 sps:$4 sm:$0xff] (%p1098_p0)  }
 0x2a3   :  { %6160 = vmatpush3.bf16.msra.mxu1 (%p1098_p0), %v6925_v62  ;;  %v6933_v17 = vld [vmem:[%s9225_s5 + $0xe0] ss:$12 sps:$4 sm:$0xff] (%p1098_p0)  }
 0x2a4   : > { %6871 = vrcp.f32 %v1826_v18  ;;  %6161 = vmatprep.subr.bf16.mxu1 (%p1098_p0), %v6928_v3  ;;  %v6914_v18 = vld [vmem:[%s9225_s5 + $0x168] ss:$12 sps:$4 sm:$0xff] (%p1098_p0)  }
 0x2a5   : > { %6873 = vpow2.f32 %v5825_v19  ;;  %v6868_v21 = vpop.eup %6867  ;;  %v6916_v19 = vld [vmem:[%s9225_s5 + $0x154] ss:$12 sps:$4 sm:$0xff] (%p1098_p0)  }
 0x2a6   : > { %v1839_v14 = vadd.f32 1.0, %v6868_v21  ;;  %v6935_v21 = vld [vmem:[%s9225_s5 + $0x20] ss:$12 sps:$4 sm:$0xff] (%p1098_p0)  }
 0x2a7   :  { %6162 = vmatpush3.bf16.msra.mxu1 (%p1098_p0), %v6930_v16 }
 0x2a8   : > { %6875 = vrcp.f32 %v1839_v14  ;;  %6163 = vmatprep.subr.bf16.mxu1 (%p1098_p0), %v6933_v17  ;;  %v6940_v14 = vld [vmem:[%s9225_s5 + $0x8] ss:$12 sps:$4 sm:$0xff] (%p1098_p0)  }
 0x2ab   :  { %6164 = vmatpush3.bf16.msra.mxu1 (%p1098_p0), %v6935_v21 }
 0x2af   : > { %v6870_v26 = vpop.eup %6869 }
 0x2b1   : > { %v6872_v29 = vpop.eup %6871 }
 0x2b2   : > { %v6874_v32 = vpop.eup %6873 }
 0x2b3   : > { %v1840_v39 = vadd.f32 1.0, %v6874_v32 }
 0x2b5   : > { %v6876_v48 = vpop.eup %6875 }
 0x2cd   : > { %v1810_v23 = vpop.f32.mrf.mxu0 }
 0x2ce   : > { %v1856_v24 = vadd.f32 %v1849_v20, %v1810_v23  ;;  %v6919_v20 = vld [vmem:[%s9225_s5 + $0x150] ss:$12 sps:$4 sm:$0xff] (%p1098_p0)  }
 0x2cf   : > { %v1812_v28 = vpop.f32.mrf.mxu0 }
 0x2d0   : > { %v1858_v30 = vmul.f32 %v6870_v26, %v1856_v24  ;;  %v1857_v31 = vadd.f32 %v1853_v22, %v1812_v28  ;;  %v6938_v22 = vld [vmem:[%s9225_s5 + $0xc8] ss:$12 sps:$4 sm:$0xff] (%p1098_p0)  }
 0x2d1   : > { %v1814_v34 = vpop.f32.mrf.mxu0  ;;  %v6921_v26 = vld [vmem:[%s9225_s5 + $0x13c] ss:$12 sps:$4 sm:$0xff] (%p1098_p0)   ;;  %6165 = vmatprep.subr.bf16.mxu1 (%p1098_p0), %v6938_v22 }
 0x2d2   : > { %v1860_v36 = vadd.f32 %v1858_v30, %v1114_v27  ;;  %v1859_v37 = vmul.f32 %v6872_v29, %v1857_v31  ;;  %v6924_v31 = vld [vmem:[%s9225_s5 + $0x138] ss:$12 sps:$4 sm:$0xff] (%p1098_p0)   ;;  %6166 = vmatpush3.bf16.msra.mxu1 (%p1098_p0), %v6940_v14 }
 0x2d3   : > { %v1815_v38 = vpop.f32.mrf.mxu0 }
 0x2d4   : > { %6877 = vtanh.f32 %v1860_v36  ;;  %v1861_v47 = vadd.f32 %v1859_v37, %v1115_v33  ;;  %v6926_v33 = vld [vmem:[%s9225_s5 + $0x124] ss:$12 sps:$4 sm:$0xff] (%p1098_p0)   ;;  %v6929_v37 = vld [vmem:[%s9225_s5 + $0x120] ss:$12 sps:$4 sm:$0xff] (%p1098_p0)  }
 0x2d5   :  { %v6931_v38 = vld [vmem:[%s9225_s5 + $0x10c] ss:$12 sps:$4 sm:$0xff] (%p1098_p0)  }
 0x2d6   : > { %6879 = vtanh.f32 %v1861_v47 }
 0x2d7   : > { %6881 = vrcp.f32 %v1840_v39 }
 0x2e1   : > { %v6878_v49 = vpop.eup %6877 }
 0x2e2   : > { %v1864_v50 = vsub.f32 %v7255_v40, %v6878_v49 }
 0x2e3   : > { %v6880_v51 = vpop.eup %6879 }
 0x2e4   : > { %v1866_v53 = vmul.f32 %v6876_v48, %v1864_v50  ;;  %v1865_v54 = vsub.f32 %v7251_v12, %v6880_v51  ;;  %v6882_v55 = vpop.eup %6881  ;;  %v6934_v50 = vld [vmem:[%s9225_s5 + $0x108] ss:$12 sps:$4 sm:$0xff] (%p1098_p0)  }
 0x2e6   : > { %v1868_v40 = vadd.f32 %v6878_v49, %v1866_v53   ;;  %v1867_v56 = vmul.f32 %v6882_v55, %v1865_v54  ;;  %1100 = sbr.rel (!%p1098_p0) target bundleno = 396 (0x18c), region = 82  ;;  %v6939_v55 = vld [vmem:[%s9225_s5 + $0xf0] ss:$12 sps:$4 sm:$0xff] (%p1098_p0)  }
 0x2e8   : > { %1873 = vst [vmem:[%s1872_s19] sm:$0xff] %v1868_v40  ;;  %v1869_v12 = vadd.f32 %v6880_v51, %v1867_v56   ;;  %v6888_v40 = vld [vmem:[%s9225_s5 + $0x90] ss:$12 sps:$4 sm:$0xff] (%p1098_p0)   ;;  %v6936_v51 = vld [vmem:[%s9225_s5 + $0xf4] ss:$12 sps:$4 sm:$0xff] (%p1098_p0)  }
 0x2e9   :  { %2305 = vmatpush1.bf16.msra.mxu0 (%p1098_p0), %v6888_v40  ;;  %v6941_v56 = vld [vmem:[%s9225_s5 + $0xdc] ss:$12 sps:$4 sm:$0xff] (%p1098_p0)  }
 0x2ea   : > { %1874 = vst [vmem:[%s1872_s19 + $0x8] sm:$0xff] %v1869_v12  ;;  %v6891_v12 = vld [vmem:[%s9225_s5 + $0x78] ss:$12 sps:$4 sm:$0xff] (%p1098_p0)   ;;  %2306 = vmatprep.subr.bf16.mxu0 (%p1098_p0), %v6889_v52 }
 0x2eb   :  { %v6943_v52 = vld [vmem:[%s9225_s5 + $0xd8] ss:$12 sps:$4 sm:$0xff]  }
 0x2ed   :  { %2307 = vmatpush1.bf16.msra.mxu0 %v6891_v12  ;;  %v6944_v12 = vld [vmem:[%s9225_s5 + $0xc4] ss:$12 sps:$4 sm:$0xff]  }
 0x2ee   :  { %2308 = vmatprep.subr.bf16.mxu0 %v6892_v60 }
 0x2f1   :  { %2309 = vmatpush1.bf16.msra.mxu0 %v6894_v63  ;;  %v1876_v23 = vld [vmem:[#allocation3 + $0x8] sm:$0xff]  ;;  %v1878_v24 = vld [vmem:[#allocation3 + $0x18] sm:$0xff]  ;;  %v1875_v28 = vld [vmem:[#allocation3] sm:$0xff] }
 0x2f2   :  { %2310 = vmatprep.subr.bf16.mxu0 %v6895_v1  ;;  %v1936_v27 = vpack.c.bf16 %v1878_v24, %v1876_v23  ;;  %v1877_v29 = vld [vmem:[#allocation3 + $0x10] sm:$0xff]  ;;  %v1880_v30 = vld [vmem:[#allocation3 + $0x28] sm:$0xff]  ;;  %v1882_v32 = vld [vmem:[#allocation3 + $0x38] sm:$0xff] }
 0x2f3   :  { %v1935_v34 = vpack.c.bf16 %v1877_v29, %v1875_v28  ;;  %v1938_v36 = vpack.c.bf16 %v1882_v32, %v1880_v30  ;;  %v1879_v39 = vld [vmem:[#allocation3 + $0x20] sm:$0xff]  ;;  %v1881_v47 = vld [vmem:[#allocation3 + $0x30] sm:$0xff]  ;;  %v1884_v48 = vld [vmem:[#allocation3 + $0x48] sm:$0xff] }
 0x2f4   :  { %2517 = vmatprep.mubr.bf16.mxu1 %v1936_v27  ;;  %2334 = vmatprep.mubr.bf16.mxu0 %v1936_v27  ;;  %v1886_v49 = vld [vmem:[#allocation3 + $0x58] sm:$0xff]  ;;  %v1937_v53 = vpack.c.bf16 %v1881_v47, %v1879_v39  ;;  %v1883_v57 = vld [vmem:[#allocation3 + $0x40] sm:$0xff]  ;;  %v1885_v58 = vld [vmem:[#allocation3 + $0x50] sm:$0xff] }
 0x2f5   :  { %2311 = vmatpush1.bf16.msra.mxu0 %v6897_v5  ;;  %2518 = vmatmul.mubr.bf16.vlgmr.msra.gmra.mxu1 %v1935_v34  ;;  %v1940_v54 = vpack.c.bf16 %v1886_v49, %v1884_v48  ;;  %v1888_v59 = vld [vmem:[#allocation3 + $0x68] sm:$0xff]  ;;  %v1890_v40 = vld [vmem:[#allocation3 + $0x78] sm:$0xff]  ;;  %v1939_v60 = vpack.c.bf16 %v1885_v58, %v1883_v57  ;;  %v1887_v0 = vld [vmem:[#allocation3 + $0x60] sm:$0xff] }
 0x2f6   :  { %2312 = vmatprep.subr.bf16.mxu0 %v6898_v45  ;;  %2525 = vmatprep.mubr.bf16.mxu1 %v1938_v36  ;;  %v1942_v61 = vpack.c.bf16 %v1890_v40, %v1888_v59  ;;  %v6946_v63 = vld [vmem:[%s9225_s5 + $0xc0] ss:$12 sps:$4 sm:$0xff]   ;;  %v1889_v1 = vld [vmem:[#allocation3 + $0x70] sm:$0xff]  ;;  %v1894_v4 = vld [vmem:[#allocation3 + $0x98] sm:$0xff] }
 0x2f7   :  { %v1892_v2 = vld [vmem:[#allocation3 + $0x88] sm:$0xff]  ;;  %v1941_v5 = vpack.c.bf16 %v1889_v1, %v1887_v0  ;;  %v1891_v6 = vld [vmem:[#allocation3 + $0x80] sm:$0xff]  ;;  %v1893_v7 = vld [vmem:[#allocation3 + $0x90] sm:$0xff] }
 0x2f8   :  { %v1944_v45 = vpack.c.bf16 %v1894_v4, %v1892_v2  ;;  %v1898_v9 = vld [vmem:[#allocation3 + $0xb8] sm:$0xff]  ;;  %v1897_v11 = vld [vmem:[#allocation3 + $0xb0] sm:$0xff]  ;;  %v1904_v17 = vld [vmem:[#allocation3 + $0xe8] sm:$0xff] }
 0x2f9   :  { %2313 = vmatpush1.bf16.msra.mxu0 %v6900_v8  ;;  %v1896_v8 = vld [vmem:[#allocation3 + $0xa8] sm:$0xff]  ;;  %v1902_v62 = vld [vmem:[#allocation3 + $0xd8] sm:$0xff]  ;;  %v1901_v16 = vld [vmem:[#allocation3 + $0xd0] sm:$0xff] }
 0x2fa   :  { %2314 = vmatprep.subr.bf16.mxu0 %v6901_v46  ;;  %v1943_v46 = vpack.c.bf16 %v1893_v7, %v1891_v6  ;;  %v1946_v10 = vpack.c.bf16 %v1898_v9, %v1896_v8  ;;  %v1903_v21 = vld [vmem:[#allocation3 + $0xe0] sm:$0xff]  ;;  %v1905_v22 = vld [vmem:[#allocation3 + $0xf0] sm:$0xff]  ;;  %v1908_v23 = vld [vmem:[#allocation3 + $0x108] sm:$0xff] }
 0x2fb   :  { %v1910_v24 = vld [vmem:[#allocation3 + $0x118] sm:$0xff]  ;;  %v1907_v27 = vld [vmem:[#allocation3 + $0x100] sm:$0xff]  ;;  %v1909_v28 = vld [vmem:[#allocation3 + $0x110] sm:$0xff] }
 0x2fc   :  { %v1952_v14 = vpack.c.bf16 %v1910_v24, %v1908_v23  ;;  %v1912_v29 = vld [vmem:[#allocation3 + $0x128] sm:$0xff]  ;;  %v1914_v30 = vld [vmem:[#allocation3 + $0x138] sm:$0xff]  ;;  %v1915_v47 = vld [vmem:[#allocation3 + $0x140] sm:$0xff] }
 0x2fd   :  { %2315 = vmatpush1.bf16.msra.mxu0 %v6904_v35  ;;  %2526 = vmatmul.mubr.bf16.gmra.mxu1 %v1937_v53  ;;  %v1895_v35 = vld [vmem:[#allocation3 + $0xa0] sm:$0xff]  ;;  %v1954_v32 = vpack.c.bf16 %v1914_v30, %v1912_v29  ;;  %v1917_v48 = vld [vmem:[#allocation3 + $0x150] sm:$0xff]  ;;  %v1920_v49 = vld [vmem:[#allocation3 + $0x168] sm:$0xff] }
 0x2fe   :  { %2316 = vmatprep.subr.bf16.mxu0 %v6906_v43  ;;  %2533 = vmatprep.mubr.bf16.mxu1 %v1940_v54  ;;  %v1900_v43 = vld [vmem:[#allocation3 + $0xc8] sm:$0xff]  ;;  %v1945_v3 = vpack.c.bf16 %v1897_v11, %v1895_v35  ;;  %v1926_v57 = vld [vmem:[#allocation3 + $0x198] sm:$0xff]  ;;  %v1923_v40 = vld [vmem:[#allocation3 + $0x180] sm:$0xff] }
 0x2ff   :  { %v1927_v0 = vld [vmem:[#allocation3 + $0x1a0] sm:$0xff]  ;;  %v1929_v1 = vld [vmem:[#allocation3 + $0x1b0] sm:$0xff]  ;;  %v1932_v2 = vld [vmem:[#allocation3 + $0x1c8] sm:$0xff] }
 0x300   :  { %v1934_v4 = vld [vmem:[#allocation3 + $0x1d8] sm:$0xff]  ;;  %v1931_v6 = vld [vmem:[#allocation3 + $0x1c0] sm:$0xff]  ;;  %v1933_v7 = vld [vmem:[#allocation3 + $0x1d0] sm:$0xff] }
 0x301   :  { %2317 = vmatpush1.bf16.msra.mxu0 %v6909_v13  ;;  %v1948_v13 = vpack.c.bf16 %v1902_v62, %v1900_v43  ;;  %v1963_v8 = vpack.c.bf16 %v1933_v7, %v1931_v6  ;;  %v2029_v9 = vld [vmem:[%s9227_s7] sm:$0x7] }
 0x302   :  { %2318 = vmatprep.subr.bf16.mxu0 %v6911_v15  ;;  %v1899_v15 = vld [vmem:[#allocation3 + $0xc0] sm:$0xff] }
 0x305   :  { %2319 = vmatpush2.bf16.msra.mxu0 %v6914_v18  ;;  %2534 = vmatmul.mubr.bf16.gmra.mxu1 %v1939_v60  ;;  %v1906_v18 = vld [vmem:[#allocation3 + $0xf8] sm:$0xff] }
 0x306   :  { %2320 = vmatprep.subr.bf16.mxu0 %v6916_v19  ;;  %2541 = vmatprep.mubr.bf16.mxu1 %v1942_v61  ;;  %v1947_v19 = vpack.c.bf16 %v1901_v16, %v1899_v15 }
 0x309   :  { %2321 = vmatpush2.bf16.msra.mxu0 %v6919_v20  ;;  %v1950_v20 = vpack.c.bf16 %v1906_v18, %v1904_v17 }
 0x30a   :  { %2322 = vmatprep.subr.bf16.mxu0 %v6921_v26  ;;  %v1949_v26 = vpack.c.bf16 %v1905_v22, %v1903_v21  ;;  %v8309_v21 = vld [vmem:[%s9228_s8] ss:$0 sm:$0xff]  ;;  %s8406_s8 = smov 0  }
 0x30d   :  { %2323 = vmatpush2.bf16.msra.mxu0 %v6924_v31  ;;  %2542 = vmatmul.mubr.bf16.gmra.mxu1 %v1941_v5  ;;  %v1951_v31 = vpack.c.bf16 %v1909_v28, %v1907_v27  ;;  %v8316_v28 = vrot.slane %v2029_v9, %v7596_v44 }
 0x30e   :  { %2324 = vmatprep.subr.bf16.mxu0 %v6926_v33  ;;  %2549 = vmatprep.mubr.bf16.mxu1 %v1944_v45  ;;  %v1911_v33 = vld [vmem:[#allocation3 + $0x120] sm:$0xff] }
 0x311   :  { %2325 = vmatpush2.bf16.msra.mxu0 %v6929_v37  ;;  %v1918_v37 = vld [vmem:[#allocation3 + $0x158] sm:$0xff] }
 0x312   :  { %2326 = vmatprep.subr.bf16.mxu0 %v6931_v38 }
 0x315   :  { %2327 = vmatpush2.bf16.msra.mxu0 %v6934_v50  ;;  %2550 = vmatmul.mubr.bf16.gmra.mxu1 %v1943_v46  ;;  %v1922_v50 = vld [vmem:[#allocation3 + $0x178] sm:$0xff] }
 0x316   :  { %2328 = vmatprep.subr.bf16.mxu0 %v6936_v51  ;;  %2557 = vmatprep.mubr.bf16.mxu1 %v1946_v10  ;;  %v1955_v51 = vpack.c.bf16 %v1917_v48, %v1915_v47 }
 0x319   :  { %2329 = vmatpush2.bf16.msra.mxu0 %v6939_v55  ;;  %v1921_v55 = vld [vmem:[#allocation3 + $0x170] sm:$0xff] }
 0x31a   :  { %2330 = vmatprep.subr.bf16.mxu0 %v6941_v56  ;;  %v1924_v56 = vld [vmem:[#allocation3 + $0x188] sm:$0xff] }
 0x31b   :  { %v1960_v59 = vpack.c.bf16 %v1926_v57, %v1924_v56 }
 0x31d   :  { %2331 = vmatpush2.bf16.msra.mxu0 %v6943_v52  ;;  %2558 = vmatmul.mubr.bf16.gmra.mxu1 %v1945_v3  ;;  %v1925_v52 = vld [vmem:[#allocation3 + $0x190] sm:$0xff] }
 0x31e   :  { %2332 = vmatprep.subr.bf16.mxu0 %v6944_v12  ;;  %2565 = vmatprep.mubr.bf16.mxu1 %v1948_v13  ;;  %v1928_v12 = vld [vmem:[#allocation3 + $0x1a8] sm:$0xff] }
 0x321   :  { %2333 = vmatpush2.bf16.msra.mxu0 %v6946_v63 }
 0x324   :  { %2335 = vmatmul.mubr.bf16.vlgmr.msra.gmra.mxu0 %v1935_v34  ;;  %v1913_v34 = vld [vmem:[#allocation3 + $0x130] sm:$0xff] }
 0x325   :  { %2344 = vmatprep.mubr.bf16.mxu0 %v1938_v36  ;;  %2566 = vmatmul.mubr.bf16.gmra.mxu1 %v1947_v19  ;;  %v1916_v36 = vld [vmem:[#allocation3 + $0x148] sm:$0xff]  ;;  %v1953_v38 = vpack.c.bf16 %v1913_v34, %v1911_v33 }
 0x326   :  { %2573 = vmatprep.mubr.bf16.mxu1 %v1950_v20  ;;  %v1956_v39 = vpack.c.bf16 %v1918_v37, %v1916_v36 }
 0x32c   :  { %2345 = vmatmul.mubr.bf16.gmra.mxu0 %v1937_v53  ;;  %v1958_v53 = vpack.c.bf16 %v1922_v50, %v1920_v49 }
 0x32d   :  { %2354 = vmatprep.mubr.bf16.mxu0 %v1940_v54  ;;  %2574 = vmatmul.mubr.bf16.gmra.mxu1 %v1949_v26  ;;  %v1919_v54 = vld [vmem:[#allocation3 + $0x160] sm:$0xff] }
 0x32e   :  { %2581 = vmatprep.mubr.bf16.mxu1 %v1952_v14  ;;  %v1957_v58 = vpack.c.bf16 %v1921_v55, %v1919_v54 }
 0x334   :  { %2355 = vmatmul.mubr.bf16.gmra.mxu0 %v1939_v60  ;;  %v1930_v60 = vld [vmem:[#allocation3 + $0x1b8] sm:$0xff] }
 0x335   :  { %2364 = vmatprep.mubr.bf16.mxu0 %v1942_v61  ;;  %2582 = vmatmul.mubr.bf16.gmra.mxu1 %v1951_v31  ;;  %v1959_v61 = vpack.c.bf16 %v1925_v52, %v1923_v40  ;;  %v1962_v63 = vpack.c.bf16 %v1930_v60, %v1928_v12 }
 0x336   :  { %2589 = vmatprep.mubr.bf16.mxu1 %v1954_v32 }
 0x33c   :  { %2365 = vmatmul.mubr.bf16.gmra.mxu0 %v1941_v5  ;;  %v1961_v5 = vpack.c.bf16 %v1929_v1, %v1927_v0 }
 0x33d   :  { %2374 = vmatprep.mubr.bf16.mxu0 %v1944_v45  ;;  %2590 = vmatmul.mubr.bf16.gmra.mxu1 %v1953_v38  ;;  %v1964_v45 = vpack.c.bf16 %v1934_v4, %v1932_v2 }
 0x33e   :  { %2597 = vmatprep.mubr.bf16.mxu1 %v1956_v39 }
 0x344   :  { %2375 = vmatmul.mubr.bf16.gmra.mxu0 %v1943_v46 }
 0x345   :  { %2384 = vmatprep.mubr.bf16.mxu0 %v1946_v10  ;;  %2598 = vmatmul.mubr.bf16.gmra.mxu1 %v1955_v51  ;;  %v8301_v10 = vrot.slane %v2029_v9, %v105_v25 }
 0x346   :  { %2605 = vmatprep.mubr.bf16.mxu1 %v1958_v53 }
 0x34c   :  { %2385 = vmatmul.mubr.bf16.gmra.mxu0 %v1945_v3 }
 0x34d   :  { %2394 = vmatprep.mubr.bf16.mxu0 %v1948_v13  ;;  %2606 = vmatmul.mubr.bf16.gmra.mxu1 %v1957_v58 }
 0x34e   :  { %2613 = vmatprep.mubr.bf16.mxu1 %v1960_v59 }
 0x354   :  { %2395 = vmatmul.mubr.bf16.gmra.mxu0 %v1947_v19 }
 0x355   :  { %2404 = vmatprep.mubr.bf16.mxu0 %v1950_v20  ;;  %2614 = vmatmul.mubr.bf16.gmra.mxu1 %v1959_v61 }
 0x356   :  { %2621 = vmatprep.mubr.bf16.mxu1 %v1962_v63 }
 0x35c   :  { %2405 = vmatmul.mubr.bf16.gmra.mxu0 %v1949_v26  ;;  %v8313_v26 = vrot.slane %v2029_v9, %v7588_v42 }
 0x35d   :  { %2414 = vmatprep.mubr.bf16.mxu0 %v1952_v14  ;;  %2622 = vmatmul.mubr.bf16.gmra.mxu1 %v1961_v5 }
 0x35e   :  { %2629 = vmatprep.mubr.bf16.mxu1 %v1964_v45 }
 0x364   :  { %2415 = vmatmul.mubr.bf16.gmra.mxu0 %v1951_v31 }
 0x365   :  { %2424 = vmatprep.mubr.bf16.mxu0 %v1954_v32  ;;  %2630 = vmatmul.mubr.bf16.gmra.mxu1 %v1963_v8 }
 0x36c   :  { %2425 = vmatmul.mubr.bf16.gmra.mxu0 %v1953_v38 }
 0x36d   :  { %2434 = vmatprep.mubr.bf16.mxu0 %v1956_v39 }
 0x374   :  { %2435 = vmatmul.mubr.bf16.gmra.mxu0 %v1955_v51 }
 0x375   :  { %2444 = vmatprep.mubr.bf16.mxu0 %v1958_v53 }
 0x37c   :  { %2445 = vmatmul.mubr.bf16.gmra.mxu0 %v1957_v58 }
 0x37d   :  { %2454 = vmatprep.mubr.bf16.mxu0 %v1960_v59 }
 0x384   :  { %2455 = vmatmul.mubr.bf16.gmra.mxu0 %v1959_v61 }
 0x385   :  { %2464 = vmatprep.mubr.bf16.mxu0 %v1962_v63 }
 0x38c   :  { %2465 = vmatmul.mubr.bf16.gmra.mxu0 %v1961_v5 }
 0x38d   :  { %2474 = vmatprep.mubr.bf16.mxu0 %v1964_v45 }
 0x394   :  { %2475 = vmatmul.mubr.bf16.gmra.mxu0 %v1963_v8 }
 0x3b5   :  { %v6167_v46 = vpop.f32.mrf.mxu1 }
 0x3b7   :  { %v6168_v35 = vpop.f32.mrf.mxu1 }
 0x3b8   :  { %v6169_v11 = vadd.f32 %v6168_v35, %v6167_v46 }
 0x3b9   :  { %v6170_v43 = vpop.f32.mrf.mxu1 }
 0x3ba   :  { %v2520_v62 = vadd.f32 %v6169_v11, %v8301_v10 }
 0x3bb   :  { %v6171_v3 = vpop.f32.mrf.mxu1 }
 0x3bc   :  { %2640 = vst [vmem:[#allocation4 + $0x10] sm:$0xff] %v2520_v62  ;;  %v6172_v13 = vadd.f32 %v6171_v3, %v6170_v43 }
 0x3bd   :  { %v6173_v15 = vpop.f32.mrf.mxu1 }
 0x3be   :  { %v2523_v16 = vadd.f32 %v6172_v13, %v8301_v10 }
 0x3bf   :  { %v6174_v17 = vpop.f32.mrf.mxu1 }
 0x3c0   :  { %2643 = vst [vmem:[#allocation4 + $0x28] sm:$0xff] %v2523_v16  ;;  %v6175_v18 = vadd.f32 %v6174_v17, %v6173_v15 }
 0x3c1   :  { %v6176_v19 = vpop.f32.mrf.mxu1 }
 0x3c2   :  { %v2528_v20 = vadd.f32 %v6175_v18, %v8301_v10 }
 0x3c3   :  { %v6177_v41 = vpop.f32.mrf.mxu1 }
 0x3c4   :  { %2646 = vst [vmem:[#allocation4 + $0x40] sm:$0xff] %v2528_v20  ;;  %v6178_v25 = vadd.f32 %v6177_v41, %v6176_v19 }
 0x3c5   :  { %v6179_v22 = vpop.f32.mrf.mxu1 }
 0x3c6   :  { %v2531_v23 = vadd.f32 %v6178_v25, %v8301_v10 }
 0x3c7   :  { %v6180_v24 = vpop.f32.mrf.mxu1 }
 0x3c8   :  { %2649 = vst [vmem:[#allocation4 + $0x58] sm:$0xff] %v2531_v23  ;;  %v6181_v14 = vadd.f32 %v6180_v24, %v6179_v22 }
 0x3c9   :  { %v6182_v27 = vpop.f32.mrf.mxu1 }
 0x3ca   :  { %v2536_v29 = vadd.f32 %v6181_v14, %v8301_v10 }
 0x3cb   :  { %v6183_v31 = vpop.f32.mrf.mxu1 }
 0x3cc   :  { %2652 = vst [vmem:[#allocation4 + $0x70] sm:$0xff] %v2536_v29  ;;  %v6184_v33 = vadd.f32 %v6183_v31, %v6182_v27 }
 0x3cd   :  { %v6185_v36 = vpop.f32.mrf.mxu1 }
 0x3ce   :  { %v2539_v37 = vadd.f32 %v6184_v33, %v8301_v10 }
 0x3cf   :  { %v6186_v39 = vpop.f32.mrf.mxu1 }
 0x3d0   :  { %2655 = vst [vmem:[#allocation4 + $0x88] sm:$0xff] %v2539_v37  ;;  %v6187_v47 = vadd.f32 %v6186_v39, %v6185_v36 }
 0x3d1   :  { %v6188_v49 = vpop.f32.mrf.mxu1 }
 0x3d2   :  { %v2544_v51 = vadd.f32 %v6187_v47, %v8301_v10 }
 0x3d3   :  { %v6189_v54 = vpop.f32.mrf.mxu1 }
 0x3d4   :  { %2658 = vst [vmem:[#allocation4 + $0xa0] sm:$0xff] %v2544_v51  ;;  %v6190_v56 = vadd.f32 %v6189_v54, %v6188_v49 }
 0x3d5   :  { %v6191_v58 = vpop.f32.mrf.mxu1 }
 0x3d6   :  { %v2547_v40 = vadd.f32 %v6190_v56, %v8301_v10 }
 0x3d7   :  { %v6192_v12 = vpop.f32.mrf.mxu1 }
 0x3d8   :  { %2661 = vst [vmem:[#allocation4 + $0xb8] sm:$0xff] %v2547_v40  ;;  %v6193_v61 = vadd.f32 %v6192_v12, %v6191_v58 }
 0x3d9   :  { %v6194_v0 = vpop.f32.mrf.mxu1 }
 0x3da   :  { %v2552_v2 = vadd.f32 %v6193_v61, %v8301_v10 }
 0x3db   :  { %v6195_v5 = vpop.f32.mrf.mxu1 }
 0x3dc   :  { %2664 = vst [vmem:[#allocation4 + $0xd0] sm:$0xff] %v2552_v2  ;;  %v6196_v6 = vadd.f32 %v6195_v5, %v6194_v0 }
 0x3dd   :  { %v6197_v8 = vpop.f32.mrf.mxu1 }
 0x3de   :  { %v2555_v46 = vadd.f32 %v6196_v6, %v8301_v10 }
 0x3df   :  { %v6198_v11 = vpop.f32.mrf.mxu1 }
 0x3e0   :  { %2667 = vst [vmem:[#allocation4 + $0xe8] sm:$0xff] %v2555_v46  ;;  %v6199_v62 = vadd.f32 %v6198_v11, %v6197_v8 }
 0x3e1   :  { %v6200_v13 = vpop.f32.mrf.mxu1 }
 0x3e2   :  { %v2560_v16 = vadd.f32 %v6199_v62, %v8301_v10 }
 0x3e3   :  { %v6201_v18 = vpop.f32.mrf.mxu1 }
 0x3e4   :  { %v2336_v30 = vpop.f32.mrf.mxu0  ;;  %2670 = vst [vmem:[#allocation4 + $0x100] sm:$0xff] %v2560_v16  ;;  %v6202_v20 = vadd.f32 %v6201_v18, %v6200_v13 }
 0x3e5   :  { %v2337_v32 = vadd.f32 %v2336_v30, %v8313_v26  ;;  %v6203_v25 = vpop.f32.mrf.mxu1 }
 0x3e6   :  { %v2338_v34 = vpop.f32.mrf.mxu0  ;;  %v2563_v23 = vadd.f32 %v6202_v20, %v8301_v10 }
 0x3e7   :  { %2638 = vst [vmem:[#allocation4] sm:$0xff] %v2337_v32  ;;  %v2339_v42 = vadd.f32 %v2338_v34, %v8316_v28  ;;  %v6204_v14 = vpop.f32.mrf.mxu1 }
 0x3e8   :  { %v2340_v38 = vpop.f32.mrf.mxu0  ;;  %2673 = vst [vmem:[#allocation4 + $0x118] sm:$0xff] %v2563_v23  ;;  %v6205_v29 = vadd.f32 %v6204_v14, %v6203_v25 }
 0x3e9   :  { %2639 = vst [vmem:[#allocation4 + $0x8] sm:$0xff] %v2339_v42  ;;  %v2341_v44 = vadd.f32 %v2340_v38, %v8313_v26  ;;  %v6206_v31 = vpop.f32.mrf.mxu1 }
 0x3ea   :  { %v2342_v48 = vpop.f32.mrf.mxu0  ;;  %v2568_v33 = vadd.f32 %v6205_v29, %v8301_v10 }
 0x3eb   :  { %2641 = vst [vmem:[#allocation4 + $0x18] sm:$0xff] %v2341_v44  ;;  %v2343_v50 = vadd.f32 %v2342_v48, %v8316_v28  ;;  %v6207_v36 = vpop.f32.mrf.mxu1 }
 0x3ec   :  { %v2346_v53 = vpop.f32.mrf.mxu0  ;;  %2676 = vst [vmem:[#allocation4 + $0x130] sm:$0xff] %v2568_v33  ;;  %v6208_v37 = vadd.f32 %v6207_v36, %v6206_v31 }
 0x3ed   :  { %2642 = vst [vmem:[#allocation4 + $0x20] sm:$0xff] %v2343_v50  ;;  %v2347_v55 = vadd.f32 %v2346_v53, %v8313_v26  ;;  %v6209_v39 = vpop.f32.mrf.mxu1 }
 0x3ee   :  { %v2348_v57 = vpop.f32.mrf.mxu0  ;;  %v2571_v47 = vadd.f32 %v6208_v37, %v8301_v10 }
 0x3ef   :  { %2644 = vst [vmem:[#allocation4 + $0x30] sm:$0xff] %v2347_v55  ;;  %v2349_v59 = vadd.f32 %v2348_v57, %v8316_v28  ;;  %v6210_v49 = vpop.f32.mrf.mxu1 }
 0x3f0   :  { %v2350_v52 = vpop.f32.mrf.mxu0  ;;  %2679 = vst [vmem:[#allocation4 + $0x148] sm:$0xff] %v2571_v47  ;;  %v6211_v51 = vadd.f32 %v6210_v49, %v6209_v39 }
 0x3f1   :  { %2645 = vst [vmem:[#allocation4 + $0x38] sm:$0xff] %v2349_v59  ;;  %v2351_v60 = vadd.f32 %v2350_v52, %v8313_v26  ;;  %v6212_v54 = vpop.f32.mrf.mxu1 }
 0x3f2   :  { %v2352_v63 = vpop.f32.mrf.mxu0  ;;  %v2576_v56 = vadd.f32 %v6211_v51, %v8301_v10 }
 0x3f3   :  { %2647 = vst [vmem:[#allocation4 + $0x48] sm:$0xff] %v2351_v60  ;;  %v2353_v1 = vadd.f32 %v2352_v63, %v8316_v28  ;;  %v6213_v58 = vpop.f32.mrf.mxu1 }
 0x3f4   :  { %v2356_v4 = vpop.f32.mrf.mxu0  ;;  %2682 = vst [vmem:[#allocation4 + $0x160] sm:$0xff] %v2576_v56  ;;  %v6214_v40 = vadd.f32 %v6213_v58, %v6212_v54 }
 0x3f5   :  { %2648 = vst [vmem:[#allocation4 + $0x50] sm:$0xff] %v2353_v1  ;;  %v2357_v45 = vadd.f32 %v2356_v4, %v8313_v26  ;;  %v6215_v12 = vpop.f32.mrf.mxu1 }
 0x3f6   :  { %v2358_v7 = vpop.f32.mrf.mxu0  ;;  %v2579_v61 = vadd.f32 %v6214_v40, %v8301_v10 }
 0x3f7   :  { %2650 = vst [vmem:[#allocation4 + $0x60] sm:$0xff] %v2357_v45  ;;  %v2359_v9 = vadd.f32 %v2358_v7, %v8316_v28  ;;  %v6216_v0 = vpop.f32.mrf.mxu1 }
 0x3f8   :  { %v2360_v35 = vpop.f32.mrf.mxu0  ;;  %2685 = vst [vmem:[#allocation4 + $0x178] sm:$0xff] %v2579_v61  ;;  %v6217_v2 = vadd.f32 %v6216_v0, %v6215_v12 }
 0x3f9   :  { %2651 = vst [vmem:[#allocation4 + $0x68] sm:$0xff] %v2359_v9  ;;  %v2361_v43 = vadd.f32 %v2360_v35, %v8313_v26  ;;  %v6218_v5 = vpop.f32.mrf.mxu1 }
 0x3fa   :  { %v2362_v3 = vpop.f32.mrf.mxu0  ;;  %v2584_v6 = vadd.f32 %v6217_v2, %v8301_v10 }
 0x3fb   :  { %2653 = vst [vmem:[#allocation4 + $0x78] sm:$0xff] %v2361_v43  ;;  %v2363_v15 = vadd.f32 %v2362_v3, %v8316_v28  ;;  %v6219_v8 = vpop.f32.mrf.mxu1 }
 0x3fc   :  { %v2366_v17 = vpop.f32.mrf.mxu0  ;;  %2688 = vst [vmem:[#allocation4 + $0x190] sm:$0xff] %v2584_v6  ;;  %v6220_v46 = vadd.f32 %v6219_v8, %v6218_v5 }
 0x3fd   :  { %2654 = vst [vmem:[#allocation4 + $0x80] sm:$0xff] %v2363_v15  ;;  %v2367_v19 = vadd.f32 %v2366_v17, %v8313_v26  ;;  %v6221_v11 = vpop.f32.mrf.mxu1 }
 0x3fe   :  { %v2368_v41 = vpop.f32.mrf.mxu0  ;;  %v2587_v62 = vadd.f32 %v6220_v46, %v8301_v10 }
 0x3ff   :  { %2656 = vst [vmem:[#allocation4 + $0x90] sm:$0xff] %v2367_v19  ;;  %v2369_v22 = vadd.f32 %v2368_v41, %v8316_v28  ;;  %v6222_v13 = vpop.f32.mrf.mxu1 }
 0x400   :  { %v2370_v24 = vpop.f32.mrf.mxu0  ;;  %2691 = vst [vmem:[#allocation4 + $0x1a8] sm:$0xff] %v2587_v62  ;;  %v6223_v16 = vadd.f32 %v6222_v13, %v6221_v11 }
 0x401   :  { %2657 = vst [vmem:[#allocation4 + $0x98] sm:$0xff] %v2369_v22  ;;  %v2371_v27 = vadd.f32 %v2370_v24, %v8313_v26  ;;  %v6224_v18 = vpop.f32.mrf.mxu1 }
 0x402   :  { %v2372_v30 = vpop.f32.mrf.mxu0  ;;  %v2592_v20 = vadd.f32 %v6223_v16, %v8301_v10 }
 0x403   :  { %2659 = vst [vmem:[#allocation4 + $0xa8] sm:$0xff] %v2371_v27  ;;  %v2373_v32 = vadd.f32 %v2372_v30, %v8316_v28  ;;  %v6225_v25 = vpop.f32.mrf.mxu1 }
 0x404   :  { %v2376_v34 = vpop.f32.mrf.mxu0  ;;  %2694 = vst [vmem:[#allocation4 + $0x1c0] sm:$0xff] %v2592_v20  ;;  %v6226_v23 = vadd.f32 %v6225_v25, %v6224_v18 }
 0x405   :  { %2660 = vst [vmem:[#allocation4 + $0xb0] sm:$0xff] %v2373_v32  ;;  %v2377_v42 = vadd.f32 %v2376_v34, %v8313_v26  ;;  %v6227_v14 = vpop.f32.mrf.mxu1 }
 0x406   :  { %v2378_v38 = vpop.f32.mrf.mxu0  ;;  %v2595_v29 = vadd.f32 %v6226_v23, %v8301_v10 }
 0x407   :  { %2662 = vst [vmem:[#allocation4 + $0xc0] sm:$0xff] %v2377_v42  ;;  %v2379_v44 = vadd.f32 %v2378_v38, %v8316_v28  ;;  %v6228_v31 = vpop.f32.mrf.mxu1 }
 0x408   :  { %v2380_v48 = vpop.f32.mrf.mxu0  ;;  %2697 = vst [vmem:[#allocation4 + $0x1d8] sm:$0xff] %v2595_v29  ;;  %v6229_v33 = vadd.f32 %v6228_v31, %v6227_v14 }
 0x409   :  { %2663 = vst [vmem:[#allocation4 + $0xc8] sm:$0xff] %v2379_v44  ;;  %v2381_v50 = vadd.f32 %v2380_v48, %v8313_v26  ;;  %v6230_v36 = vpop.f32.mrf.mxu1 }
 0x40a   :  { %v2382_v53 = vpop.f32.mrf.mxu0  ;;  %v2600_v37 = vadd.f32 %v6229_v33, %v8301_v10 }
 0x40b   :  { %2665 = vst [vmem:[#allocation4 + $0xd8] sm:$0xff] %v2381_v50  ;;  %v2383_v55 = vadd.f32 %v2382_v53, %v8316_v28  ;;  %v6231_v39 = vpop.f32.mrf.mxu1 }
 0x40c   :  { %v2386_v57 = vpop.f32.mrf.mxu0  ;;  %2700 = vst [vmem:[#allocation4 + $0x1f0] sm:$0xff] %v2600_v37  ;;  %v6232_v47 = vadd.f32 %v6231_v39, %v6230_v36 }
 0x40d   :  { %2666 = vst [vmem:[#allocation4 + $0xe0] sm:$0xff] %v2383_v55  ;;  %v2387_v59 = vadd.f32 %v2386_v57, %v8313_v26  ;;  %v6233_v49 = vpop.f32.mrf.mxu1 }
 0x40e   :  { %v2388_v52 = vpop.f32.mrf.mxu0  ;;  %v2603_v51 = vadd.f32 %v6232_v47, %v8301_v10 }
 0x40f   :  { %2668 = vst [vmem:[#allocation4 + $0xf0] sm:$0xff] %v2387_v59  ;;  %v2389_v60 = vadd.f32 %v2388_v52, %v8316_v28  ;;  %v6234_v54 = vpop.f32.mrf.mxu1 }
 0x410   :  { %v2390_v63 = vpop.f32.mrf.mxu0  ;;  %2703 = vst [vmem:[#allocation4 + $0x208] sm:$0xff] %v2603_v51  ;;  %v6235_v56 = vadd.f32 %v6234_v54, %v6233_v49 }
 0x411   :  { %2669 = vst [vmem:[#allocation4 + $0xf8] sm:$0xff] %v2389_v60  ;;  %v2391_v1 = vadd.f32 %v2390_v63, %v8313_v26  ;;  %v6236_v58 = vpop.f32.mrf.mxu1 }
 0x412   :  { %v2392_v4 = vpop.f32.mrf.mxu0  ;;  %v2608_v40 = vadd.f32 %v6235_v56, %v8301_v10 }
 0x413   :  { %2671 = vst [vmem:[#allocation4 + $0x108] sm:$0xff] %v2391_v1  ;;  %v2393_v45 = vadd.f32 %v2392_v4, %v8316_v28  ;;  %v6237_v12 = vpop.f32.mrf.mxu1 }
 0x414   :  { %v2396_v7 = vpop.f32.mrf.mxu0  ;;  %2706 = vst [vmem:[#allocation4 + $0x220] sm:$0xff] %v2608_v40  ;;  %v6238_v61 = vadd.f32 %v6237_v12, %v6236_v58 }
 0x415   :  { %2672 = vst [vmem:[#allocation4 + $0x110] sm:$0xff] %v2393_v45  ;;  %v2397_v9 = vadd.f32 %v2396_v7, %v8313_v26  ;;  %v6239_v0 = vpop.f32.mrf.mxu1 }
 0x416   :  { %v2398_v35 = vpop.f32.mrf.mxu0  ;;  %v2611_v2 = vadd.f32 %v6238_v61, %v8301_v10 }
 0x417   :  { %2674 = vst [vmem:[#allocation4 + $0x120] sm:$0xff] %v2397_v9  ;;  %v2399_v43 = vadd.f32 %v2398_v35, %v8316_v28  ;;  %v6240_v5 = vpop.f32.mrf.mxu1 }
 0x418   :  { %v2400_v3 = vpop.f32.mrf.mxu0  ;;  %2709 = vst [vmem:[#allocation4 + $0x238] sm:$0xff] %v2611_v2  ;;  %v6241_v6 = vadd.f32 %v6240_v5, %v6239_v0 }
 0x419   :  { %2675 = vst [vmem:[#allocation4 + $0x128] sm:$0xff] %v2399_v43  ;;  %v2401_v15 = vadd.f32 %v2400_v3, %v8313_v26  ;;  %v6242_v8 = vpop.f32.mrf.mxu1 }
 0x41a   :  { %v2402_v17 = vpop.f32.mrf.mxu0  ;;  %v2616_v46 = vadd.f32 %v6241_v6, %v8301_v10 }
 0x41b   :  { %2677 = vst [vmem:[#allocation4 + $0x138] sm:$0xff] %v2401_v15  ;;  %v2403_v19 = vadd.f32 %v2402_v17, %v8316_v28  ;;  %v6243_v11 = vpop.f32.mrf.mxu1 }
 0x41c   :  { %v2406_v41 = vpop.f32.mrf.mxu0  ;;  %2712 = vst [vmem:[#allocation4 + $0x250] sm:$0xff] %v2616_v46  ;;  %v6244_v62 = vadd.f32 %v6243_v11, %v6242_v8 }
 0x41d   :  { %2678 = vst [vmem:[#allocation4 + $0x140] sm:$0xff] %v2403_v19  ;;  %v2407_v22 = vadd.f32 %v2406_v41, %v8313_v26  ;;  %v6245_v13 = vpop.f32.mrf.mxu1 }
 0x41e   :  { %v2408_v24 = vpop.f32.mrf.mxu0  ;;  %v2619_v16 = vadd.f32 %v6244_v62, %v8301_v10 }
 0x41f   :  { %2680 = vst [vmem:[#allocation4 + $0x150] sm:$0xff] %v2407_v22  ;;  %v2409_v27 = vadd.f32 %v2408_v24, %v8316_v28  ;;  %v6246_v18 = vpop.f32.mrf.mxu1 }
 0x420   :  { %v2410_v30 = vpop.f32.mrf.mxu0  ;;  %2715 = vst [vmem:[#allocation4 + $0x268] sm:$0xff] %v2619_v16  ;;  %v6247_v20 = vadd.f32 %v6246_v18, %v6245_v13 }
 0x421   :  { %2681 = vst [vmem:[#allocation4 + $0x158] sm:$0xff] %v2409_v27  ;;  %v2411_v32 = vadd.f32 %v2410_v30, %v8313_v26  ;;  %v6248_v25 = vpop.f32.mrf.mxu1 }
 0x422   :  { %v2412_v34 = vpop.f32.mrf.mxu0  ;;  %v2624_v23 = vadd.f32 %v6247_v20, %v8301_v10 }
 0x423   :  { %2683 = vst [vmem:[#allocation4 + $0x168] sm:$0xff] %v2411_v32  ;;  %v2413_v42 = vadd.f32 %v2412_v34, %v8316_v28  ;;  %v6249_v14 = vpop.f32.mrf.mxu1 }
 0x424   :  { %v2416_v38 = vpop.f32.mrf.mxu0  ;;  %2718 = vst [vmem:[#allocation4 + $0x280] sm:$0xff] %v2624_v23  ;;  %v6250_v29 = vadd.f32 %v6249_v14, %v6248_v25 }
 0x425   :  { %2684 = vst [vmem:[#allocation4 + $0x170] sm:$0xff] %v2413_v42  ;;  %v2417_v44 = vadd.f32 %v2416_v38, %v8313_v26  ;;  %v6251_v31 = vpop.f32.mrf.mxu1 }
 0x426   :  { %v2418_v48 = vpop.f32.mrf.mxu0  ;;  %v2627_v33 = vadd.f32 %v6250_v29, %v8301_v10 }
 0x427   :  { %2686 = vst [vmem:[#allocation4 + $0x180] sm:$0xff] %v2417_v44  ;;  %v2419_v50 = vadd.f32 %v2418_v48, %v8316_v28  ;;  %v6252_v36 = vpop.f32.mrf.mxu1 }
 0x428   :  { %v2420_v53 = vpop.f32.mrf.mxu0  ;;  %2721 = vst [vmem:[#allocation4 + $0x298] sm:$0xff] %v2627_v33  ;;  %v6253_v37 = vadd.f32 %v6252_v36, %v6251_v31 }
 0x429   :  { %2687 = vst [vmem:[#allocation4 + $0x188] sm:$0xff] %v2419_v50  ;;  %v2421_v55 = vadd.f32 %v2420_v53, %v8313_v26  ;;  %v6254_v39 = vpop.f32.mrf.mxu1 }
 0x42a   :  { %v2422_v57 = vpop.f32.mrf.mxu0  ;;  %v2632_v47 = vadd.f32 %v6253_v37, %v8301_v10 }
 0x42b   :  { %2689 = vst [vmem:[#allocation4 + $0x198] sm:$0xff] %v2421_v55  ;;  %v2423_v59 = vadd.f32 %v2422_v57, %v8316_v28  ;;  %v6255_v49 = vpop.f32.mrf.mxu1 }
 0x42c   :  { %v2426_v52 = vpop.f32.mrf.mxu0  ;;  %2724 = vst [vmem:[#allocation4 + $0x2b0] sm:$0xff] %v2632_v47  ;;  %v6256_v51 = vadd.f32 %v6255_v49, %v6254_v39 }
 0x42d   :  { %2690 = vst [vmem:[#allocation4 + $0x1a0] sm:$0xff] %v2423_v59  ;;  %v2427_v60 = vadd.f32 %v2426_v52, %v8313_v26 }
 0x42e   :  { %v2428_v63 = vpop.f32.mrf.mxu0  ;;  %v2635_v55 = vadd.f32 %v6256_v51, %v8301_v10 }
 0x42f   :  { %2692 = vst [vmem:[#allocation4 + $0x1b0] sm:$0xff] %v2427_v60  ;;  %v2429_v1 = vadd.f32 %v2428_v63, %v8316_v28 }
 0x430   :  { %v2430_v4 = vpop.f32.mrf.mxu0  ;;  %2727 = vst [vmem:[#allocation4 + $0x2c8] sm:$0xff] %v2635_v55 }
 0x431   :  { %2693 = vst [vmem:[#allocation4 + $0x1b8] sm:$0xff] %v2429_v1  ;;  %v2431_v45 = vadd.f32 %v2430_v4, %v8313_v26 }
 0x432   :  { %v2432_v7 = vpop.f32.mrf.mxu0 }
 0x433   :  { %2695 = vst [vmem:[#allocation4 + $0x1c8] sm:$0xff] %v2431_v45  ;;  %v2433_v9 = vadd.f32 %v2432_v7, %v8316_v28 }
 0x434   :  { %v2436_v35 = vpop.f32.mrf.mxu0 }
 0x435   :  { %2696 = vst [vmem:[#allocation4 + $0x1d0] sm:$0xff] %v2433_v9  ;;  %v2437_v43 = vadd.f32 %v2436_v35, %v8313_v26  ;;  %v8404_v9 = vmov 0.0  }
 0x436   :  { %v2438_v3 = vpop.f32.mrf.mxu0 }
 0x437   :  { %2698 = vst [vmem:[#allocation4 + $0x1e0] sm:$0xff] %v2437_v43  ;;  %v2439_v15 = vadd.f32 %v2438_v3, %v8316_v28 }
 0x438   :  { %v2440_v17 = vpop.f32.mrf.mxu0 }
 0x439   :  { %2699 = vst [vmem:[#allocation4 + $0x1e8] sm:$0xff] %v2439_v15  ;;  %v2441_v19 = vadd.f32 %v2440_v17, %v8313_v26 }
 0x43a   :  { %v2442_v41 = vpop.f32.mrf.mxu0 }
 0x43b   :  { %2701 = vst [vmem:[#allocation4 + $0x1f8] sm:$0xff] %v2441_v19  ;;  %v2443_v22 = vadd.f32 %v2442_v41, %v8316_v28 }
 0x43c   :  { %v2446_v24 = vpop.f32.mrf.mxu0 }
 0x43d   :  { %2702 = vst [vmem:[#allocation4 + $0x200] sm:$0xff] %v2443_v22  ;;  %v2447_v27 = vadd.f32 %v2446_v24, %v8313_v26 }
 0x43e   :  { %v2448_v30 = vpop.f32.mrf.mxu0 }
 0x43f   :  { %2704 = vst [vmem:[#allocation4 + $0x210] sm:$0xff] %v2447_v27  ;;  %v2449_v32 = vadd.f32 %v2448_v30, %v8316_v28 }
 0x440   :  { %v2450_v34 = vpop.f32.mrf.mxu0 }
 0x441   :  { %2705 = vst [vmem:[#allocation4 + $0x218] sm:$0xff] %v2449_v32  ;;  %v2451_v42 = vadd.f32 %v2450_v34, %v8313_v26 }
 0x442   :  { %v2452_v38 = vpop.f32.mrf.mxu0 }
 0x443   :  { %2707 = vst [vmem:[#allocation4 + $0x228] sm:$0xff] %v2451_v42  ;;  %v2453_v44 = vadd.f32 %v2452_v38, %v8316_v28 }
 0x444   :  { %v2456_v48 = vpop.f32.mrf.mxu0 }
 0x445   :  { %2708 = vst [vmem:[#allocation4 + $0x230] sm:$0xff] %v2453_v44  ;;  %v2457_v50 = vadd.f32 %v2456_v48, %v8313_v26 }
 0x446   :  { %v2458_v53 = vpop.f32.mrf.mxu0 }
 0x447   :  { %2710 = vst [vmem:[#allocation4 + $0x240] sm:$0xff] %v2457_v50  ;;  %v2459_v54 = vadd.f32 %v2458_v53, %v8316_v28 }
 0x448   :  { %v2460_v56 = vpop.f32.mrf.mxu0 }
 0x449   :  { %2711 = vst [vmem:[#allocation4 + $0x248] sm:$0xff] %v2459_v54  ;;  %v2461_v57 = vadd.f32 %v2460_v56, %v8313_v26 }
 0x44a   :  { %v2462_v58 = vpop.f32.mrf.mxu0 }
 0x44b   :  { %2713 = vst [vmem:[#allocation4 + $0x258] sm:$0xff] %v2461_v57  ;;  %v2463_v59 = vadd.f32 %v2462_v58, %v8316_v28 }
 0x44c   :  { %v2466_v40 = vpop.f32.mrf.mxu0 }
 0x44d   :  { %2714 = vst [vmem:[#allocation4 + $0x260] sm:$0xff] %v2463_v59  ;;  %v2467_v52 = vadd.f32 %v2466_v40, %v8313_v26 }
 0x44e   :  { %v2468_v12 = vpop.f32.mrf.mxu0 }
 0x44f   :  { %2716 = vst [vmem:[#allocation4 + $0x270] sm:$0xff] %v2467_v52  ;;  %v2469_v60 = vadd.f32 %v2468_v12, %v8316_v28 }
 0x450   :  { %v2470_v61 = vpop.f32.mrf.mxu0 }
 0x451   :  { %2717 = vst [vmem:[#allocation4 + $0x278] sm:$0xff] %v2469_v60  ;;  %v2471_v10 = vadd.f32 %v2470_v61, %v8313_v26 }
 0x452   :  { %v2472_v63 = vpop.f32.mrf.mxu0 }
 0x453   :  { %2719 = vst [vmem:[#allocation4 + $0x288] sm:$0xff] %v2471_v10  ;;  %v2473_v0 = vadd.f32 %v2472_v63, %v8316_v28 }
 0x454   :  { %v2476_v1 = vpop.f32.mrf.mxu0 }
 0x455   :  { %2720 = vst [vmem:[#allocation4 + $0x290] sm:$0xff] %v2473_v0  ;;  %v2477_v2 = vadd.f32 %v2476_v1, %v8313_v26 }
 0x456   :  { %v2478_v4 = vpop.f32.mrf.mxu0 }
 0x457   :  { %2722 = vst [vmem:[#allocation4 + $0x2a0] sm:$0xff] %v2477_v2  ;;  %v2479_v5 = vadd.f32 %v2478_v4, %v8316_v28 }
 0x458   :  { %v2480_v45 = vpop.f32.mrf.mxu0 }
 0x459   :  { %2723 = vst [vmem:[#allocation4 + $0x2a8] sm:$0xff] %v2479_v5  ;;  %v2481_v6 = vadd.f32 %v2480_v45, %v8313_v26 }
 0x45a   :  { %v2482_v7 = vpop.f32.mrf.mxu0 }
 0x45b   :  { %2725 = vst [vmem:[#allocation4 + $0x2b8] sm:$0xff] %v2481_v6  ;;  %v2483_v8 = vadd.f32 %v2482_v7, %v8316_v28 }
 0x45d   :  { %2726 = vst [vmem:[#allocation4 + $0x2c0] sm:$0xff] %v2483_v8 }
 0x45e LB: > { %v6947_v26 = vld [vmem:[%s9226_s6 + $0xac] ss:$12 sps:$4 sm:$0xff]   ;;  %v6949_v28 = vld [vmem:[%s9226_s6 + $0xa8] ss:$12 sps:$4 sm:$0xff]   ;;  %v7270_v46 = vmov 0.0   ;;  %v7271_v35 = vmov 0   ;;  %v2745_v31 = vpack.c.bf16 %v7263_v9, %v7263_v9  ;;  %s7267_s8 = sphi %s8406_s8, %s2734_s8   ;;  %v7263_v9 = vphi %v8404_v9, %v3013_v9  }
 0x45f   : > { %6596 = vmatprep.subr.bf16.mxu1 %v7270_v46  ;;  %2938 = vmatprep.mubr.bf16.mxu0 %v7271_v35  ;;  %v6950_v11 = vld [vmem:[%s9226_s6 + $0x94] ss:$12 sps:$4 sm:$0xff]   ;;  %vm7272_vm1 = vmmov 0   ;;  %v6952_v43 = vld [vmem:[%s9226_s6 + $0x90] ss:$12 sps:$4 sm:$0xff]   ;;  %s5876_s5 = sshll.u32 %s7267_s8, 3 }
 0x460   : > { %2906 = vmatprep.subr.bf16.mxu0 %v6947_v26  ;;  %6612 = vmatprep.mubr.msk.bf16.mxu1 %vm7272_vm1, %v7270_v46  ;;  %v6953_v62 = vld [vmem:[%s9226_s6 + $0x7c] ss:$12 sps:$4 sm:$0xff]   ;;  %v6955_v3 = vld [vmem:[%s9226_s6 + $0x78] ss:$12 sps:$4 sm:$0xff]   ;;  %v6958_v16 = vld [vmem:[%s9226_s6 + $0x60] ss:$12 sps:$4 sm:$0xff]  }
 0x461   : > { %2907 = vmatpush1.bf16.msra.mxu0 %v6949_v28  ;;  %v6956_v13 = vld [vmem:[%s9226_s6 + $0x64] ss:$12 sps:$4 sm:$0xff]   ;;  %v6959_v17 = vld [vmem:[%s9226_s6 + $0x4c] ss:$12 sps:$4 sm:$0xff]   ;;  %v6961_v19 = vld [vmem:[%s9226_s6 + $0x48] ss:$12 sps:$4 sm:$0xff]  }
 0x462   : > { %2908 = vmatprep.subr.bf16.mxu0 %v6950_v11  ;;  %v6968_v15 = vld [vmem:[%s9226_s6 + $0xb0] ss:$12 sps:$4 sm:$0xff]   ;;  %v6972_v18 = vld [vmem:[%s9226_s6 + $0x98] ss:$12 sps:$4 sm:$0xff]   ;;  %v6962_v20 = vld [vmem:[%s9226_s6 + $0x34] ss:$12 sps:$4 sm:$0xff]  }
 0x463   : > { %6597 = vmatpush3.bf16.msra.mxu1 %v6968_v15  ;;  %v6973_v41 = vld [vmem:[%s9226_s6 + $0x80] ss:$12 sps:$4 sm:$0xff]   ;;  %v6964_v25 = vld [vmem:[%s9226_s6 + $0x30] ss:$12 sps:$4 sm:$0xff]   ;;  %v6974_v23 = vld [vmem:[%s9226_s6 + $0x68] ss:$12 sps:$4 sm:$0xff]  }
 0x464   : > { %6598 = vmatprep.subr.bf16.mxu1 %v7270_v46  ;;  %v6965_v22 = vld [vmem:[%s9226_s6 + $0x1c] ss:$12 sps:$4 sm:$0xff]   ;;  %v6967_v24 = vld [vmem:[%s9226_s6 + $0x18] ss:$12 sps:$4 sm:$0xff]   ;;  %v6971_v29 = vld [vmem:[%s9226_s6] ss:$12 sps:$4 sm:$0xff]  }
 0x465   : > { %2909 = vmatpush1.bf16.msra.mxu0 %v6952_v43  ;;  %v6969_v14 = vld [vmem:[%s9226_s6 + $0x4] ss:$12 sps:$4 sm:$0xff]   ;;  %v6977_v32 = vld [vmem:[%s9226_s6 + $0x20] ss:$12 sps:$4 sm:$0xff]   ;;  %v6978_v33 = vld [vmem:[%s9226_s6 + $0x8] ss:$12 sps:$4 sm:$0xff]  }
 0x466   : > { %2910 = vmatprep.subr.bf16.mxu0 %v6953_v62  ;;  %v6975_v27 = vld [vmem:[%s9226_s6 + $0x50] ss:$12 sps:$4 sm:$0xff]   ;;  %v6976_v30 = vld [vmem:[%s9226_s6 + $0x38] ss:$12 sps:$4 sm:$0xff]   ;;  %s2737_s1 = sshra.s32 %s5876_s5, 3  ;;  %s5905_s21 = sshll.u32 %s7267_s8, 7 }
 0x467   : > { %6599 = vmatpush3.bf16.msra.mxu1 %v6972_v18  ;;  %s6150_s7 = smul.u32 24, %s2737_s1  ;;  %s3015_s22 = sshra.s32 %s5905_s21, 7 }
 0x468   : > { %6600 = vmatprep.subr.bf16.mxu1 %v7270_v46  ;;  %s5906_s23 = sshll.u32 %s3015_s22, 3  ;;  %s2734_s8 = sadd.s32 1, %s7267_s8  }
 0x469   : > { %2911 = vmatpush1.bf16.msra.mxu0 %v6955_v3  ;;  %s2741_s20 = scalar_lea.vmem [#allocation4], %s6150_s7  ;;  %s3018_s24 = scalar_lea.vmem [#allocation5], %s5906_s23 }
 0x46a   : > { %2912 = vmatprep.subr.bf16.mxu0 %v6956_v13  ;;  %v2742_v34 = vld [vmem:[%s2741_s20] sm:$0xff]  ;;  %v2743_v47 = vld [vmem:[%s2741_s20 + $0x8] sm:$0xff]  ;;  %v2744_v40 = vld [vmem:[%s2741_s20 + $0x10] sm:$0xff]  ;;  %p2731_p1 = scmp.ge.s32.totalorder %s2734_s8, 30  }
 0x46b   : > { %6601 = vmatpush3.bf16.msra.mxu1 %v6973_v41  ;;  %v6989_v1 = vld [vmem:[%s9229_s9 + $0x78] sm:$0xff] (%p2731_p1)   ;;  %v6994_v45 = vld [vmem:[%s9229_s9 + $0x30] sm:$0xff] (%p2731_p1)   ;;  %v6997_v8 = vld [vmem:[%s9229_s9 + $0x68] sm:$0xff] (%p2731_p1)   ;;  %vm5607_vm2 = vcmask (%p2731_p1), 97280  }
 0x46c   : > { %6602 = vmatprep.subr.bf16.mxu1 %v7270_v46  ;;  %v6990_v2 = vld [vmem:[%s9229_s9 + $0x38] sm:$0xff] (%p2731_p1)   ;;  %v6995_v6 = vld [vmem:[%s9229_s9 + $0xf0] sm:$0xff] (%p2731_p1)   ;;  %v6999_v26 = vld [vmem:[%s9229_s9 + $0xe8] sm:$0xff] (%p2731_p1)  }
 0x46d   : > { %2913 = vmatpush1.bf16.msra.mxu0 %v6958_v16  ;;  %v6991_v4 = vld [vmem:[%s9229_s9 + $0xf8] sm:$0xff] (%p2731_p1)   ;;  %v6996_v7 = vld [vmem:[%s9229_s9 + $0xb0] sm:$0xff] (%p2731_p1)   ;;  %v7000_v28 = vld [vmem:[%s9229_s9 + $0xa8] sm:$0xff] (%p2731_p1)  }
 0x46e   : > { %2914 = vmatprep.subr.bf16.mxu0 %v6959_v17  ;;  %v6992_v5 = vld [vmem:[%s9229_s9 + $0xb8] sm:$0xff] (%p2731_p1)   ;;  %v7002_v35 = vld [vmem:[%s9229_s9 + $0x20] sm:$0xff] (%p2731_p1)   ;;  %v7009_v16 = vld [vmem:[%s9229_s9 + $0x50] sm:$0xff] (%p2731_p1)  }
 0x46f   : > { %6603 = vmatpush3.bf16.msra.mxu1 %v6974_v23  ;;  %v7003_v11 = vld [vmem:[%s9229_s9 + $0xe0] sm:$0xff] (%p2731_p1)   ;;  %v7005_v62 = vld [vmem:[%s9229_s9 + $0x58] sm:$0xff] (%p2731_p1)   ;;  %v7010_v17 = vld [vmem:[%s9229_s9 + $0x10] sm:$0xff] (%p2731_p1)  }
 0x470   : > { %6604 = vmatprep.subr.bf16.mxu1 %v7270_v46  ;;  %v7004_v43 = vld [vmem:[%s9229_s9 + $0xa0] sm:$0xff] (%p2731_p1)   ;;  %v7006_v3 = vld [vmem:[%s9229_s9 + $0x18] sm:$0xff] (%p2731_p1)   ;;  %v7011_v18 = vld [vmem:[%s9229_s9 + $0xd0] sm:$0xff] (%p2731_p1)  }
 0x471   : > { %2915 = vmatpush1.bf16.msra.mxu0 %v6961_v19  ;;  %v7007_v13 = vld [vmem:[%s9229_s9 + $0xd8] sm:$0xff] (%p2731_p1)   ;;  %v7012_v19 = vld [vmem:[%s9229_s9 + $0x90] sm:$0xff] (%p2731_p1)   ;;  %v7014_v41 = vld [vmem:[%s9229_s9 + $0x8] sm:$0xff] (%p2731_p1)  }
 0x472   : > { %2916 = vmatprep.subr.bf16.mxu0 %v6962_v20  ;;  %v7008_v15 = vld [vmem:[%s9229_s9 + $0x98] sm:$0xff] (%p2731_p1)   ;;  %v7013_v20 = vld [vmem:[%s9229_s9 + $0x48] sm:$0xff] (%p2731_p1)   ;;  %v7017_v23 = vld [vmem:[%s9229_s9 + $0x40] sm:$0xff] (%p2731_p1)  }
 0x473   : > { %6605 = vmatpush3.bf16.msra.mxu1 %v6975_v27 }
 0x474   : > { %6606 = vmatprep.subr.bf16.mxu1 %v7270_v46 }
 0x475   : > { %2917 = vmatpush1.bf16.msra.mxu0 %v6964_v25  ;;  %v7015_v25 = vld [vmem:[%s9229_s9 + $0xc8] sm:$0xff] (%p2731_p1)  }
 0x476   : > { %2918 = vmatprep.subr.bf16.mxu0 %v6965_v22  ;;  %v7016_v22 = vld [vmem:[%s9229_s9 + $0x88] sm:$0xff] (%p2731_p1)  }
 0x477   : > { %6607 = vmatpush3.bf16.msra.mxu1 %v6976_v30  ;;  %v7020_v30 = vld [vmem:[%s9229_s9 + $0x80] sm:$0xff] (%p2731_p1)  }
 0x478   : > { %6608 = vmatprep.subr.bf16.mxu1 %v7270_v46 }
 0x479   : > { %2919 = vmatpush1.bf16.msra.mxu0 %v6967_v24  ;;  %v7018_v24 = vld [vmem:[%s9229_s9] sm:$0xff] (%p2731_p1)  }
 0x47a   : > { %2920 = vmatprep.subr.bf16.mxu0 %v6969_v14  ;;  %v7019_v14 = vld [vmem:[%s9229_s9 + $0xc0] sm:$0xff] (%p2731_p1)  }
 0x47b   : > { %6609 = vmatpush3.bf16.msra.mxu1 %v6977_v32 }
 0x47c   : > { %6610 = vmatprep.subr.bf16.mxu1 %v7270_v46  ;;  %v7001_v46 = vld [vmem:[%s9229_s9 + $0x60] sm:$0xff] (%p2731_p1)  }
 0x47d   : > { %2921 = vmatpush1.bf16.msra.mxu0 %v6971_v29 }
 0x47e   :  { %6266 = vmatprep.subr.bf16.mxu0 (%p2731_p1), %v6989_v1  ;;  %v7045_v1 = vld [vmem:[%s9229_s9 + $0x148] sm:$0xff] (%p2731_p1)  }
 0x47f   : > { %6611 = vmatpush3.bf16.msra.mxu1 %v6978_v33  ;;  %v7021_v33 = vld [vmem:[%s9229_s9 + $0x178] sm:$0xff] (%p2731_p1)  }
 0x480   : > { %2939 = vmatmul.mubr.bf16.vlgmr.msra.gmra.mxu0 %v2745_v31  ;;  %6288 = vmatprep.subr.bf16.mxu1 (%p2731_p1), %v6991_v4  ;;  %v7047_v4 = vld [vmem:[%s9229_s9 + $0x1c8] sm:$0xff] (%p2731_p1)  }
 0x481   :  { %6267 = vmatpush3.bf16.msra.mxu0 (%p2731_p1), %v6990_v2  ;;  %v7046_v2 = vld [vmem:[%s9229_s9 + $0x108] sm:$0xff] (%p2731_p1)  }
 0x482   : > { %6613 = vmatmul.mubr.bf16.vlgmr.msra.gmra.mxu1 %v2745_v31 }
 0x483   :  { %6289 = vmatpush3.bf16.msra.mxu1 (%p2731_p1), %v6992_v5  ;;  %v7048_v5 = vld [vmem:[%s9229_s9 + $0x188] sm:$0xff] (%p2731_p1)  }
 0x484   :  { %6290 = vmatprep.subr.bf16.mxu1 (%p2731_p1), %v6995_v6  ;;  %v7051_v6 = vld [vmem:[%s9229_s9 + $0x1c0] sm:$0xff] (%p2731_p1)  }
 0x487   :  { %6291 = vmatpush3.bf16.msra.mxu1 (%p2731_p1), %v6996_v7 }
 0x488   :  { %6292 = vmatprep.subr.bf16.mxu1 (%p2731_p1), %v6999_v26 }
 0x48b   :  { %6293 = vmatpush3.bf16.msra.mxu1 (%p2731_p1), %v7000_v28 }
 0x48c   :  { %6294 = vmatprep.subr.bf16.mxu1 (%p2731_p1), %v7003_v11 }
 0x48f   :  { %6295 = vmatpush3.bf16.msra.mxu1 (%p2731_p1), %v7004_v43  ;;  %v7054_v43 = vld [vmem:[%s9229_s9 + $0x238] sm:$0xff] (%p2731_p1)  }
 0x490   :  { %6296 = vmatprep.subr.bf16.mxu1 (%p2731_p1), %v7007_v13  ;;  %v7055_v13 = vld [vmem:[%s9229_s9 + $0x2f8] sm:$0xff] (%p2731_p1)  }
 0x493   :  { %6297 = vmatpush3.bf16.msra.mxu1 (%p2731_p1), %v7008_v15  ;;  %v7056_v15 = vld [vmem:[%s9229_s9 + $0x2b8] sm:$0xff] (%p2731_p1)  }
 0x494   :  { %6298 = vmatprep.subr.bf16.mxu1 (%p2731_p1), %v7011_v18  ;;  %v7059_v18 = vld [vmem:[%s9229_s9 + $0x2f0] sm:$0xff] (%p2731_p1)  }
 0x497   :  { %6299 = vmatpush3.bf16.msra.mxu1 (%p2731_p1), %v7012_v19  ;;  %v7060_v19 = vld [vmem:[%s9229_s9 + $0x2b0] sm:$0xff] (%p2731_p1)  }
 0x498   :  { %6300 = vmatprep.subr.bf16.mxu1 (%p2731_p1), %v7015_v25  ;;  %v7063_v25 = vld [vmem:[%s9229_s9 + $0x2e8] sm:$0xff] (%p2731_p1)  }
 0x49b   :  { %6301 = vmatpush3.bf16.msra.mxu1 (%p2731_p1), %v7016_v22  ;;  %v7064_v22 = vld [vmem:[%s9229_s9 + $0x2a8] sm:$0xff] (%p2731_p1)  }
 0x49c   :  { %6302 = vmatprep.subr.bf16.mxu1 (%p2731_p1), %v7019_v14  ;;  %v7067_v14 = vld [vmem:[%s9229_s9 + $0x2e0] sm:$0xff] (%p2731_p1)  }
 0x49f   :  { %6303 = vmatpush3.bf16.msra.mxu1 (%p2731_p1), %v7020_v30  ;;  %v7070_v30 = vld [vmem:[%s9229_s9 + $0x218] sm:$0xff] (%p2731_p1)  }
 0x540   : > { %v2940_v36 = vpop.f32.mrf.mxu0 }
 0x541   : > { %v2987_v42 = vadd.f32 %v2940_v36, %v2742_v34 }
 0x542   : > { %v2942_v37 = vpop.f32.mrf.mxu0  ;;  %v2981_v48 = vpop.f32.mrf.mxu1 }
 0x543   : > { %v5902_v38 = vmul.f32 -1.442695, %v2987_v42  ;;  %v2994_v50 = vadd.f32 %v2942_v37, %v2743_v47  ;;  %v3007_v57 = vadd.f32 %v8309_v21, %v2981_v48  ;;  %v6993_v21 = vld [vmem:[%s9229_s9 + $0x70] sm:$0xff] (%p2731_p1)   ;;  %v7022_v42 = vld [vmem:[%s9229_s9 + $0x138] sm:$0xff] (%p2731_p1)  }
 0x544   : > { %v2944_v39 = vpop.f32.mrf.mxu0  ;;  %v6614_v49 = vpop.f32.mrf.mxu1  ;;  %6268 = vmatprep.subr.bf16.mxu0 (%p2731_p1), %v6993_v21  ;;  %v7025_v47 = vld [vmem:[%s9229_s9 + $0x170] sm:$0xff] (%p2731_p1)   ;;  %v7049_v21 = vld [vmem:[%s9229_s9 + $0x140] sm:$0xff] (%p2731_p1)  }
 0x545   : > { %6979 = vpow2.f32 %v5902_v38  ;;  %v5903_v54 = vmul.f32 -1.442695, %v2994_v50  ;;  %6269 = vmatpush3.bf16.msra.mxu0 (%p2731_p1), %v6994_v45  ;;  %v7023_v39 = vld [vmem:[%s9229_s9 + $0x1f8] sm:$0xff] (%p2731_p1)   ;;  %v7026_v48 = vld [vmem:[%s9229_s9 + $0x130] sm:$0xff] (%p2731_p1)   ;;  %v7050_v45 = vld [vmem:[%s9229_s9 + $0x100] sm:$0xff] (%p2731_p1)  }
 0x546   : > { %v2945_v44 = vpop.f32.mrf.mxu0  ;;  %v2984_v51 = vpop.f32.mrf.mxu1  ;;  %6270 = vmatprep.subr.bf16.mxu0 (%p2731_p1), %v6997_v8  ;;  %6332 = vmatprep.subr.bf16.mxu1 (%p2731_p1), %v7023_v39  ;;  %v7027_v49 = vld [vmem:[%s9229_s9 + $0x1f0] sm:$0xff] (%p2731_p1)   ;;  %v7079_v39 = vld [vmem:[%s9229_s9 + $0x2c8] sm:$0xff] (%p2731_p1)  }
 0x547   : > { %6981 = vpow2.f32 %v5903_v54  ;;  %v7024_v44 = vld [vmem:[%s9229_s9 + $0x1b8] sm:$0xff] (%p2731_p1)   ;;  %v7028_v50 = vld [vmem:[%s9229_s9 + $0x1b0] sm:$0xff] (%p2731_p1)   ;;  %v7029_v51 = vld [vmem:[%s9229_s9 + $0x168] sm:$0xff] (%p2731_p1)  }
 0x548   : > { %v6615_v53 = vpop.f32.mrf.mxu1  ;;  %v7031_v54 = vld [vmem:[%s9229_s9 + $0x1e8] sm:$0xff] (%p2731_p1)  }
 0x549   :  { %v7030_v53 = vld [vmem:[%s9229_s9 + $0x128] sm:$0xff] (%p2731_p1)  }
 0x552   : > { %v6980_v55 = vpop.eup %6979 }
 0x553   : > { %v2991_v56 = vadd.f32 1.0, %v6980_v55  ;;  %v7032_v55 = vld [vmem:[%s9229_s9 + $0x1a8] sm:$0xff] (%p2731_p1)  }
 0x554   : > { %v6982_v58 = vpop.eup %6981 }
 0x555   : > { %6983 = vrcp.f32 %v2991_v56  ;;  %v2998_v12 = vadd.f32 1.0, %v6982_v58  ;;  %v7033_v56 = vld [vmem:[%s9229_s9 + $0x160] sm:$0xff] (%p2731_p1)  }
 0x556   :  { %v7035_v58 = vld [vmem:[%s9229_s9 + $0x1e0] sm:$0xff] (%p2731_p1)  }
 0x562   : > { %v6984_v59 = vpop.eup %6983 }
 0x563   : > { %v3008_v52 = vmul.f32 %v6984_v59, %v3007_v57  ;;  %v7034_v57 = vld [vmem:[%s9229_s9 + $0x120] sm:$0xff] (%p2731_p1)  }
 0x564   :  { %v7036_v59 = vld [vmem:[%s9229_s9 + $0x1a0] sm:$0xff] (%p2731_p1)  }
 0x565   : > { %v3009_v60 = vadd.f32 %v3008_v52, %v2744_v40  ;;  %v7037_v40 = vld [vmem:[%s9229_s9 + $0x158] sm:$0xff] (%p2731_p1)  }
 0x566   :  { %v7038_v52 = vld [vmem:[%s9229_s9 + $0x118] sm:$0xff] (%p2731_p1)  }
 0x567   : > { %6985 = vtanh.f32 %v3009_v60  ;;  %v7040_v60 = vld [vmem:[%s9229_s9 + $0x198] sm:$0xff] (%p2731_p1)  }
 0x568   : > { %6987 = vrcp.f32 %v2998_v12  ;;  %v7039_v12 = vld [vmem:[%s9229_s9 + $0x1d8] sm:$0xff] (%p2731_p1)  }
 0x574   : > { %v6986_v61 = vpop.eup %6985 }
 0x575   : > { %v3011_v10 = vsub.f32 %v7263_v9, %v6986_v61  ;;  %v6988_v63 = vpop.eup %6987 }
 0x577   : > { %v3012_v0 = vmul.f32 %v6988_v63, %v3011_v10  ;;  %2733 = sbr.rel (!%p2731_p1) target bundleno = 1118 (0x45e), region = 93  ;;  %v7042_v10 = vld [vmem:[%s9229_s9 + $0x110] sm:$0xff] (%p2731_p1)  }
 0x578   :  { %v7043_v63 = vld [vmem:[%s9229_s9 + $0x1d0] sm:$0xff] (%p2731_p1)  }
 0x579   : > { %v3013_v9 = vadd.f32 %v6986_v61, %v3012_v0   ;;  %v7041_v61 = vld [vmem:[%s9229_s9 + $0x150] sm:$0xff] (%p2731_p1)  }
 0x57a   :  { %v7044_v0 = vld [vmem:[%s9229_s9 + $0x190] sm:$0xff] (%p2731_p1)  }
 0x57b   : > { %3019 = vst [vmem:[%s3018_s24] sm:$0xff] %v3013_v9  ;;  %v6998_v9 = vld [vmem:[%s9229_s9 + $0x28] sm:$0xff] (%p2731_p1)  }
 0x57c   :  { %6271 = vmatpush3.bf16.msra.mxu0 %v6998_v9  ;;  %v7052_v9 = vld [vmem:[%s9229_s9 + $0x180] sm:$0xff]  }
 0x57d   :  { %6272 = vmatprep.subr.bf16.mxu0 %v7001_v46  ;;  %v7053_v46 = vld [vmem:[%s9229_s9 + $0x278] sm:$0xff]  }
 0x580   :  { %6273 = vmatpush3.bf16.msra.mxu0 %v7002_v35 }
 0x581   :  { %6274 = vmatprep.subr.bf16.mxu0 %v7005_v62 }
 0x582   :  { %v3021_v27 = vld [vmem:[#allocation5 + $0x8] sm:$0xff]  ;;  %v3020_v31 = vld [vmem:[#allocation5] sm:$0xff]  ;;  %v3023_v34 = vld [vmem:[#allocation5 + $0x18] sm:$0xff] }
 0x583   :  { %v3051_v29 = vpack.c.bf16 %v3021_v27, %v3021_v27  ;;  %v3050_v32 = vpack.c.bf16 %v3020_v31, %v3020_v31  ;;  %v3053_v36 = vpack.c.bf16 %v3023_v34, %v3023_v34  ;;  %v3022_v37 = vld [vmem:[#allocation5 + $0x10] sm:$0xff]  ;;  %v3025_v7 = vld [vmem:[#allocation5 + $0x28] sm:$0xff]  ;;  %v3024_v26 = vld [vmem:[#allocation5 + $0x20] sm:$0xff] }
 0x584   :  { %6275 = vmatpush3.bf16.msra.mxu0 %v7006_v3  ;;  %v3052_v38 = vpack.c.bf16 %v3022_v37, %v3022_v37  ;;  %v3055_v8 = vpack.c.bf16 %v3025_v7, %v3025_v7  ;;  %v3054_v28 = vpack.c.bf16 %v3024_v26, %v3024_v26  ;;  %v3027_v35 = vld [vmem:[#allocation5 + $0x38] sm:$0xff]  ;;  %v3026_v62 = vld [vmem:[#allocation5 + $0x30] sm:$0xff]  ;;  %v7071_v31 = vld [vmem:[%s9229_s9 + $0x2d8] sm:$0xff]  }
 0x585   :  { %6276 = vmatprep.subr.bf16.mxu0 %v7009_v16  ;;  %5039 = vmatprep.mubr.bf16.mxu0 %v3051_v29  ;;  %v3057_v11 = vpack.c.bf16 %v3027_v35, %v3027_v35  ;;  %v3056_v3 = vpack.c.bf16 %v3026_v62, %v3026_v62  ;;  %v7057_v16 = vld [vmem:[%s9229_s9 + $0x270] sm:$0xff]   ;;  %v7068_v27 = vld [vmem:[%s9229_s9 + $0x2a0] sm:$0xff]   ;;  %v7069_v29 = vld [vmem:[%s9229_s9 + $0x258] sm:$0xff]  }
 0x586   :  { %5079 = vmatprep.mubr.bf16.mxu1 %v3053_v36  ;;  %v7074_v34 = vld [vmem:[%s9229_s9 + $0x210] sm:$0xff]   ;;  %v7077_v37 = vld [vmem:[%s9229_s9 + $0x248] sm:$0xff]   ;;  %v7100_v7 = vld [vmem:[%s9229_s9 + $0x3a0] sm:$0xff]  }
 0x587   :  { %5080 = vmatmul.mubr.bf16.vlgmr.msra.gmra.mxu1 %v3052_v38  ;;  %v7075_v36 = vld [vmem:[%s9229_s9 + $0x2d0] sm:$0xff]   ;;  %v7078_v38 = vld [vmem:[%s9229_s9 + $0x208] sm:$0xff]   ;;  %v7103_v26 = vld [vmem:[%s9229_s9 + $0x3d8] sm:$0xff]  }
 0x588   :  { %6277 = vmatpush3.bf16.msra.mxu0 %v7010_v17  ;;  %6333 = vmatpush3.bf16.msra.mxu1 %v7024_v44  ;;  %v7058_v17 = vld [vmem:[%s9229_s9 + $0x230] sm:$0xff]   ;;  %v7080_v44 = vld [vmem:[%s9229_s9 + $0x288] sm:$0xff]  }
 0x589   :  { %6278 = vmatprep.subr.bf16.mxu0 %v7013_v20  ;;  %6334 = vmatprep.subr.bf16.mxu1 %v7027_v49  ;;  %v7061_v20 = vld [vmem:[%s9229_s9 + $0x268] sm:$0xff]   ;;  %v7083_v49 = vld [vmem:[%s9229_s9 + $0x2c0] sm:$0xff]   ;;  %v7106_v35 = vld [vmem:[%s9229_s9 + $0x310] sm:$0xff]  }
 0x58a   :  { %5159 = vmatprep.mubr.bf16.mxu1 %v3057_v11  ;;  %v7107_v11 = vld [vmem:[%s9229_s9 + $0x3d0] sm:$0xff]   ;;  %v7109_v62 = vld [vmem:[%s9229_s9 + $0x348] sm:$0xff]  }
 0x58c   :  { %6279 = vmatpush3.bf16.msra.mxu0 %v7014_v41  ;;  %6335 = vmatpush3.bf16.msra.mxu1 %v7028_v50  ;;  %v7062_v41 = vld [vmem:[%s9229_s9 + $0x228] sm:$0xff]   ;;  %v3029_v50 = vld [vmem:[#allocation5 + $0x48] sm:$0xff] }
 0x58d   :  { %6280 = vmatprep.subr.bf16.mxu0 %v7017_v23  ;;  %6336 = vmatprep.subr.bf16.mxu1 %v7031_v54  ;;  %v7065_v23 = vld [vmem:[%s9229_s9 + $0x260] sm:$0xff]   ;;  %v3028_v54 = vld [vmem:[#allocation5 + $0x40] sm:$0xff] }
 0x590   :  { %6281 = vmatpush3.bf16.msra.mxu0 %v7018_v24  ;;  %6337 = vmatpush3.bf16.msra.mxu1 %v7032_v55  ;;  %v7066_v24 = vld [vmem:[%s9229_s9 + $0x220] sm:$0xff]   ;;  %v3058_v55 = vpack.c.bf16 %v3028_v54, %v3028_v54  ;;  %v7135_v54 = vld [vmem:[%s9229_s9 + $0x4d8] sm:$0xff]  }
 0x591   :  { %6310 = vmatprep.subr.bf16.mxu0 %v7021_v33  ;;  %6338 = vmatprep.subr.bf16.mxu1 %v7035_v58  ;;  %v7073_v33 = vld [vmem:[%s9229_s9 + $0x250] sm:$0xff]  }
 0x593   :  { %5040 = vmatmul.mubr.bf16.vlgmr.msra.gmra.mxu0 %v3050_v32  ;;  %v7072_v32 = vld [vmem:[%s9229_s9 + $0x298] sm:$0xff]  }
 0x594   :  { %6311 = vmatpush3.bf16.msra.mxu0 %v7022_v42  ;;  %6339 = vmatpush3.bf16.msra.mxu1 %v7036_v59  ;;  %v7076_v42 = vld [vmem:[%s9229_s9 + $0x290] sm:$0xff]   ;;  %v7086_v59 = vld [vmem:[%s9229_s9 + $0x338] sm:$0xff]  }
 0x595   :  { %6312 = vmatprep.subr.bf16.mxu0 %v7025_v47  ;;  %6340 = vmatprep.subr.bf16.mxu1 %v7039_v12  ;;  %v7081_v47 = vld [vmem:[%s9229_s9 + $0x240] sm:$0xff]   ;;  %v7087_v12 = vld [vmem:[%s9229_s9 + $0x3f8] sm:$0xff]  }
 0x596   :  { %5119 = vmatprep.mubr.bf16.mxu0 %v3055_v8  ;;  %v7101_v8 = vld [vmem:[%s9229_s9 + $0x358] sm:$0xff]  }
 0x598   :  { %6313 = vmatpush3.bf16.msra.mxu0 %v7026_v48  ;;  %6341 = vmatpush3.bf16.msra.mxu1 %v7040_v60  ;;  %v7082_v48 = vld [vmem:[%s9229_s9 + $0x200] sm:$0xff]   ;;  %v7088_v60 = vld [vmem:[%s9229_s9 + $0x3b8] sm:$0xff]  }
 0x599   :  { %6314 = vmatprep.subr.bf16.mxu0 %v7029_v51  ;;  %6342 = vmatprep.subr.bf16.mxu1 %v7043_v63  ;;  %v3059_v51 = vpack.c.bf16 %v3029_v50, %v3029_v50  ;;  %v7091_v63 = vld [vmem:[%s9229_s9 + $0x3f0] sm:$0xff]   ;;  %v7132_v50 = vld [vmem:[%s9229_s9 + $0x4a0] sm:$0xff]  }
 0x59c   :  { %6315 = vmatpush3.bf16.msra.mxu0 %v7030_v53  ;;  %6343 = vmatpush3.bf16.msra.mxu1 %v7044_v0  ;;  %v7084_v53 = vld [vmem:[%s9229_s9 + $0x280] sm:$0xff]   ;;  %v7092_v0 = vld [vmem:[%s9229_s9 + $0x3b0] sm:$0xff]  }
 0x59d   :  { %6316 = vmatprep.subr.bf16.mxu0 %v7033_v56  ;;  %6344 = vmatprep.subr.bf16.mxu1 %v7047_v4  ;;  %v7085_v56 = vld [vmem:[%s9229_s9 + $0x378] sm:$0xff]   ;;  %v7095_v4 = vld [vmem:[%s9229_s9 + $0x3e8] sm:$0xff]  }
 0x5a0   :  { %6317 = vmatpush3.bf16.msra.mxu0 %v7034_v57  ;;  %6345 = vmatpush3.bf16.msra.mxu1 %v7048_v5  ;;  %v3031_v57 = vld [vmem:[#allocation5 + $0x58] sm:$0xff] }
 0x5a1   :  { %6318 = vmatprep.subr.bf16.mxu0 %v7037_v40  ;;  %6346 = vmatprep.subr.bf16.mxu1 %v7051_v6  ;;  %v3061_v58 = vpack.c.bf16 %v3031_v57, %v3031_v57  ;;  %v3030_v40 = vld [vmem:[#allocation5 + $0x50] sm:$0xff]  ;;  %v7096_v5 = vld [vmem:[%s9229_s9 + $0x3a8] sm:$0xff]   ;;  %v7138_v57 = vld [vmem:[%s9229_s9 + $0x410] sm:$0xff]  }
 0x5a2   :  { %v7099_v6 = vld [vmem:[%s9229_s9 + $0x3e0] sm:$0xff]  }
 0x5a4   :  { %6319 = vmatpush3.bf16.msra.mxu0 %v7038_v52  ;;  %6347 = vmatpush3.bf16.msra.mxu1 %v7052_v9  ;;  %v3060_v52 = vpack.c.bf16 %v3030_v40, %v3030_v40  ;;  %v7102_v9 = vld [vmem:[%s9229_s9 + $0x318] sm:$0xff]   ;;  %v7141_v40 = vld [vmem:[%s9229_s9 + $0x448] sm:$0xff]  }
 0x5a5   :  { %6320 = vmatprep.subr.bf16.mxu0 %v7041_v61  ;;  %6376 = vmatprep.subr.bf16.mxu1 %v7055_v13  ;;  %v7089_v61 = vld [vmem:[%s9229_s9 + $0x370] sm:$0xff]   ;;  %v7111_v13 = vld [vmem:[%s9229_s9 + $0x3c8] sm:$0xff]  }
 0x5a7   :  { %5160 = vmatmul.mubr.bf16.vlgmr.msra.gmra.mxu1 %v3056_v3  ;;  %v7110_v3 = vld [vmem:[%s9229_s9 + $0x308] sm:$0xff]  }
 0x5a8   :  { %6321 = vmatpush3.bf16.msra.mxu0 %v7042_v10  ;;  %6377 = vmatpush3.bf16.msra.mxu1 %v7056_v15  ;;  %v7090_v10 = vld [vmem:[%s9229_s9 + $0x330] sm:$0xff]   ;;  %v7112_v15 = vld [vmem:[%s9229_s9 + $0x388] sm:$0xff]  }
 0x5a9   :  { %6322 = vmatprep.subr.bf16.mxu0 %v7045_v1  ;;  %6378 = vmatprep.subr.bf16.mxu1 %v7059_v18  ;;  %v7093_v1 = vld [vmem:[%s9229_s9 + $0x368] sm:$0xff]   ;;  %v7115_v18 = vld [vmem:[%s9229_s9 + $0x3c0] sm:$0xff]  }
 0x5aa   :  { %5239 = vmatprep.mubr.bf16.mxu1 %v3061_v58  ;;  %v7139_v58 = vld [vmem:[%s9229_s9 + $0x4d0] sm:$0xff]  }
 0x5ac   :  { %6323 = vmatpush3.bf16.msra.mxu0 %v7046_v2  ;;  %6379 = vmatpush3.bf16.msra.mxu1 %v7060_v19  ;;  %v7094_v2 = vld [vmem:[%s9229_s9 + $0x328] sm:$0xff]   ;;  %v3033_v19 = vld [vmem:[#allocation5 + $0x68] sm:$0xff] }
 0x5ad   :  { %6324 = vmatprep.subr.bf16.mxu0 %v7049_v21  ;;  %6380 = vmatprep.subr.bf16.mxu1 %v7063_v25  ;;  %v7097_v21 = vld [vmem:[%s9229_s9 + $0x360] sm:$0xff]   ;;  %v3032_v25 = vld [vmem:[#allocation5 + $0x60] sm:$0xff] }
 0x5b0   :  { %6325 = vmatpush3.bf16.msra.mxu0 %v7050_v45  ;;  %6381 = vmatpush3.bf16.msra.mxu1 %v7064_v22  ;;  %v7098_v45 = vld [vmem:[%s9229_s9 + $0x320] sm:$0xff]   ;;  %v3062_v22 = vpack.c.bf16 %v3032_v25, %v3032_v25  ;;  %v7167_v25 = vld [vmem:[%s9229_s9 + $0x5d8] sm:$0xff]  }
 0x5b1   :  { %6354 = vmatprep.subr.bf16.mxu0 %v7053_v46  ;;  %6382 = vmatprep.subr.bf16.mxu1 %v7067_v14  ;;  %v7105_v46 = vld [vmem:[%s9229_s9 + $0x350] sm:$0xff]  }
 0x5b3   :  { %5120 = vmatmul.mubr.bf16.vlgmr.msra.gmra.mxu0 %v3054_v28  ;;  %v7104_v28 = vld [vmem:[%s9229_s9 + $0x398] sm:$0xff]  }
 0x5b4   :  { %6355 = vmatpush3.bf16.msra.mxu0 %v7054_v43  ;;  %6383 = vmatpush3.bf16.msra.mxu1 %v7068_v27  ;;  %v7108_v43 = vld [vmem:[%s9229_s9 + $0x390] sm:$0xff]   ;;  %v7118_v27 = vld [vmem:[%s9229_s9 + $0x438] sm:$0xff]  }
 0x5b5   :  { %6356 = vmatprep.subr.bf16.mxu0 %v7057_v16  ;;  %6384 = vmatprep.subr.bf16.mxu1 %v7071_v31  ;;  %v7113_v16 = vld [vmem:[%s9229_s9 + $0x340] sm:$0xff]   ;;  %v7119_v31 = vld [vmem:[%s9229_s9 + $0x4f8] sm:$0xff]  }
 0x5b6   :  { %5199 = vmatprep.mubr.bf16.mxu0 %v3059_v51  ;;  %v7133_v51 = vld [vmem:[%s9229_s9 + $0x458] sm:$0xff]  }
 0x5b8   :  { %6357 = vmatpush3.bf16.msra.mxu0 %v7058_v17  ;;  %6385 = vmatpush3.bf16.msra.mxu1 %v7072_v32  ;;  %v7114_v17 = vld [vmem:[%s9229_s9 + $0x300] sm:$0xff]   ;;  %v7120_v32 = vld [vmem:[%s9229_s9 + $0x4b8] sm:$0xff]  }
 0x5b9   :  { %6358 = vmatprep.subr.bf16.mxu0 %v7061_v20  ;;  %6386 = vmatprep.subr.bf16.mxu1 %v7075_v36  ;;  %v3063_v20 = vpack.c.bf16 %v3033_v19, %v3033_v19  ;;  %v7123_v36 = vld [vmem:[%s9229_s9 + $0x4f0] sm:$0xff]   ;;  %v7164_v19 = vld [vmem:[%s9229_s9 + $0x5a0] sm:$0xff]  }
 0x5bc   :  { %6359 = vmatpush3.bf16.msra.mxu0 %v7062_v41  ;;  %6387 = vmatpush3.bf16.msra.mxu1 %v7076_v42  ;;  %v7116_v41 = vld [vmem:[%s9229_s9 + $0x380] sm:$0xff]   ;;  %v7124_v42 = vld [vmem:[%s9229_s9 + $0x4b0] sm:$0xff]  }
 0x5bd   :  { %6360 = vmatprep.subr.bf16.mxu0 %v7065_v23  ;;  %6388 = vmatprep.subr.bf16.mxu1 %v7079_v39  ;;  %v7117_v23 = vld [vmem:[%s9229_s9 + $0x478] sm:$0xff]   ;;  %v7127_v39 = vld [vmem:[%s9229_s9 + $0x4e8] sm:$0xff]  }
 0x5c0   :  { %6361 = vmatpush3.bf16.msra.mxu0 %v7066_v24  ;;  %6389 = vmatpush3.bf16.msra.mxu1 %v7080_v44  ;;  %v3035_v24 = vld [vmem:[#allocation5 + $0x78] sm:$0xff] }
 0x5c1   :  { %6362 = vmatprep.subr.bf16.mxu0 %v7069_v29  ;;  %6390 = vmatprep.subr.bf16.mxu1 %v7083_v49  ;;  %v3065_v14 = vpack.c.bf16 %v3035_v24, %v3035_v24  ;;  %v3034_v29 = vld [vmem:[#allocation5 + $0x70] sm:$0xff]  ;;  %v7128_v44 = vld [vmem:[%s9229_s9 + $0x4a8] sm:$0xff]   ;;  %v7170_v24 = vld [vmem:[%s9229_s9 + $0x510] sm:$0xff]  }
 0x5c2   :  { %v7131_v49 = vld [vmem:[%s9229_s9 + $0x4e0] sm:$0xff]  }
 0x5c4   :  { %6363 = vmatpush3.bf16.msra.mxu0 %v7070_v30  ;;  %6391 = vmatpush3.bf16.msra.mxu1 %v7084_v53  ;;  %v3064_v30 = vpack.c.bf16 %v3034_v29, %v3034_v29  ;;  %v7134_v53 = vld [vmem:[%s9229_s9 + $0x418] sm:$0xff]   ;;  %v7173_v29 = vld [vmem:[%s9229_s9 + $0x548] sm:$0xff]  }
 0x5c5   :  { %6364 = vmatprep.subr.bf16.mxu0 %v7073_v33  ;;  %6420 = vmatprep.subr.bf16.mxu1 %v7087_v12  ;;  %v7121_v33 = vld [vmem:[%s9229_s9 + $0x470] sm:$0xff]   ;;  %v7143_v12 = vld [vmem:[%s9229_s9 + $0x4c8] sm:$0xff]  }
 0x5c7   :  { %5240 = vmatmul.mubr.bf16.vlgmr.msra.gmra.mxu1 %v3060_v52  ;;  %v7142_v52 = vld [vmem:[%s9229_s9 + $0x408] sm:$0xff]  }
 0x5c8   :  { %6365 = vmatpush3.bf16.msra.mxu0 %v7074_v34  ;;  %6421 = vmatpush3.bf16.msra.mxu1 %v7088_v60  ;;  %v7122_v34 = vld [vmem:[%s9229_s9 + $0x430] sm:$0xff]   ;;  %v7144_v60 = vld [vmem:[%s9229_s9 + $0x488] sm:$0xff]  }
 0x5c9   :  { %6366 = vmatprep.subr.bf16.mxu0 %v7077_v37  ;;  %6422 = vmatprep.subr.bf16.mxu1 %v7091_v63  ;;  %v7125_v37 = vld [vmem:[%s9229_s9 + $0x468] sm:$0xff]   ;;  %v7147_v63 = vld [vmem:[%s9229_s9 + $0x4c0] sm:$0xff]  }
 0x5ca   :  { %5319 = vmatprep.mubr.bf16.mxu1 %v3065_v14  ;;  %v7171_v14 = vld [vmem:[%s9229_s9 + $0x5d0] sm:$0xff]  }
 0x5cc   :  { %6367 = vmatpush3.bf16.msra.mxu0 %v7078_v38  ;;  %6423 = vmatpush3.bf16.msra.mxu1 %v7092_v0  ;;  %v7126_v38 = vld [vmem:[%s9229_s9 + $0x428] sm:$0xff]   ;;  %v3037_v0 = vld [vmem:[#allocation5 + $0x88] sm:$0xff] }
 0x5cd   :  { %6368 = vmatprep.subr.bf16.mxu0 %v7081_v47  ;;  %6424 = vmatprep.subr.bf16.mxu1 %v7095_v4  ;;  %v7129_v47 = vld [vmem:[%s9229_s9 + $0x460] sm:$0xff]   ;;  %v3036_v4 = vld [vmem:[#allocation5 + $0x80] sm:$0xff] }
 0x5d0   :  { %6369 = vmatpush3.bf16.msra.mxu0 %v7082_v48  ;;  %6425 = vmatpush3.bf16.msra.mxu1 %v7096_v5  ;;  %v7130_v48 = vld [vmem:[%s9229_s9 + $0x420] sm:$0xff]   ;;  %v3066_v5 = vpack.c.bf16 %v3036_v4, %v3036_v4  ;;  %v7199_v4 = vld [vmem:[%s9229_s9 + $0x6d8] sm:$0xff]  }
 0x5d1   :  { %6398 = vmatprep.subr.bf16.mxu0 %v7085_v56  ;;  %6426 = vmatprep.subr.bf16.mxu1 %v7099_v6  ;;  %v7137_v56 = vld [vmem:[%s9229_s9 + $0x450] sm:$0xff]  }
 0x5d3   :  { %5200 = vmatmul.mubr.bf16.vlgmr.msra.gmra.mxu0 %v3058_v55  ;;  %v7136_v55 = vld [vmem:[%s9229_s9 + $0x498] sm:$0xff]  }
 0x5d4   :  { %6399 = vmatpush3.bf16.msra.mxu0 %v7086_v59  ;;  %6427 = vmatpush3.bf16.msra.mxu1 %v7100_v7  ;;  %v7140_v59 = vld [vmem:[%s9229_s9 + $0x490] sm:$0xff]   ;;  %v7150_v7 = vld [vmem:[%s9229_s9 + $0x538] sm:$0xff]  }
 0x5d5   :  { %6400 = vmatprep.subr.bf16.mxu0 %v7089_v61  ;;  %6428 = vmatprep.subr.bf16.mxu1 %v7103_v26  ;;  %v7145_v61 = vld [vmem:[%s9229_s9 + $0x440] sm:$0xff]   ;;  %v7151_v26 = vld [vmem:[%s9229_s9 + $0x5f8] sm:$0xff]  }
 0x5d6   :  { %5279 = vmatprep.mubr.bf16.mxu0 %v3063_v20  ;;  %v7165_v20 = vld [vmem:[%s9229_s9 + $0x558] sm:$0xff]  }
 0x5d8   :  { %6401 = vmatpush3.bf16.msra.mxu0 %v7090_v10  ;;  %6429 = vmatpush3.bf16.msra.mxu1 %v7104_v28  ;;  %v7146_v10 = vld [vmem:[%s9229_s9 + $0x400] sm:$0xff]   ;;  %v7152_v28 = vld [vmem:[%s9229_s9 + $0x5b8] sm:$0xff]  }
 0x5d9   :  { %6402 = vmatprep.subr.bf16.mxu0 %v7093_v1  ;;  %6430 = vmatprep.subr.bf16.mxu1 %v7107_v11  ;;  %v3067_v1 = vpack.c.bf16 %v3037_v0, %v3037_v0  ;;  %v7155_v11 = vld [vmem:[%s9229_s9 + $0x5f0] sm:$0xff]   ;;  %v7196_v0 = vld [vmem:[%s9229_s9 + $0x6a0] sm:$0xff]  }
 0x5dc   :  { %6403 = vmatpush3.bf16.msra.mxu0 %v7094_v2  ;;  %6431 = vmatpush3.bf16.msra.mxu1 %v7108_v43  ;;  %v7148_v2 = vld [vmem:[%s9229_s9 + $0x480] sm:$0xff]   ;;  %v7156_v43 = vld [vmem:[%s9229_s9 + $0x5b0] sm:$0xff]  }
 0x5dd   :  { %6404 = vmatprep.subr.bf16.mxu0 %v7097_v21  ;;  %6432 = vmatprep.subr.bf16.mxu1 %v7111_v13  ;;  %v7149_v21 = vld [vmem:[%s9229_s9 + $0x578] sm:$0xff]   ;;  %v7159_v13 = vld [vmem:[%s9229_s9 + $0x5e8] sm:$0xff]  }
 0x5e0   :  { %6405 = vmatpush3.bf16.msra.mxu0 %v7098_v45  ;;  %6433 = vmatpush3.bf16.msra.mxu1 %v7112_v15  ;;  %v3039_v45 = vld [vmem:[#allocation5 + $0x98] sm:$0xff] }
 0x5e1   :  { %6406 = vmatprep.subr.bf16.mxu0 %v7101_v8  ;;  %6434 = vmatprep.subr.bf16.mxu1 %v7115_v18  ;;  %v3069_v6 = vpack.c.bf16 %v3039_v45, %v3039_v45  ;;  %v3038_v8 = vld [vmem:[#allocation5 + $0x90] sm:$0xff]  ;;  %v7160_v15 = vld [vmem:[%s9229_s9 + $0x5a8] sm:$0xff]   ;;  %v7202_v45 = vld [vmem:[%s9229_s9 + $0x610] sm:$0xff]  }
 0x5e2   :  { %v7163_v18 = vld [vmem:[%s9229_s9 + $0x5e0] sm:$0xff]  }
 0x5e4   :  { %6407 = vmatpush3.bf16.msra.mxu0 %v7102_v9  ;;  %6435 = vmatpush3.bf16.msra.mxu1 %v7116_v41  ;;  %v3068_v9 = vpack.c.bf16 %v3038_v8, %v3038_v8  ;;  %v7166_v41 = vld [vmem:[%s9229_s9 + $0x518] sm:$0xff]   ;;  %v7205_v8 = vld [vmem:[%s9229_s9 + $0x648] sm:$0xff]  }
 0x5e5   :  { %6408 = vmatprep.subr.bf16.mxu0 %v7105_v46  ;;  %6464 = vmatprep.subr.bf16.mxu1 %v7119_v31  ;;  %v7153_v46 = vld [vmem:[%s9229_s9 + $0x570] sm:$0xff]   ;;  %v7175_v31 = vld [vmem:[%s9229_s9 + $0x5c8] sm:$0xff]  }
 0x5e7   :  { %5320 = vmatmul.mubr.bf16.vlgmr.msra.gmra.mxu1 %v3064_v30  ;;  %v7174_v30 = vld [vmem:[%s9229_s9 + $0x508] sm:$0xff]  }
 0x5e8   :  { %6409 = vmatpush3.bf16.msra.mxu0 %v7106_v35  ;;  %6465 = vmatpush3.bf16.msra.mxu1 %v7120_v32  ;;  %v7154_v35 = vld [vmem:[%s9229_s9 + $0x530] sm:$0xff]   ;;  %v7176_v32 = vld [vmem:[%s9229_s9 + $0x588] sm:$0xff]  }
 0x5e9   :  { %6410 = vmatprep.subr.bf16.mxu0 %v7109_v62  ;;  %6466 = vmatprep.subr.bf16.mxu1 %v7123_v36  ;;  %v7157_v62 = vld [vmem:[%s9229_s9 + $0x568] sm:$0xff]   ;;  %v7179_v36 = vld [vmem:[%s9229_s9 + $0x5c0] sm:$0xff]  }
 0x5ea   :  { %5399 = vmatprep.mubr.bf16.mxu1 %v3069_v6  ;;  %v7203_v6 = vld [vmem:[%s9229_s9 + $0x6d0] sm:$0xff]  }
 0x5ec   :  { %6411 = vmatpush3.bf16.msra.mxu0 %v7110_v3  ;;  %6467 = vmatpush3.bf16.msra.mxu1 %v7124_v42  ;;  %v7158_v3 = vld [vmem:[%s9229_s9 + $0x528] sm:$0xff]   ;;  %v3041_v42 = vld [vmem:[#allocation5 + $0xa8] sm:$0xff] }
 0x5ed   :  { %6412 = vmatprep.subr.bf16.mxu0 %v7113_v16  ;;  %6468 = vmatprep.subr.bf16.mxu1 %v7127_v39  ;;  %v7161_v16 = vld [vmem:[%s9229_s9 + $0x560] sm:$0xff]   ;;  %v3040_v39 = vld [vmem:[#allocation5 + $0xa0] sm:$0xff] }
 0x5f0   :  { %6413 = vmatpush3.bf16.msra.mxu0 %v7114_v17  ;;  %6469 = vmatpush3.bf16.msra.mxu1 %v7128_v44  ;;  %v7162_v17 = vld [vmem:[%s9229_s9 + $0x520] sm:$0xff]   ;;  %v3070_v44 = vpack.c.bf16 %v3040_v39, %v3040_v39  ;;  %v7218_v39 = vld [vmem:[%s9229_s9 + $0x728] sm:$0xff]  }
 0x5f1   :  { %6442 = vmatprep.subr.bf16.mxu0 %v7117_v23  ;;  %6470 = vmatprep.subr.bf16.mxu1 %v7131_v49  ;;  %v7169_v23 = vld [vmem:[%s9229_s9 + $0x550] sm:$0xff]  }
 0x5f3   :  { %5280 = vmatmul.mubr.bf16.vlgmr.msra.gmra.mxu0 %v3062_v22  ;;  %v7168_v22 = vld [vmem:[%s9229_s9 + $0x598] sm:$0xff]  }
 0x5f4   :  { %6443 = vmatpush3.bf16.msra.mxu0 %v7118_v27  ;;  %6471 = vmatpush3.bf16.msra.mxu1 %v7132_v50  ;;  %v7172_v27 = vld [vmem:[%s9229_s9 + $0x590] sm:$0xff]   ;;  %v7182_v50 = vld [vmem:[%s9229_s9 + $0x638] sm:$0xff]  }
 0x5f5   :  { %6444 = vmatprep.subr.bf16.mxu0 %v7121_v33  ;;  %6472 = vmatprep.subr.bf16.mxu1 %v7135_v54  ;;  %v7177_v33 = vld [vmem:[%s9229_s9 + $0x540] sm:$0xff]   ;;  %v7183_v54 = vld [vmem:[%s9229_s9 + $0x6f8] sm:$0xff]  }
 0x5f6   :  { %5359 = vmatprep.mubr.bf16.mxu0 %v3067_v1  ;;  %v7197_v1 = vld [vmem:[%s9229_s9 + $0x658] sm:$0xff]  }
 0x5f8   :  { %6445 = vmatpush3.bf16.msra.mxu0 %v7122_v34  ;;  %6473 = vmatpush3.bf16.msra.mxu1 %v7136_v55  ;;  %v7178_v34 = vld [vmem:[%s9229_s9 + $0x500] sm:$0xff]   ;;  %v7184_v55 = vld [vmem:[%s9229_s9 + $0x6b8] sm:$0xff]  }
 0x5f9   :  { %6446 = vmatprep.subr.bf16.mxu0 %v7125_v37  ;;  %6474 = vmatprep.subr.bf16.mxu1 %v7139_v58  ;;  %v3071_v37 = vpack.c.bf16 %v3041_v42, %v3041_v42  ;;  %v7187_v58 = vld [vmem:[%s9229_s9 + $0x6f0] sm:$0xff]  }
 0x5fa   :  { %v7216_v42 = vld [vmem:[%s9229_s9 + $0x730] sm:$0xff]  }
 0x5fc   :  { %6447 = vmatpush3.bf16.msra.mxu0 %v7126_v38  ;;  %6475 = vmatpush3.bf16.msra.mxu1 %v7140_v59  ;;  %v7180_v38 = vld [vmem:[%s9229_s9 + $0x580] sm:$0xff]   ;;  %v7188_v59 = vld [vmem:[%s9229_s9 + $0x6b0] sm:$0xff]  }
 0x5fd   :  { %6448 = vmatprep.subr.bf16.mxu0 %v7129_v47  ;;  %6476 = vmatprep.subr.bf16.mxu1 %v7143_v12  ;;  %v7181_v47 = vld [vmem:[%s9229_s9 + $0x678] sm:$0xff]   ;;  %v7191_v12 = vld [vmem:[%s9229_s9 + $0x6e8] sm:$0xff]  }
 0x600   :  { %6449 = vmatpush3.bf16.msra.mxu0 %v7130_v48  ;;  %6477 = vmatpush3.bf16.msra.mxu1 %v7144_v60  ;;  %v3043_v48 = vld [vmem:[#allocation5 + $0xb8] sm:$0xff] }
 0x601   :  { %6450 = vmatprep.subr.bf16.mxu0 %v7133_v51  ;;  %6478 = vmatprep.subr.bf16.mxu1 %v7147_v63  ;;  %v3073_v49 = vpack.c.bf16 %v3043_v48, %v3043_v48  ;;  %v3042_v51 = vld [vmem:[#allocation5 + $0xb0] sm:$0xff]  ;;  %v7192_v60 = vld [vmem:[%s9229_s9 + $0x6a8] sm:$0xff]   ;;  %v7221_v48 = vld [vmem:[%s9229_s9 + $0x758] sm:$0xff]  }
 0x602   :  { %v7195_v63 = vld [vmem:[%s9229_s9 + $0x6e0] sm:$0xff]  }
 0x604   :  { %6451 = vmatpush3.bf16.msra.mxu0 %v7134_v53  ;;  %6479 = vmatpush3.bf16.msra.mxu1 %v7148_v2  ;;  %v3072_v53 = vpack.c.bf16 %v3042_v51, %v3042_v51  ;;  %v7198_v2 = vld [vmem:[%s9229_s9 + $0x618] sm:$0xff]  }
 0x605   :  { %6452 = vmatprep.subr.bf16.mxu0 %v7137_v56  ;;  %6508 = vmatprep.subr.bf16.mxu1 %v7151_v26  ;;  %v7185_v56 = vld [vmem:[%s9229_s9 + $0x670] sm:$0xff]   ;;  %v7207_v26 = vld [vmem:[%s9229_s9 + $0x6c8] sm:$0xff]   ;;  %v3049_v51 = vld [vmem:[#allocation5 + $0xe8] sm:$0xff] }
 0x607   :  { %5400 = vmatmul.mubr.bf16.vlgmr.msra.gmra.mxu1 %v3068_v9  ;;  %v7206_v9 = vld [vmem:[%s9229_s9 + $0x608] sm:$0xff]  }
 0x608   :  { %6453 = vmatpush3.bf16.msra.mxu0 %v7138_v57  ;;  %6509 = vmatpush3.bf16.msra.mxu1 %v7152_v28  ;;  %v7186_v57 = vld [vmem:[%s9229_s9 + $0x630] sm:$0xff]   ;;  %v7208_v28 = vld [vmem:[%s9229_s9 + $0x688] sm:$0xff]  }
 0x609   :  { %6454 = vmatprep.subr.bf16.mxu0 %v7141_v40  ;;  %6510 = vmatprep.subr.bf16.mxu1 %v7155_v11  ;;  %v7189_v40 = vld [vmem:[%s9229_s9 + $0x668] sm:$0xff]   ;;  %v7210_v11 = vld [vmem:[%s9229_s9 + $0x600] sm:$0xff]  }
 0x60a   :  { %5479 = vmatprep.mubr.bf16.mxu1 %v3073_v49  ;;  %v7222_v49 = vld [vmem:[%s9229_s9 + $0x718] sm:$0xff]  }
 0x60c   :  { %6455 = vmatpush3.bf16.msra.mxu0 %v7142_v52  ;;  %6511 = vmatpush3.bf16.msra.mxu1 %v7156_v43  ;;  %v7190_v52 = vld [vmem:[%s9229_s9 + $0x628] sm:$0xff]  }
 0x60d   :  { %6456 = vmatprep.subr.bf16.mxu0 %v7145_v61  ;;  %6512 = vmatprep.subr.bf16.mxu1 %v7159_v13  ;;  %v7193_v61 = vld [vmem:[%s9229_s9 + $0x660] sm:$0xff]  }
 0x610   :  { %6457 = vmatpush3.bf16.msra.mxu0 %v7146_v10  ;;  %6513 = vmatpush3.bf16.msra.mxu1 %v7160_v15  ;;  %v7194_v10 = vld [vmem:[%s9229_s9 + $0x620] sm:$0xff]   ;;  %v3045_v15 = vld [vmem:[#allocation5 + $0xc8] sm:$0xff] }
 0x611   :  { %6486 = vmatprep.subr.bf16.mxu0 %v7149_v21  ;;  %6514 = vmatprep.subr.bf16.mxu1 %v7163_v18  ;;  %v7201_v21 = vld [vmem:[%s9229_s9 + $0x650] sm:$0xff]   ;;  %v7212_v18 = vld [vmem:[%s9229_s9 + $0x680] sm:$0xff]  }
 0x613   :  { %5360 = vmatmul.mubr.bf16.vlgmr.msra.gmra.mxu0 %v3066_v5  ;;  %v7200_v5 = vld [vmem:[%s9229_s9 + $0x698] sm:$0xff]  }
 0x614   :  { %6487 = vmatpush3.bf16.msra.mxu0 %v7150_v7  ;;  %6515 = vmatpush3.bf16.msra.mxu1 %v7164_v19  ;;  %v7204_v7 = vld [vmem:[%s9229_s9 + $0x690] sm:$0xff]  }
 0x615   :  { %6488 = vmatprep.subr.bf16.mxu0 %v7153_v46  ;;  %6516 = vmatprep.subr.bf16.mxu1 %v7167_v25  ;;  %v3044_v19 = vld [vmem:[#allocation5 + $0xc0] sm:$0xff]  ;;  %v7213_v25 = vld [vmem:[%s9229_s9 + $0x778] sm:$0xff]  }
 0x616   :  { %5439 = vmatprep.mubr.bf16.mxu0 %v3071_v37 }
 0x618   :  { %6489 = vmatpush3.bf16.msra.mxu0 %v7154_v35  ;;  %6517 = vmatpush3.bf16.msra.mxu1 %v7168_v22  ;;  %v7209_v35 = vld [vmem:[%s9229_s9 + $0x640] sm:$0xff]   ;;  %v3047_v22 = vld [vmem:[#allocation5 + $0xd8] sm:$0xff] }
 0x619   :  { %6490 = vmatprep.subr.bf16.mxu0 %v7157_v62  ;;  %6518 = vmatprep.subr.bf16.mxu1 %v7171_v14  ;;  %v7211_v62 = vld [vmem:[%s9229_s9 + $0x6c0] sm:$0xff]   ;;  %v3077_v14 = vpack.c.bf16 %v3047_v22, %v3047_v22 }
 0x61c   :  { %6491 = vmatpush3.bf16.msra.mxu0 %v7158_v3  ;;  %6519 = vmatpush3.bf16.msra.mxu1 %v7172_v27  ;;  %v7214_v27 = vld [vmem:[%s9229_s9 + $0x738] sm:$0xff]  }
 0x61d   :  { %6492 = vmatprep.subr.bf16.mxu0 %v7161_v16  ;;  %6520 = vmatprep.subr.bf16.mxu1 %v7175_v31  ;;  %v3046_v31 = vld [vmem:[#allocation5 + $0xd0] sm:$0xff] }
 0x620   :  { %6493 = vmatpush3.bf16.msra.mxu0 %v7162_v17  ;;  %6521 = vmatpush3.bf16.msra.mxu1 %v7176_v32  ;;  %v3075_v17 = vpack.c.bf16 %v3045_v15, %v3045_v15 }
 0x621   :  { %6494 = vmatprep.subr.bf16.mxu0 %v7165_v20  ;;  %6522 = vmatprep.subr.bf16.mxu1 %v7179_v36 }
 0x624   :  { %6495 = vmatpush3.bf16.msra.mxu0 %v7166_v41  ;;  %6523 = vmatpush3.bf16.msra.mxu1 %v7180_v38  ;;  %v3074_v41 = vpack.c.bf16 %v3044_v19, %v3044_v19  ;;  %v7217_v38 = vld [vmem:[%s9229_s9 + $0x768] sm:$0xff]  }
 0x625   :  { %6496 = vmatprep.subr.bf16.mxu0 %v7169_v23  ;;  %6552 = vmatprep.subr.bf16.mxu1 %v7183_v54  ;;  %v7224_v54 = vld [vmem:[%s9229_s9 + $0x710] sm:$0xff]  }
 0x627   :  { %5480 = vmatmul.mubr.bf16.vlgmr.msra.gmra.mxu1 %v3072_v53  ;;  %v3079_v53 = vpack.c.bf16 %v3049_v51, %v3049_v51 }
 0x628   :  { %6497 = vmatpush3.bf16.msra.mxu0 %v7170_v24  ;;  %6553 = vmatpush3.bf16.msra.mxu1 %v7184_v55  ;;  %v7225_v55 = vld [vmem:[%s9229_s9 + $0x748] sm:$0xff]  }
 0x629   :  { %6498 = vmatprep.subr.bf16.mxu0 %v7173_v29  ;;  %6554 = vmatprep.subr.bf16.mxu1 %v7187_v58  ;;  %v7228_v58 = vld [vmem:[%s9229_s9 + $0x700] sm:$0xff]  }
 0x62a   :  { %5559 = vmatprep.mubr.bf16.mxu1 %v3077_v14 }
 0x62c   :  { %6499 = vmatpush3.bf16.msra.mxu0 %v7174_v30  ;;  %6555 = vmatpush3.bf16.msra.mxu1 %v7188_v59  ;;  %v5907_v30 = vld [vmem:[%s9230_s10] ss:$0 sm:$0xff] }
 0x62d   :  { %6500 = vmatprep.subr.bf16.mxu0 %v7177_v33  ;;  %6556 = vmatprep.subr.bf16.mxu1 %v7191_v12  ;;  %v3076_v33 = vpack.c.bf16 %v3046_v31, %v3046_v31 }
 0x630   :  { %6501 = vmatpush3.bf16.msra.mxu0 %v7178_v34  ;;  %6557 = vmatpush3.bf16.msra.mxu1 %v7192_v60  ;;  %v7215_v34 = vld [vmem:[%s9229_s9 + $0x770] sm:$0xff]  }
 0x631   :  { %6530 = vmatprep.subr.bf16.mxu0 %v7181_v47  ;;  %6558 = vmatprep.subr.bf16.mxu1 %v7195_v63  ;;  %v7220_v47 = vld [vmem:[%s9229_s9 + $0x720] sm:$0xff]  }
 0x633   :  { %5440 = vmatmul.mubr.bf16.vlgmr.msra.gmra.mxu0 %v3070_v44  ;;  %v7219_v44 = vld [vmem:[%s9229_s9 + $0x760] sm:$0xff]  }
 0x634   :  { %6531 = vmatpush3.bf16.msra.mxu0 %v7182_v50  ;;  %6559 = vmatpush3.bf16.msra.mxu1 %v7196_v0  ;;  %v7223_v50 = vld [vmem:[%s9229_s9 + $0x750] sm:$0xff]  }
 0x635   :  { %6532 = vmatprep.subr.bf16.mxu0 %v7185_v56  ;;  %6560 = vmatprep.subr.bf16.mxu1 %v7199_v4  ;;  %v7226_v56 = vld [vmem:[%s9229_s9 + $0x708] sm:$0xff]  }
 0x636   :  { %5519 = vmatprep.mubr.bf16.mxu0 %v3075_v17 }
 0x638   :  { %6533 = vmatpush3.bf16.msra.mxu0 %v7186_v57  ;;  %6561 = vmatpush3.bf16.msra.mxu1 %v7200_v5  ;;  %v7227_v57 = vld [vmem:[%s9229_s9 + $0x740] sm:$0xff]  }
 0x639   :  { %6534 = vmatprep.subr.bf16.mxu0 %v7189_v40  ;;  %6562 = vmatprep.subr.bf16.mxu1 %v7203_v6  ;;  %v3048_v40 = vld [vmem:[#allocation5 + $0xe0] sm:$0xff] }
 0x63a   :  { %v3078_v12 = vpack.c.bf16 %v3048_v40, %v3048_v40 }
 0x63c   :  { %6535 = vmatpush3.bf16.msra.mxu0 %v7190_v52  ;;  %6563 = vmatpush3.bf16.msra.mxu1 %v7204_v7 }
 0x63d   :  { %6536 = vmatprep.subr.bf16.mxu0 %v7193_v61  ;;  %6564 = vmatprep.subr.bf16.mxu1 %v7207_v26 }
 0x640   :  { %6537 = vmatpush3.bf16.msra.mxu0 %v7194_v10  ;;  %6565 = vmatpush3.bf16.msra.mxu1 %v7208_v28 }
 0x641   :  { %6538 = vmatprep.subr.bf16.mxu0 %v7197_v1  ;;  %6566 = vmatprep.subr.bf16.mxu1 %v7211_v62 }
 0x644   :  { %6539 = vmatpush3.bf16.msra.mxu0 %v7198_v2  ;;  %6567 = vmatpush3.bf16.msra.mxu1 %v7212_v18 }
 0x645   :  { %6540 = vmatprep.subr.bf16.mxu0 %v7201_v21 }
 0x647   :  { %v6304_v13 = vpop.f32.mrf.mxu1  ;;  %5560 = vmatmul.mubr.bf16.vlgmr.msra.gmra.mxu1 %v3076_v33 }
 0x648   :  { %6541 = vmatpush3.bf16.msra.mxu0 %v7202_v45 }
 0x649   :  { %6542 = vmatprep.subr.bf16.mxu0 %v7205_v8  ;;  %v6305_v20 = vpop.f32.mrf.mxu1 }
 0x64a   :  { %v6306_v23 = vadd.f32 %v6305_v20, %v6304_v13 }
 0x64b   :  { %v6307_v29 = vpop.f32.mrf.mxu1 }
 0x64c   :  { %6543 = vmatpush3.bf16.msra.mxu0 %v7206_v9 }
 0x64d   :  { %6544 = vmatprep.subr.bf16.mxu0 %v7209_v35  ;;  %v6308_v36 = vpop.f32.mrf.mxu1 }
 0x650   :  { %6545 = vmatpush3.bf16.msra.mxu0 %v7210_v11 }
 0x651   :  { %6574 = vmatprep.subr.bf16.mxu0 %v7213_v25 }
 0x653   :  { %v6282_v46 = vpop.f32.mrf.mxu0  ;;  %5520 = vmatmul.mubr.bf16.vlgmr.msra.gmra.mxu0 %v3074_v41 }
 0x654   :  { %6575 = vmatpush3.bf16.msra.mxu0 %v7214_v27  ;;  %5599 = vmatprep.mubr.bf16.mxu0 %v3079_v53 }
 0x655   :  { %v6283_v43 = vpop.f32.mrf.mxu0  ;;  %6576 = vmatprep.subr.bf16.mxu0 %v7215_v34 }
 0x656   :  { %v6284_v3 = vadd.f32 %v6283_v43, %v6282_v46 }
 0x657   :  { %v6285_v16 = vpop.f32.mrf.mxu0 }
 0x658   :  { %v5042_v32 = vadd.f32 %v6284_v3, %v5907_v30  ;;  %6577 = vmatpush3.bf16.msra.mxu0 %v7216_v42 }
 0x659   :  { %v6286_v24 = vpop.f32.mrf.mxu0  ;;  %6578 = vmatprep.subr.bf16.mxu0 %v7217_v38 }
 0x65a   :  { %v5082_v37 = vadd.f32 %v6306_v23, %v5042_v32 }
 0x65c   :  { %6579 = vmatpush3.bf16.msra.mxu0 %v7218_v39 }
 0x65d   :  { %6580 = vmatprep.subr.bf16.mxu0 %v7219_v44 }
 0x660   :  { %6581 = vmatpush3.bf16.msra.mxu0 %v7220_v47 }
 0x661   :  { %6582 = vmatprep.subr.bf16.mxu0 %v7221_v48 }
 0x664   :  { %6583 = vmatpush3.bf16.msra.mxu0 %v7222_v49 }
 0x665   :  { %6584 = vmatprep.subr.bf16.mxu0 %v7223_v50 }
 0x667   :  { %v6348_v61 = vpop.f32.mrf.mxu1 }
 0x668   :  { %6585 = vmatpush3.bf16.msra.mxu0 %v7224_v54 }
 0x669   :  { %6586 = vmatprep.subr.bf16.mxu0 %v7225_v55  ;;  %v6349_v0 = vpop.f32.mrf.mxu1 }
 0x66a   :  { %v6350_v1 = vadd.f32 %v6349_v0, %v6348_v61 }
 0x66b   :  { %v6351_v4 = vpop.f32.mrf.mxu1 }
 0x66c   :  { %6587 = vmatpush3.bf16.msra.mxu0 %v7226_v56 }
 0x66d   :  { %6588 = vmatprep.subr.bf16.mxu0 %v7227_v57  ;;  %v6352_v21 = vpop.f32.mrf.mxu1 }
 0x670   :  { %6589 = vmatpush3.bf16.msra.mxu0 %v7228_v58 }
 0x673   :  { %v6326_v59 = vpop.f32.mrf.mxu0  ;;  %5600 = vmatmul.mubr.bf16.vlgmr.msra.gmra.mxu0 %v3078_v12 }
 0x675   :  { %v6327_v52 = vpop.f32.mrf.mxu0 }
 0x676   :  { %v6328_v60 = vadd.f32 %v6327_v52, %v6326_v59 }
 0x677   :  { %v6329_v10 = vpop.f32.mrf.mxu0 }
 0x678   :  { %v5122_v63 = vadd.f32 %v6328_v60, %v5082_v37 }
 0x679   :  { %v6330_v2 = vpop.f32.mrf.mxu0 }
 0x67a   :  { %v5162_v5 = vadd.f32 %v6350_v1, %v5122_v63 }
 0x687   :  { %v6392_v7 = vpop.f32.mrf.mxu1 }
 0x689   :  { %v6393_v26 = vpop.f32.mrf.mxu1 }
 0x68a   :  { %v6394_v46 = vadd.f32 %v6393_v26, %v6392_v7 }
 0x68b   :  { %v6395_v11 = vpop.f32.mrf.mxu1 }
 0x68d   :  { %v6396_v62 = vpop.f32.mrf.mxu1 }
 0x693   :  { %v6370_v45 = vpop.f32.mrf.mxu0 }
 0x695   :  { %v6371_v6 = vpop.f32.mrf.mxu0 }
 0x696   :  { %v6372_v8 = vadd.f32 %v6371_v6, %v6370_v45 }
 0x697   :  { %v6373_v9 = vpop.f32.mrf.mxu0 }
 0x698   :  { %v5202_v28 = vadd.f32 %v6372_v8, %v5162_v5 }
 0x699   :  { %v6374_v35 = vpop.f32.mrf.mxu0 }
 0x69a   :  { %v5242_v43 = vadd.f32 %v6394_v46, %v5202_v28 }
 0x6a7   :  { %v6436_v16 = vpop.f32.mrf.mxu1 }
 0x6a9   :  { %v6437_v19 = vpop.f32.mrf.mxu1 }
 0x6aa   :  { %v6438_v20 = vadd.f32 %v6437_v19, %v6436_v16 }
 0x6ab   :  { %v6439_v25 = vpop.f32.mrf.mxu1 }
 0x6ad   :  { %v6440_v23 = vpop.f32.mrf.mxu1 }
 0x6b3   :  { %v6414_v3 = vpop.f32.mrf.mxu0 }
 0x6b5   :  { %v6415_v13 = vpop.f32.mrf.mxu0 }
 0x6b6   :  { %v6416_v15 = vadd.f32 %v6415_v13, %v6414_v3 }
 0x6b7   :  { %v6417_v17 = vpop.f32.mrf.mxu0 }
 0x6b8   :  { %v5282_v18 = vadd.f32 %v6416_v15, %v5242_v43 }
 0x6b9   :  { %v6418_v41 = vpop.f32.mrf.mxu0 }
 0x6ba   :  { %v5322_v22 = vadd.f32 %v6438_v20, %v5282_v18 }
 0x6c7   :  { %v6480_v29 = vpop.f32.mrf.mxu1 }
 0x6c9   :  { %v6481_v32 = vpop.f32.mrf.mxu1 }
 0x6ca   :  { %v6482_v33 = vadd.f32 %v6481_v32, %v6480_v29 }
 0x6cb   :  { %v6483_v36 = vpop.f32.mrf.mxu1 }
 0x6cd   :  { %v6484_v37 = vpop.f32.mrf.mxu1 }
 0x6d3   :  { %v6458_v24 = vpop.f32.mrf.mxu0 }
 0x6d5   :  { %v6459_v14 = vpop.f32.mrf.mxu0 }
 0x6d6   :  { %v6460_v27 = vadd.f32 %v6459_v14, %v6458_v24 }
 0x6d7   :  { %v6461_v30 = vpop.f32.mrf.mxu0 }
 0x6d8   :  { %v5362_v31 = vadd.f32 %v6460_v27, %v5322_v22 }
 0x6d9   :  { %v6462_v34 = vpop.f32.mrf.mxu0 }
 0x6da   :  { %v5402_v42 = vadd.f32 %v6482_v33, %v5362_v31 }
 0x6e7   :  { %v6524_v44 = vpop.f32.mrf.mxu1 }
 0x6e9   :  { %v6525_v48 = vpop.f32.mrf.mxu1 }
 0x6ea   :  { %v6526_v60 = vadd.f32 %v6525_v48, %v6524_v44 }
 0x6eb   :  { %v6527_v50 = vpop.f32.mrf.mxu1 }
 0x6ed   :  { %v6528_v51 = vpop.f32.mrf.mxu1 }
 0x6f3   :  { %v6502_v38 = vpop.f32.mrf.mxu0 }
 0x6f5   :  { %v6503_v39 = vpop.f32.mrf.mxu0 }
 0x6f6   :  { %v6504_v52 = vadd.f32 %v6503_v39, %v6502_v38 }
 0x6f7   :  { %v6505_v47 = vpop.f32.mrf.mxu0 }
 0x6f8   :  { %v5442_v12 = vadd.f32 %v6504_v52, %v5402_v42 }
 0x6f9   :  { %v6506_v49 = vpop.f32.mrf.mxu0 }
 0x6fa   :  { %v5482_v10 = vadd.f32 %v6526_v60, %v5442_v12 }
 0x707   :  { %v6568_v55 = vpop.f32.mrf.mxu1 }
 0x709   :  { %v6569_v57 = vpop.f32.mrf.mxu1 }
 0x70a   :  { %v6570_v0 = vadd.f32 %v6569_v57, %v6568_v55 }
 0x70b   :  { %v6571_v59 = vpop.f32.mrf.mxu1 }
 0x70d   :  { %v6572_v40 = vpop.f32.mrf.mxu1 }
 0x713   :  { %v6546_v53 = vpop.f32.mrf.mxu0 }
 0x715   :  { %v6547_v54 = vpop.f32.mrf.mxu0 }
 0x716   :  { %v6548_v61 = vadd.f32 %v6547_v54, %v6546_v53 }
 0x717   :  { %v6549_v56 = vpop.f32.mrf.mxu0 }
 0x718   :  { %v5522_v63 = vadd.f32 %v6548_v61, %v5482_v10 }
 0x719   :  { %v6550_v58 = vpop.f32.mrf.mxu0 }
 0x71a   :  { %v5562_v4 = vadd.f32 %v6570_v0, %v5522_v63 }
 0x733   :  { %v6590_v1 = vpop.f32.mrf.mxu0 }
 0x735   :  { %v6591_v2 = vpop.f32.mrf.mxu0 }
 0x736   :  { %v6592_v5 = vadd.f32 %v6591_v2, %v6590_v1 }
 0x737   :  { %v6593_v21 = vpop.f32.mrf.mxu0 }
 0x738   :  { %v5602_v45 = vadd.f32 %v6592_v5, %v5562_v4 }
 0x739   :  { %v6594_v6 = vpop.f32.mrf.mxu0 }
 0x73a   :  { %5608 = vst.msk [vmem:[%s9231_s11] sm:$0xff] %vm5607_vm2, %v5602_v45 }

</bundles_post_ra>
